<compile_context>
chip_gen: v6e
topology: v6e:2x2x1
jax: 0.10.0
libtpu: 0.0.40
codegen_flags: <defaults>
</compile_context>

<pallas_src>
import functools
import math

import jax
import jax.numpy as jnp
from jax import lax
from jax.experimental import pallas as pl
from jax.experimental.pallas import tpu as pltpu

LRELU_SLOPE = 0.2
LRELU_SCALE = math.sqrt(2.0)        # FusedLeakyReLU scale
INV_SQRT2 = 1.0 / math.sqrt(2.0)    # residual (out + skip) / sqrt(2)


# ---------------------------------------------------------------------------
# Pallas kernels: direct conv as unrolled shifted-slice matmuls, fused epilogue
# ---------------------------------------------------------------------------
def _lrelu(x):
    return jnp.where(x >= 0.0, x, LRELU_SLOPE * x) * LRELU_SCALE


def _accum_taps(x_ref, w_ref, offs, cin, mflat, n):
    acc = jnp.zeros((mflat, n), jnp.float32)
    for t, off in enumerate(offs):                       # static unroll (<= 9 taps)
        acc = acc + jnp.dot(x_ref[off:off + mflat, :],
                            w_ref[t * cin:(t + 1) * cin, :],
                            preferred_element_type=jnp.float32)
    return acc


def _conv_act_kernel(x_ref, w_ref, b_ref, o_ref, *, offs, cin, mflat):
    n = o_ref.shape[-1]
    out = _accum_taps(x_ref, w_ref, offs, cin, mflat, n) + b_ref[...]
    o_ref[...] = _lrelu(out).astype(o_ref.dtype)


def _conv_act_skipconv_kernel(x_ref, w_ref, b_ref, xs_ref, ws_ref, o_ref, *,
                              offs, cin, offs_s, cin_s, mflat):
    n = o_ref.shape[-1]
    out = _lrelu(_accum_taps(x_ref, w_ref, offs, cin, mflat, n) + b_ref[...])
    skip = _accum_taps(xs_ref, ws_ref, offs_s, cin_s, mflat, n)
    o_ref[...] = ((out + skip) * INV_SQRT2).astype(o_ref.dtype)


def _conv_act_res_kernel(x_ref, w_ref, b_ref, res_ref, o_ref, *, offs, cin, mflat):
    n = o_ref.shape[-1]
    out = _lrelu(_accum_taps(x_ref, w_ref, offs, cin, mflat, n) + b_ref[...])
    res = res_ref[...].astype(jnp.float32)
    o_ref[...] = ((out + res) * INV_SQRT2).astype(o_ref.dtype)


def _round_up(x, m):
    return (x + m - 1) // m * m


def _conv_pallas(x_flat, w_mat, bias, *, offs, cin, mflat, out_dtype,
                 skip_flat=None, skip_w=None, skip_offs=None, skip_cin=None,
                 res_flat=None):
    """Fused conv + FusedLeakyReLU [+ fused skip conv or residual, /sqrt(2)].

    x_flat : (B, Lx, cin) bf16, spatially padded row-flattened NHWC activation.
    w_mat  : (len(offs)*cin, N) bf16 tap-major weight matrix. bias: (N,) f32.
    Returns (B, mflat, Np); garbage columns (flat w >= out width) are sliced off
    by the caller.
    """
    B, Lx, cx = x_flat.shape
    Ktot, N = w_mat.shape
    assert Ktot == len(offs) * cin and cx == cin

    # Output-channel tiling: one full-N block up to 256, else 256-wide blocks.
    if N <= 256:
        tn, Np = N, N
    else:
        tn, Np = 256, _round_up(N, 256)
    if Np != N:
        w_mat = jnp.pad(w_mat, ((0, 0), (0, Np - N)))
        bias = jnp.pad(bias, (0, Np - N))
        if skip_w is not None:
            skip_w = jnp.pad(skip_w, ((0, 0), (0, Np - N)))
        if res_flat is not None:
            res_flat = jnp.pad(res_flat, ((0, 0), (0, 0), (0, Np - N)))
    grid = (B, Np // tn)

    bias2d = bias.reshape(1, Np).astype(jnp.float32)
    out_size = jnp.dtype(out_dtype).itemsize

    in_specs = [
        pl.BlockSpec((None, Lx, cin), lambda b, n: (b, 0, 0)),
        pl.BlockSpec((Ktot, tn), lambda b, n: (0, n)),
        pl.BlockSpec((1, tn), lambda b, n: (0, n)),
    ]
    args = [x_flat, w_mat, bias2d]
    flops = 2 * B * mflat * Ktot * Np
    bytes_acc = (x_flat.size * 2 + w_mat.size * 2 + bias2d.size * 4
                 + B * mflat * Np * out_size)
    vmem = Lx * cin * 2 + Ktot * tn * 2 + tn * 4 + mflat * tn * out_size

    if skip_flat is not None:
        Ls, cs = skip_flat.shape[1:]
        Ks = skip_w.shape[0]
        assert Ks == len(skip_offs) * skip_cin and cs == skip_cin
        in_specs += [
            pl.BlockSpec((None, Ls, skip_cin), lambda b, n: (b, 0, 0)),
            pl.BlockSpec((Ks, tn), lambda b, n: (0, n)),
        ]
        args += [skip_flat, skip_w]
        kernel = functools.partial(_conv_act_skipconv_kernel, offs=tuple(offs),
                                   cin=cin, offs_s=tuple(skip_offs),
                                   cin_s=skip_cin, mflat=mflat)
        flops += 2 * B * mflat * Ks * Np
        bytes_acc += skip_flat.size * 2 + skip_w.size * 2
        vmem += Ls * skip_cin * 2 + Ks * tn * 2
    elif res_flat is not None:
        in_specs.append(pl.BlockSpec((None, mflat, tn), lambda b, n: (b, 0, n)))
        args.append(res_flat)
        kernel = functools.partial(_conv_act_res_kernel, offs=tuple(offs),
                                   cin=cin, mflat=mflat)
        bytes_acc += res_flat.size * res_flat.dtype.itemsize
        vmem += mflat * tn * res_flat.dtype.itemsize
    else:
        kernel = functools.partial(_conv_act_kernel, offs=tuple(offs),
                                   cin=cin, mflat=mflat)

    # Double-buffered operands + f32 accumulator headroom; cap at 64 MiB (v7x safe).
    vmem_limit = int(min(64 << 20, max(32 << 20, 3 * vmem + mflat * tn * 8)))

    return pl.pallas_call(
        kernel,
        out_shape=jax.ShapeDtypeStruct((B, mflat, Np), out_dtype),
        grid_spec=pltpu.PrefetchScalarGridSpec(
            num_scalar_prefetch=0,
            grid=grid,
            in_specs=in_specs,
            out_specs=pl.BlockSpec((None, mflat, tn), lambda b, n: (b, 0, n)),
        ),
        compiler_params=pltpu.CompilerParams(
            dimension_semantics=("parallel", "parallel"),
            vmem_limit_bytes=vmem_limit),
        cost_estimate=pl.CostEstimate(flops=int(flops), transcendentals=0,
                                      bytes_accessed=int(bytes_acc)),
    )(*args)


# ---------------------------------------------------------------------------
# XLA-side layout plumbing (1x-sized data movement only, no patch expansion)
# ---------------------------------------------------------------------------
def _pad_hw(x, pt, pb, plf, prr):                      # x: NHWC
    return jnp.pad(x, ((0, 0), (pt, pb), (plf, prr), (0, 0)))


def _space_to_depth(x):
    """(B, H, W, C), H/W even -> (B, H//2, W//2, 4C); channel = (2*di+dj)*C + c."""
    B, H, W, C = x.shape
    x = x.reshape(B, H // 2, 2, W // 2, 2, C)
    x = jnp.transpose(x, (0, 1, 3, 2, 4, 5))
    return x.reshape(B, H // 2, W // 2, 4 * C)


def _flatten_rows(x, need):
    """(B, Hp, Wp, C) -> (B, max(Hp*Wp, need), C) row-major flat + zero tail."""
    B, Hp, Wp, C = x.shape
    f = x.reshape(B, Hp * Wp, C)
    if need > Hp * Wp:
        f = jnp.pad(f, ((0, 0), (0, need - Hp * Wp), (0, 0)))
    return f


def _tap_offsets(kh, kw, wp):
    return [i * wp + j for i in range(kh) for j in range(kw)]


def _w_to_mat(w):
    """(O, C, kh, kw) -> (kh*kw*C, O), tap-major (i, j), matching _tap_offsets."""
    O, C, kh, kw = w.shape
    return jnp.transpose(w, (2, 3, 1, 0)).reshape(kh * kw * C, O)


def _w_to_mat_s2d(w):
    """(O, C, K, K), K even -> (kk*kk*4C, O) for the space-to-depth input layout."""
    O, C, K, _ = w.shape
    kk = K // 2
    w = w.reshape(O, C, kk, 2, kk, 2)
    w = jnp.transpose(w, (2, 4, 3, 5, 1, 0))           # (i, j, di, dj, C, O)
    return w.reshape(kk * kk * 4 * C, O)


def _blur_kernel_2d():
    k1 = jnp.array([1.0, 3.0, 3.0, 1.0], jnp.float32)
    k2 = jnp.outer(k1, k1)
    return k2 / jnp.sum(k2)                            # symmetric -> flip is a no-op


def _fuse_blur_into_conv(w, k2):
    """Effective kernel of (Blur -> conv w) == full 2-D convolution of w with k2."""
    O, C, kh, kw = w.shape
    bh, bw = k2.shape
    oh, ow = kh + bh - 1, kw + bw - 1
    wp = jnp.pad(w, ((0, 0), (0, 0), (bh - 1, bh - 1), (bw - 1, bw - 1)))
    out = jnp.zeros((O, C, oh, ow), jnp.float32)
    for i in range(bh):
        for j in range(bw):
            out = out + k2[i, j] * wp[:, :, i:i + oh, j:j + ow]
    return out


# ---------------------------------------------------------------------------
# ResBlock forward (matches the PyTorch module semantics): 2 pallas_calls total
# ---------------------------------------------------------------------------
def res_block_forward(params, x_nchw, *, downsample=True):
    x = jnp.transpose(x_nchw, (0, 2, 3, 1)).astype(jnp.bfloat16)   # NHWC, cast once
    B, H, W, Cin = x.shape
    Cout = params["conv1_w"].shape[0]

    scale1 = 1.0 / math.sqrt(Cin * 9)
    scale2 = 1.0 / math.sqrt(Cout * 9)
    scale_s = 1.0 / math.sqrt(Cin)
    k2 = _blur_kernel_2d()

    # --- conv1: EqualConv2d 3x3 stride 1 pad 1 + FusedLeakyReLU (bf16 result) ----
    wp1 = W + 2
    offs1 = _tap_offsets(3, 3, wp1)
    m1 = H * wp1
    x1 = _flatten_rows(_pad_hw(x, 1, 1, 1, 1), max(offs1) + m1)
    w1 = _w_to_mat(params["conv1_w"] * scale1).astype(jnp.bfloat16)
    out1f = _conv_pallas(x1, w1, params["conv1_b"].astype(jnp.float32),
                         offs=offs1, cin=Cin, mflat=m1, out_dtype=jnp.bfloat16)
    out1 = out1f.reshape(B, H, wp1, -1)[:, :, :W, :Cout]           # (B,H,W,Cout) bf16

    if downsample:
        assert H % 2 == 0 and W % 2 == 0
        oh, ow = H // 2, W // 2
        wp2 = ow + 2
        # conv2: Blur(pad 2,2)+3x3 stride-2 == 6x6 stride-2 == s2d 3x3 over 4*Cout
        a2 = _space_to_depth(_pad_hw(out1, 2, 2, 2, 2))            # (B,oh+2,ow+2,4Cout)
        offs2 = _tap_offsets(3, 3, wp2)
        m2 = oh * wp2
        a2f = _flatten_rows(a2, max(offs2) + m2)
        w2 = _w_to_mat_s2d(
            _fuse_blur_into_conv(params["conv2_w"] * scale2, k2)).astype(jnp.bfloat16)
        # skip: Blur(pad 1,1)+1x1 stride-2 == 4x4 stride-2 == s2d 2x2 over 4*Cin,
        # right-padded to conv2's flat row stride so the add fuses elementwise.
        asd = _space_to_depth(_pad_hw(x, 1, 1, 1, 1))              # (B,oh+1,ow+1,4Cin)
        asd = jnp.pad(asd, ((0, 0), (0, 0), (0, wp2 - asd.shape[2]), (0, 0)))
        offs_s = _tap_offsets(2, 2, wp2)
        asf = _flatten_rows(asd, max(offs_s) + m2)
        ws = _w_to_mat_s2d(
            _fuse_blur_into_conv(params["skip_w"] * scale_s, k2)).astype(jnp.bfloat16)

        outf = _conv_pallas(a2f, w2, params["conv2_b"].astype(jnp.float32),
                            offs=offs2, cin=4 * Cout, mflat=m2,
                            out_dtype=jnp.float32,
                            skip_flat=asf, skip_w=ws, skip_offs=offs_s,
                            skip_cin=4 * Cin)
        out = outf.reshape(B, oh, wp2, -1)[:, :, :ow, :Cout]
    else:
        oh, ow = H, W
        wp2 = W + 2
        offs2 = _tap_offsets(3, 3, wp2)
        m2 = H * wp2
        a2f = _flatten_rows(_pad_hw(out1, 1, 1, 1, 1), max(offs2) + m2)
        w2 = _w_to_mat(params["conv2_w"] * scale2).astype(jnp.bfloat16)
        if params.get("skip_w") is not None:
            # 1x1 EqualConv2d skip (no bias / activation), fused into conv2's call
            asf = _flatten_rows(_pad_hw(x, 0, 0, 0, 2), m2)
            ws = _w_to_mat(params["skip_w"] * scale_s).astype(jnp.bfloat16)
            outf = _conv_pallas(a2f, w2, params["conv2_b"].astype(jnp.float32),
                                offs=offs2, cin=Cout, mflat=m2,
                                out_dtype=jnp.float32,
                                skip_flat=asf, skip_w=ws, skip_offs=(0,),
                                skip_cin=Cin)
        else:
            # identity skip (Cin == Cout), passed as a fused residual operand
            resf = _flatten_rows(_pad_hw(x, 0, 0, 0, 2), m2)
            outf = _conv_pallas(a2f, w2, params["conv2_b"].astype(jnp.float32),
                                offs=offs2, cin=Cout, mflat=m2,
                                out_dtype=jnp.float32, res_flat=resf)
        out = outf.reshape(B, oh, wp2, -1)[:, :, :ow, :Cout]

    return jnp.transpose(out, (0, 3, 1, 2)).astype(jnp.float32)    # back to NCHW


# ---------------------------------------------------------------------------
# Pure-JAX f32 reference of the PyTorch module (for tolerance checking)
# ---------------------------------------------------------------------------
def _ref_res_block(params, x_nchw, downsample):
    x = x_nchw.astype(jnp.float32)

    def conv(v, w, stride, pad):
        return lax.conv_general_dilated(
            v, w, window_strides=(stride, stride),
            padding=((pad, pad), (pad, pad)),
            dimension_numbers=("NCHW", "OIHW", "NCHW"))

    def blur(v, pad):
        C = v.shape[1]
        k = jnp.tile(_blur_kernel_2d().reshape(1, 1, 4, 4), (C, 1, 1, 1))
        return lax.conv_general_dilated(
            v, k, window_strides=(1, 1), padding=((pad, pad), (pad, pad)),
            dimension_numbers=("NCHW", "OIHW", "NCHW"), feature_group_count=C)

    def flrelu(v, b):
        v = v + b.reshape(1, -1, 1, 1)
        return jnp.where(v >= 0.0, v, LRELU_SLOPE * v) * LRELU_SCALE

    Cin = x.shape[1]
    Cout = params["conv1_w"].shape[0]
    s1 = 1.0 / math.sqrt(Cin * 9)
    s2 = 1.0 / math.sqrt(Cout * 9)
    ss = 1.0 / math.sqrt(Cin)

    out = flrelu(conv(x, params["conv1_w"] * s1, 1, 1), params["conv1_b"])
    if downsample:
        out = flrelu(conv(blur(out, 2), params["conv2_w"] * s2, 2, 0),
                     params["conv2_b"])
        skip = conv(blur(x, 1), params["skip_w"] * ss, 2, 0)
    else:
        out = flrelu(conv(out, params["conv2_w"] * s2, 1, 1), params["conv2_b"])
        if params.get("skip_w") is not None:
            skip = conv(x, params["skip_w"] * ss, 1, 0)
        else:
            skip = x
    return (out + skip) * INV_SQRT2


# ---------------------------------------------------------------------------
# Deterministic parameter init (shapes as in the PyTorch ResBlock.__init__)
# ---------------------------------------------------------------------------
def init_res_block_params(key, in_channel, out_channel, downsample):
    ka, kb, kc = jax.random.split(key, 3)
    params = {
        "conv1_w": jax.random.normal(ka, (out_channel, in_channel, 3, 3), jnp.float32),
        "conv1_b": jnp.zeros((out_channel,), jnp.float32),     # FusedLeakyReLU bias
        "conv2_w": jax.random.normal(kb, (out_channel, out_channel, 3, 3), jnp.float32),
        "conv2_b": jnp.zeros((out_channel,), jnp.float32),
    }
    if downsample or in_channel != out_channel:
        params["skip_w"] = jax.random.normal(
            kc, (out_channel, in_channel, 1, 1), jnp.float32)
    else:
        params["skip_w"] = None
    return params


def _check(out, ref, shape):
    assert out.shape == shape, (out.shape, shape)
    assert bool(jnp.all(jnp.isfinite(out)))
    err = float(jnp.max(jnp.abs(out.astype(jnp.float32) - ref)))
    assert err < 0.15, f"max abs err {err}"


if __name__ == "__main__":
    key = jax.random.PRNGKey(0)
    pkey, p2key, p3key, xkey, x2key, x3key = jax.random.split(key, 6)

    # Config 1: downsampling ResBlock (StyleGAN2 discriminator style)
    B, Cin, Cout, H = 2, 64, 64, 16
    params = init_res_block_params(pkey, Cin, Cout, downsample=True)
    x = jax.random.normal(xkey, (B, Cin, H, H), dtype=jnp.float32)      # NCHW
    fwd_ds = jax.jit(functools.partial(res_block_forward, downsample=True))
    out = jax.block_until_ready(fwd_ds(params, x))
    _check(out, _ref_res_block(params, x, True), (B, Cout, H // 2, H // 2))

    # Config 2: non-downsampling, channel change (1x1 conv skip fused into conv2)
    Cin2, Cout2 = 32, 64
    params2 = init_res_block_params(p2key, Cin2, Cout2, downsample=False)
    x2 = jax.random.normal(x2key, (B, Cin2, H, H), dtype=jnp.float32)
    fwd = jax.jit(functools.partial(res_block_forward, downsample=False))
    out2 = jax.block_until_ready(fwd(params2, x2))
    _check(out2, _ref_res_block(params2, x2, False), (B, Cout2, H, H))

    # Config 3: non-downsampling, identity skip (fused residual operand)
    Cin3 = Cout3 = 32
    params3 = init_res_block_params(p3key, Cin3, Cout3, downsample=False)
    x3 = jax.random.normal(x3key, (B, Cin3, H, H), dtype=jnp.float32)
    out3 = jax.block_until_ready(fwd(params3, x3))
    _check(out3, _ref_res_block(params3, x3, False), (B, Cout3, H, H))

    print("KERNEL_OK")
</pallas_src>

<mosaic_0001>
module attributes {stable_mosaic.version = 11 : i64} {
  func.func @_conv_act_kernel(%arg0: i32, %arg1: i32, %arg2: memref<1x326x64xbf16, #tpu.memory_space<vmem>>, %arg3: memref<576x64xbf16, #tpu.memory_space<vmem>>, %arg4: memref<1x64xf32, #tpu.memory_space<vmem>>, %arg5: memref<1x288x64xbf16, #tpu.memory_space<vmem>>) attributes {dimension_semantics = [#tpu.dimension_semantics<parallel>, #tpu.dimension_semantics<parallel>], iteration_bounds = array<i64: 2, 1>, scalar_prefetch = 0 : i64, scratch_operands = 0 : i64, tpu.core_type = #tpu.core_type<tc>, window_params = [{transform_indices = @transform_0, window_bounds = array<i64: 1, 326, 64>}, {transform_indices = @transform_1, window_bounds = array<i64: 576, 64>}, {transform_indices = @transform_2, window_bounds = array<i64: 1, 64>}, {transform_indices = @transform_3, window_bounds = array<i64: 1, 288, 64>}]} {
    %cst = arith.constant 0.000000e+00 : f32
    %0 = vector.broadcast %cst : f32 to vector<288x64xf32>
    %c0 = arith.constant 0 : index
    %c0_0 = arith.constant 0 : index
    %c0_1 = arith.constant 0 : index
    %1 = vector.load %arg2[%c0, %c0_0, %c0_1] : memref<1x326x64xbf16, #tpu.memory_space<vmem>>, vector<1x288x64xbf16>
    %2 = vector.shape_cast %1 : vector<1x288x64xbf16> to vector<288x64xbf16>
    %c0_2 = arith.constant 0 : index
    %c0_3 = arith.constant 0 : index
    %3 = vector.load %arg3[%c0_2, %c0_3] : memref<576x64xbf16, #tpu.memory_space<vmem>>, vector<64x64xbf16>
    %cst_4 = arith.constant dense<0.000000e+00> : vector<288x64xf32>
    %4 = tpu.matmul %2, %3, %cst_4 {dimension_numbers = #tpu.dot_dimension_numbers<[1], [0], [0], [1], [0, 0, 1, 1], [], []>} : vector<288x64xbf16>, vector<64x64xbf16>, vector<288x64xf32> -> vector<288x64xf32>
    %5 = arith.addf %0, %4 : vector<288x64xf32>
    %c0_5 = arith.constant 0 : index
    %c1 = arith.constant 1 : index
    %c0_6 = arith.constant 0 : index
    %6 = vector.load %arg2[%c0_5, %c1, %c0_6] : memref<1x326x64xbf16, #tpu.memory_space<vmem>>, vector<1x288x64xbf16>
    %7 = vector.shape_cast %6 : vector<1x288x64xbf16> to vector<288x64xbf16>
    %c64 = arith.constant 64 : index
    %c0_7 = arith.constant 0 : index
    %8 = vector.load %arg3[%c64, %c0_7] : memref<576x64xbf16, #tpu.memory_space<vmem>>, vector<64x64xbf16>
    %cst_8 = arith.constant dense<0.000000e+00> : vector<288x64xf32>
    %9 = tpu.matmul %7, %8, %cst_8 {dimension_numbers = #tpu.dot_dimension_numbers<[1], [0], [0], [1], [0, 0, 1, 1], [], []>} : vector<288x64xbf16>, vector<64x64xbf16>, vector<288x64xf32> -> vector<288x64xf32>
    %10 = arith.addf %5, %9 : vector<288x64xf32>
    %c0_9 = arith.constant 0 : index
    %c2 = arith.constant 2 : index
    %c0_10 = arith.constant 0 : index
    %11 = vector.load %arg2[%c0_9, %c2, %c0_10] : memref<1x326x64xbf16, #tpu.memory_space<vmem>>, vector<1x288x64xbf16>
    %12 = vector.shape_cast %11 : vector<1x288x64xbf16> to vector<288x64xbf16>
    %c128 = arith.constant 128 : index
    %c0_11 = arith.constant 0 : index
    %13 = vector.load %arg3[%c128, %c0_11] : memref<576x64xbf16, #tpu.memory_space<vmem>>, vector<64x64xbf16>
    %cst_12 = arith.constant dense<0.000000e+00> : vector<288x64xf32>
    %14 = tpu.matmul %12, %13, %cst_12 {dimension_numbers = #tpu.dot_dimension_numbers<[1], [0], [0], [1], [0, 0, 1, 1], [], []>} : vector<288x64xbf16>, vector<64x64xbf16>, vector<288x64xf32> -> vector<288x64xf32>
    %15 = arith.addf %10, %14 : vector<288x64xf32>
    %c0_13 = arith.constant 0 : index
    %c18 = arith.constant 18 : index
    %c0_14 = arith.constant 0 : index
    %16 = vector.load %arg2[%c0_13, %c18, %c0_14] : memref<1x326x64xbf16, #tpu.memory_space<vmem>>, vector<1x288x64xbf16>
    %17 = vector.shape_cast %16 : vector<1x288x64xbf16> to vector<288x64xbf16>
    %c192 = arith.constant 192 : index
    %c0_15 = arith.constant 0 : index
    %18 = vector.load %arg3[%c192, %c0_15] : memref<576x64xbf16, #tpu.memory_space<vmem>>, vector<64x64xbf16>
    %cst_16 = arith.constant dense<0.000000e+00> : vector<288x64xf32>
    %19 = tpu.matmul %17, %18, %cst_16 {dimension_numbers = #tpu.dot_dimension_numbers<[1], [0], [0], [1], [0, 0, 1, 1], [], []>} : vector<288x64xbf16>, vector<64x64xbf16>, vector<288x64xf32> -> vector<288x64xf32>
    %20 = arith.addf %15, %19 : vector<288x64xf32>
    %c0_17 = arith.constant 0 : index
    %c19 = arith.constant 19 : index
    %c0_18 = arith.constant 0 : index
    %21 = vector.load %arg2[%c0_17, %c19, %c0_18] : memref<1x326x64xbf16, #tpu.memory_space<vmem>>, vector<1x288x64xbf16>
    %22 = vector.shape_cast %21 : vector<1x288x64xbf16> to vector<288x64xbf16>
    %c256 = arith.constant 256 : index
    %c0_19 = arith.constant 0 : index
    %23 = vector.load %arg3[%c256, %c0_19] : memref<576x64xbf16, #tpu.memory_space<vmem>>, vector<64x64xbf16>
    %cst_20 = arith.constant dense<0.000000e+00> : vector<288x64xf32>
    %24 = tpu.matmul %22, %23, %cst_20 {dimension_numbers = #tpu.dot_dimension_numbers<[1], [0], [0], [1], [0, 0, 1, 1], [], []>} : vector<288x64xbf16>, vector<64x64xbf16>, vector<288x64xf32> -> vector<288x64xf32>
    %25 = arith.addf %20, %24 : vector<288x64xf32>
    %c0_21 = arith.constant 0 : index
    %c20 = arith.constant 20 : index
    %c0_22 = arith.constant 0 : index
    %26 = vector.load %arg2[%c0_21, %c20, %c0_22] : memref<1x326x64xbf16, #tpu.memory_space<vmem>>, vector<1x288x64xbf16>
    %27 = vector.shape_cast %26 : vector<1x288x64xbf16> to vector<288x64xbf16>
    %c320 = arith.constant 320 : index
    %c0_23 = arith.constant 0 : index
    %28 = vector.load %arg3[%c320, %c0_23] : memref<576x64xbf16, #tpu.memory_space<vmem>>, vector<64x64xbf16>
    %cst_24 = arith.constant dense<0.000000e+00> : vector<288x64xf32>
    %29 = tpu.matmul %27, %28, %cst_24 {dimension_numbers = #tpu.dot_dimension_numbers<[1], [0], [0], [1], [0, 0, 1, 1], [], []>} : vector<288x64xbf16>, vector<64x64xbf16>, vector<288x64xf32> -> vector<288x64xf32>
    %30 = arith.addf %25, %29 : vector<288x64xf32>
    %c0_25 = arith.constant 0 : index
    %c36 = arith.constant 36 : index
    %c0_26 = arith.constant 0 : index
    %31 = vector.load %arg2[%c0_25, %c36, %c0_26] : memref<1x326x64xbf16, #tpu.memory_space<vmem>>, vector<1x288x64xbf16>
    %32 = vector.shape_cast %31 : vector<1x288x64xbf16> to vector<288x64xbf16>
    %c384 = arith.constant 384 : index
    %c0_27 = arith.constant 0 : index
    %33 = vector.load %arg3[%c384, %c0_27] : memref<576x64xbf16, #tpu.memory_space<vmem>>, vector<64x64xbf16>
    %cst_28 = arith.constant dense<0.000000e+00> : vector<288x64xf32>
    %34 = tpu.matmul %32, %33, %cst_28 {dimension_numbers = #tpu.dot_dimension_numbers<[1], [0], [0], [1], [0, 0, 1, 1], [], []>} : vector<288x64xbf16>, vector<64x64xbf16>, vector<288x64xf32> -> vector<288x64xf32>
    %35 = arith.addf %30, %34 : vector<288x64xf32>
    %c0_29 = arith.constant 0 : index
    %c37 = arith.constant 37 : index
    %c0_30 = arith.constant 0 : index
    %36 = vector.load %arg2[%c0_29, %c37, %c0_30] : memref<1x326x64xbf16, #tpu.memory_space<vmem>>, vector<1x288x64xbf16>
    %37 = vector.shape_cast %36 : vector<1x288x64xbf16> to vector<288x64xbf16>
    %c448 = arith.constant 448 : index
    %c0_31 = arith.constant 0 : index
    %38 = vector.load %arg3[%c448, %c0_31] : memref<576x64xbf16, #tpu.memory_space<vmem>>, vector<64x64xbf16>
    %cst_32 = arith.constant dense<0.000000e+00> : vector<288x64xf32>
    %39 = tpu.matmul %37, %38, %cst_32 {dimension_numbers = #tpu.dot_dimension_numbers<[1], [0], [0], [1], [0, 0, 1, 1], [], []>} : vector<288x64xbf16>, vector<64x64xbf16>, vector<288x64xf32> -> vector<288x64xf32>
    %40 = arith.addf %35, %39 : vector<288x64xf32>
    %c0_33 = arith.constant 0 : index
    %c38 = arith.constant 38 : index
    %c0_34 = arith.constant 0 : index
    %41 = vector.load %arg2[%c0_33, %c38, %c0_34] : memref<1x326x64xbf16, #tpu.memory_space<vmem>>, vector<1x288x64xbf16>
    %42 = vector.shape_cast %41 : vector<1x288x64xbf16> to vector<288x64xbf16>
    %c512 = arith.constant 512 : index
    %c0_35 = arith.constant 0 : index
    %43 = vector.load %arg3[%c512, %c0_35] : memref<576x64xbf16, #tpu.memory_space<vmem>>, vector<64x64xbf16>
    %cst_36 = arith.constant dense<0.000000e+00> : vector<288x64xf32>
    %44 = tpu.matmul %42, %43, %cst_36 {dimension_numbers = #tpu.dot_dimension_numbers<[1], [0], [0], [1], [0, 0, 1, 1], [], []>} : vector<288x64xbf16>, vector<64x64xbf16>, vector<288x64xf32> -> vector<288x64xf32>
    %45 = arith.addf %40, %44 : vector<288x64xf32>
    %c0_37 = arith.constant 0 : index
    %c0_38 = arith.constant 0 : index
    %46 = vector.load %arg4[%c0_37, %c0_38] : memref<1x64xf32, #tpu.memory_space<vmem>>, vector<1x64xf32>
    %47 = vector.broadcast %46 : vector<1x64xf32> to vector<288x64xf32>
    %48 = arith.addf %45, %47 : vector<288x64xf32>
    %cst_39 = arith.constant 0.000000e+00 : f32
    %49 = vector.broadcast %cst_39 : f32 to vector<288x64xf32>
    %50 = arith.cmpf oge, %48, %49 : vector<288x64xf32>
    %cst_40 = arith.constant 2.000000e-01 : f32
    %51 = vector.broadcast %cst_40 : f32 to vector<288x64xf32>
    %52 = arith.mulf %51, %48 : vector<288x64xf32>
    %53 = arith.select %50, %48, %52 : vector<288x64xi1>, vector<288x64xf32>
    %cst_41 = arith.constant 1.41421354 : f32
    %54 = vector.broadcast %cst_41 : f32 to vector<288x64xf32>
    %55 = arith.mulf %53, %54 : vector<288x64xf32>
    %56 = arith.truncf %55 : vector<288x64xf32> to vector<288x64xbf16>
    %c0_42 = arith.constant 0 : index
    %c0_43 = arith.constant 0 : index
    %c0_44 = arith.constant 0 : index
    %57 = vector.load %arg5[%c0_42, %c0_43, %c0_44] : memref<1x288x64xbf16, #tpu.memory_space<vmem>>, vector<1x288x64xbf16>
    %58 = vector.shape_cast %57 : vector<1x288x64xbf16> to vector<288x64xbf16>
    %59 = vector.shape_cast %56 : vector<288x64xbf16> to vector<1x288x64xbf16>
    tpu.vector_store %arg5[%c0_42, %c0_43, %c0_44], %59 {strides = array<i32>} : memref<1x288x64xbf16, #tpu.memory_space<vmem>>, vector<1x288x64xbf16>,
    return
  }
  func.func @transform_0(%arg0: i32, %arg1: i32) -> (i32, i32, i32) {
    %c0_i32 = arith.constant 0 : i32
    %c0_i32_0 = arith.constant 0 : i32
    %c0_i32_1 = arith.constant 0 : i32
    return %arg0, %c0_i32, %c0_i32_0 : i32, i32, i32
  }
  func.func @transform_1(%arg0: i32, %arg1: i32) -> (i32, i32) {
    %c0_i32 = arith.constant 0 : i32
    %c0_i32_0 = arith.constant 0 : i32
    return %c0_i32, %arg1 : i32, i32
  }
  func.func @transform_2(%arg0: i32, %arg1: i32) -> (i32, i32) {
    %c0_i32 = arith.constant 0 : i32
    %c0_i32_0 = arith.constant 0 : i32
    return %c0_i32, %arg1 : i32, i32
  }
  func.func @transform_3(%arg0: i32, %arg1: i32) -> (i32, i32, i32) {
    %c0_i32 = arith.constant 0 : i32
    %c0_i32_0 = arith.constant 0 : i32
    return %arg0, %c0_i32, %arg1 : i32, i32, i32
  }
}

module attributes {stable_mosaic.version = 11 : i64} {
  func.func @_conv_act_skipconv_kernel(%arg0: i32, %arg1: i32, %arg2: memref<1x102x256xbf16, #tpu.memory_space<vmem>>, %arg3: memref<2304x64xbf16, #tpu.memory_space<vmem>>, %arg4: memref<1x64xf32, #tpu.memory_space<vmem>>, %arg5: memref<1x91x256xbf16, #tpu.memory_space<vmem>>, %arg6: memref<1024x64xbf16, #tpu.memory_space<vmem>>, %arg7: memref<1x80x64xf32, #tpu.memory_space<vmem>>) attributes {dimension_semantics = [#tpu.dimension_semantics<parallel>, #tpu.dimension_semantics<parallel>], iteration_bounds = array<i64: 2, 1>, scalar_prefetch = 0 : i64, scratch_operands = 0 : i64, tpu.core_type = #tpu.core_type<tc>, window_params = [{transform_indices = @transform_0, window_bounds = array<i64: 1, 102, 256>}, {transform_indices = @transform_1, window_bounds = array<i64: 2304, 64>}, {transform_indices = @transform_2, window_bounds = array<i64: 1, 64>}, {transform_indices = @transform_3, window_bounds = array<i64: 1, 91, 256>}, {transform_indices = @transform_4, window_bounds = array<i64: 1024, 64>}, {transform_indices = @transform_5, window_bounds = array<i64: 1, 80, 64>}]} {
    %cst = arith.constant 0.000000e+00 : f32
    %0 = vector.broadcast %cst : f32 to vector<80x64xf32>
    %c0 = arith.constant 0 : index
    %c0_0 = arith.constant 0 : index
    %c0_1 = arith.constant 0 : index
    %1 = vector.load %arg2[%c0, %c0_0, %c0_1] : memref<1x102x256xbf16, #tpu.memory_space<vmem>>, vector<1x80x256xbf16>
    %2 = vector.shape_cast %1 : vector<1x80x256xbf16> to vector<80x256xbf16>
    %c0_2 = arith.constant 0 : index
    %c0_3 = arith.constant 0 : index
    %3 = vector.load %arg3[%c0_2, %c0_3] : memref<2304x64xbf16, #tpu.memory_space<vmem>>, vector<256x64xbf16>
    %cst_4 = arith.constant dense<0.000000e+00> : vector<80x64xf32>
    %4 = tpu.matmul %2, %3, %cst_4 {dimension_numbers = #tpu.dot_dimension_numbers<[1], [0], [0], [1], [0, 0, 1, 1], [], []>} : vector<80x256xbf16>, vector<256x64xbf16>, vector<80x64xf32> -> vector<80x64xf32>
    %5 = arith.addf %0, %4 : vector<80x64xf32>
    %c0_5 = arith.constant 0 : index
    %c1 = arith.constant 1 : index
    %c0_6 = arith.constant 0 : index
    %6 = vector.load %arg2[%c0_5, %c1, %c0_6] : memref<1x102x256xbf16, #tpu.memory_space<vmem>>, vector<1x80x256xbf16>
    %7 = vector.shape_cast %6 : vector<1x80x256xbf16> to vector<80x256xbf16>
    %c256 = arith.constant 256 : index
    %c0_7 = arith.constant 0 : index
    %8 = vector.load %arg3[%c256, %c0_7] : memref<2304x64xbf16, #tpu.memory_space<vmem>>, vector<256x64xbf16>
    %cst_8 = arith.constant dense<0.000000e+00> : vector<80x64xf32>
    %9 = tpu.matmul %7, %8, %cst_8 {dimension_numbers = #tpu.dot_dimension_numbers<[1], [0], [0], [1], [0, 0, 1, 1], [], []>} : vector<80x256xbf16>, vector<256x64xbf16>, vector<80x64xf32> -> vector<80x64xf32>
    %10 = arith.addf %5, %9 : vector<80x64xf32>
    %c0_9 = arith.constant 0 : index
    %c2 = arith.constant 2 : index
    %c0_10 = arith.constant 0 : index
    %11 = vector.load %arg2[%c0_9, %c2, %c0_10] : memref<1x102x256xbf16, #tpu.memory_space<vmem>>, vector<1x80x256xbf16>
    %12 = vector.shape_cast %11 : vector<1x80x256xbf16> to vector<80x256xbf16>
    %c512 = arith.constant 512 : index
    %c0_11 = arith.constant 0 : index
    %13 = vector.load %arg3[%c512, %c0_11] : memref<2304x64xbf16, #tpu.memory_space<vmem>>, vector<256x64xbf16>
    %cst_12 = arith.constant dense<0.000000e+00> : vector<80x64xf32>
    %14 = tpu.matmul %12, %13, %cst_12 {dimension_numbers = #tpu.dot_dimension_numbers<[1], [0], [0], [1], [0, 0, 1, 1], [], []>} : vector<80x256xbf16>, vector<256x64xbf16>, vector<80x64xf32> -> vector<80x64xf32>
    %15 = arith.addf %10, %14 : vector<80x64xf32>
    %c0_13 = arith.constant 0 : index
    %c10 = arith.constant 10 : index
    %c0_14 = arith.constant 0 : index
    %16 = vector.load %arg2[%c0_13, %c10, %c0_14] : memref<1x102x256xbf16, #tpu.memory_space<vmem>>, vector<1x80x256xbf16>
    %17 = vector.shape_cast %16 : vector<1x80x256xbf16> to vector<80x256xbf16>
    %c768 = arith.constant 768 : index
    %c0_15 = arith.constant 0 : index
    %18 = vector.load %arg3[%c768, %c0_15] : memref<2304x64xbf16, #tpu.memory_space<vmem>>, vector<256x64xbf16>
    %cst_16 = arith.constant dense<0.000000e+00> : vector<80x64xf32>
    %19 = tpu.matmul %17, %18, %cst_16 {dimension_numbers = #tpu.dot_dimension_numbers<[1], [0], [0], [1], [0, 0, 1, 1], [], []>} : vector<80x256xbf16>, vector<256x64xbf16>, vector<80x64xf32> -> vector<80x64xf32>
    %20 = arith.addf %15, %19 : vector<80x64xf32>
    %c0_17 = arith.constant 0 : index
    %c11 = arith.constant 11 : index
    %c0_18 = arith.constant 0 : index
    %21 = vector.load %arg2[%c0_17, %c11, %c0_18] : memref<1x102x256xbf16, #tpu.memory_space<vmem>>, vector<1x80x256xbf16>
    %22 = vector.shape_cast %21 : vector<1x80x256xbf16> to vector<80x256xbf16>
    %c1024 = arith.constant 1024 : index
    %c0_19 = arith.constant 0 : index
    %23 = vector.load %arg3[%c1024, %c0_19] : memref<2304x64xbf16, #tpu.memory_space<vmem>>, vector<256x64xbf16>
    %cst_20 = arith.constant dense<0.000000e+00> : vector<80x64xf32>
    %24 = tpu.matmul %22, %23, %cst_20 {dimension_numbers = #tpu.dot_dimension_numbers<[1], [0], [0], [1], [0, 0, 1, 1], [], []>} : vector<80x256xbf16>, vector<256x64xbf16>, vector<80x64xf32> -> vector<80x64xf32>
    %25 = arith.addf %20, %24 : vector<80x64xf32>
    %c0_21 = arith.constant 0 : index
    %c12 = arith.constant 12 : index
    %c0_22 = arith.constant 0 : index
    %26 = vector.load %arg2[%c0_21, %c12, %c0_22] : memref<1x102x256xbf16, #tpu.memory_space<vmem>>, vector<1x80x256xbf16>
    %27 = vector.shape_cast %26 : vector<1x80x256xbf16> to vector<80x256xbf16>
    %c1280 = arith.constant 1280 : index
    %c0_23 = arith.constant 0 : index
    %28 = vector.load %arg3[%c1280, %c0_23] : memref<2304x64xbf16, #tpu.memory_space<vmem>>, vector<256x64xbf16>
    %cst_24 = arith.constant dense<0.000000e+00> : vector<80x64xf32>
    %29 = tpu.matmul %27, %28, %cst_24 {dimension_numbers = #tpu.dot_dimension_numbers<[1], [0], [0], [1], [0, 0, 1, 1], [], []>} : vector<80x256xbf16>, vector<256x64xbf16>, vector<80x64xf32> -> vector<80x64xf32>
    %30 = arith.addf %25, %29 : vector<80x64xf32>
    %c0_25 = arith.constant 0 : index
    %c20 = arith.constant 20 : index
    %c0_26 = arith.constant 0 : index
    %31 = vector.load %arg2[%c0_25, %c20, %c0_26] : memref<1x102x256xbf16, #tpu.memory_space<vmem>>, vector<1x80x256xbf16>
    %32 = vector.shape_cast %31 : vector<1x80x256xbf16> to vector<80x256xbf16>
    %c1536 = arith.constant 1536 : index
    %c0_27 = arith.constant 0 : index
    %33 = vector.load %arg3[%c1536, %c0_27] : memref<2304x64xbf16, #tpu.memory_space<vmem>>, vector<256x64xbf16>
    %cst_28 = arith.constant dense<0.000000e+00> : vector<80x64xf32>
    %34 = tpu.matmul %32, %33, %cst_28 {dimension_numbers = #tpu.dot_dimension_numbers<[1], [0], [0], [1], [0, 0, 1, 1], [], []>} : vector<80x256xbf16>, vector<256x64xbf16>, vector<80x64xf32> -> vector<80x64xf32>
    %35 = arith.addf %30, %34 : vector<80x64xf32>
    %c0_29 = arith.constant 0 : index
    %c21 = arith.constant 21 : index
    %c0_30 = arith.constant 0 : index
    %36 = vector.load %arg2[%c0_29, %c21, %c0_30] : memref<1x102x256xbf16, #tpu.memory_space<vmem>>, vector<1x80x256xbf16>
    %37 = vector.shape_cast %36 : vector<1x80x256xbf16> to vector<80x256xbf16>
    %c1792 = arith.constant 1792 : index
    %c0_31 = arith.constant 0 : index
    %38 = vector.load %arg3[%c1792, %c0_31] : memref<2304x64xbf16, #tpu.memory_space<vmem>>, vector<256x64xbf16>
    %cst_32 = arith.constant dense<0.000000e+00> : vector<80x64xf32>
    %39 = tpu.matmul %37, %38, %cst_32 {dimension_numbers = #tpu.dot_dimension_numbers<[1], [0], [0], [1], [0, 0, 1, 1], [], []>} : vector<80x256xbf16>, vector<256x64xbf16>, vector<80x64xf32> -> vector<80x64xf32>
    %40 = arith.addf %35, %39 : vector<80x64xf32>
    %c0_33 = arith.constant 0 : index
    %c22 = arith.constant 22 : index
    %c0_34 = arith.constant 0 : index
    %41 = vector.load %arg2[%c0_33, %c22, %c0_34] : memref<1x102x256xbf16, #tpu.memory_space<vmem>>, vector<1x80x256xbf16>
    %42 = vector.shape_cast %41 : vector<1x80x256xbf16> to vector<80x256xbf16>
    %c2048 = arith.constant 2048 : index
    %c0_35 = arith.constant 0 : index
    %43 = vector.load %arg3[%c2048, %c0_35] : memref<2304x64xbf16, #tpu.memory_space<vmem>>, vector<256x64xbf16>
    %cst_36 = arith.constant dense<0.000000e+00> : vector<80x64xf32>
    %44 = tpu.matmul %42, %43, %cst_36 {dimension_numbers = #tpu.dot_dimension_numbers<[1], [0], [0], [1], [0, 0, 1, 1], [], []>} : vector<80x256xbf16>, vector<256x64xbf16>, vector<80x64xf32> -> vector<80x64xf32>
    %45 = arith.addf %40, %44 : vector<80x64xf32>
    %c0_37 = arith.constant 0 : index
    %c0_38 = arith.constant 0 : index
    %46 = vector.load %arg4[%c0_37, %c0_38] : memref<1x64xf32, #tpu.memory_space<vmem>>, vector<1x64xf32>
    %47 = vector.broadcast %46 : vector<1x64xf32> to vector<80x64xf32>
    %48 = arith.addf %45, %47 : vector<80x64xf32>
    %cst_39 = arith.constant 0.000000e+00 : f32
    %49 = vector.broadcast %cst_39 : f32 to vector<80x64xf32>
    %50 = arith.cmpf oge, %48, %49 : vector<80x64xf32>
    %cst_40 = arith.constant 2.000000e-01 : f32
    %51 = vector.broadcast %cst_40 : f32 to vector<80x64xf32>
    %52 = arith.mulf %51, %48 : vector<80x64xf32>
    %53 = arith.select %50, %48, %52 : vector<80x64xi1>, vector<80x64xf32>
    %cst_41 = arith.constant 1.41421354 : f32
    %54 = vector.broadcast %cst_41 : f32 to vector<80x64xf32>
    %55 = arith.mulf %53, %54 : vector<80x64xf32>
    %cst_42 = arith.constant 0.000000e+00 : f32
    %56 = vector.broadcast %cst_42 : f32 to vector<80x64xf32>
    %c0_43 = arith.constant 0 : index
    %c0_44 = arith.constant 0 : index
    %c0_45 = arith.constant 0 : index
    %57 = vector.load %arg5[%c0_43, %c0_44, %c0_45] : memref<1x91x256xbf16, #tpu.memory_space<vmem>>, vector<1x80x256xbf16>
    %58 = vector.shape_cast %57 : vector<1x80x256xbf16> to vector<80x256xbf16>
    %c0_46 = arith.constant 0 : index
    %c0_47 = arith.constant 0 : index
    %59 = vector.load %arg6[%c0_46, %c0_47] : memref<1024x64xbf16, #tpu.memory_space<vmem>>, vector<256x64xbf16>
    %cst_48 = arith.constant dense<0.000000e+00> : vector<80x64xf32>
    %60 = tpu.matmul %58, %59, %cst_48 {dimension_numbers = #tpu.dot_dimension_numbers<[1], [0], [0], [1], [0, 0, 1, 1], [], []>} : vector<80x256xbf16>, vector<256x64xbf16>, vector<80x64xf32> -> vector<80x64xf32>
    %61 = arith.addf %56, %60 : vector<80x64xf32>
    %c0_49 = arith.constant 0 : index
    %c1_50 = arith.constant 1 : index
    %c0_51 = arith.constant 0 : index
    %62 = vector.load %arg5[%c0_49, %c1_50, %c0_51] : memref<1x91x256xbf16, #tpu.memory_space<vmem>>, vector<1x80x256xbf16>
    %63 = vector.shape_cast %62 : vector<1x80x256xbf16> to vector<80x256xbf16>
    %c256_52 = arith.constant 256 : index
    %c0_53 = arith.constant 0 : index
    %64 = vector.load %arg6[%c256_52, %c0_53] : memref<1024x64xbf16, #tpu.memory_space<vmem>>, vector<256x64xbf16>
    %cst_54 = arith.constant dense<0.000000e+00> : vector<80x64xf32>
    %65 = tpu.matmul %63, %64, %cst_54 {dimension_numbers = #tpu.dot_dimension_numbers<[1], [0], [0], [1], [0, 0, 1, 1], [], []>} : vector<80x256xbf16>, vector<256x64xbf16>, vector<80x64xf32> -> vector<80x64xf32>
    %66 = arith.addf %61, %65 : vector<80x64xf32>
    %c0_55 = arith.constant 0 : index
    %c10_56 = arith.constant 10 : index
    %c0_57 = arith.constant 0 : index
    %67 = vector.load %arg5[%c0_55, %c10_56, %c0_57] : memref<1x91x256xbf16, #tpu.memory_space<vmem>>, vector<1x80x256xbf16>
    %68 = vector.shape_cast %67 : vector<1x80x256xbf16> to vector<80x256xbf16>
    %c512_58 = arith.constant 512 : index
    %c0_59 = arith.constant 0 : index
    %69 = vector.load %arg6[%c512_58, %c0_59] : memref<1024x64xbf16, #tpu.memory_space<vmem>>, vector<256x64xbf16>
    %cst_60 = arith.constant dense<0.000000e+00> : vector<80x64xf32>
    %70 = tpu.matmul %68, %69, %cst_60 {dimension_numbers = #tpu.dot_dimension_numbers<[1], [0], [0], [1], [0, 0, 1, 1], [], []>} : vector<80x256xbf16>, vector<256x64xbf16>, vector<80x64xf32> -> vector<80x64xf32>
    %71 = arith.addf %66, %70 : vector<80x64xf32>
    %c0_61 = arith.constant 0 : index
    %c11_62 = arith.constant 11 : index
    %c0_63 = arith.constant 0 : index
    %72 = vector.load %arg5[%c0_61, %c11_62, %c0_63] : memref<1x91x256xbf16, #tpu.memory_space<vmem>>, vector<1x80x256xbf16>
    %73 = vector.shape_cast %72 : vector<1x80x256xbf16> to vector<80x256xbf16>
    %c768_64 = arith.constant 768 : index
    %c0_65 = arith.constant 0 : index
    %74 = vector.load %arg6[%c768_64, %c0_65] : memref<1024x64xbf16, #tpu.memory_space<vmem>>, vector<256x64xbf16>
    %cst_66 = arith.constant dense<0.000000e+00> : vector<80x64xf32>
    %75 = tpu.matmul %73, %74, %cst_66 {dimension_numbers = #tpu.dot_dimension_numbers<[1], [0], [0], [1], [0, 0, 1, 1], [], []>} : vector<80x256xbf16>, vector<256x64xbf16>, vector<80x64xf32> -> vector<80x64xf32>
    %76 = arith.addf %71, %75 : vector<80x64xf32>
    %77 = arith.addf %55, %76 : vector<80x64xf32>
    %cst_67 = arith.constant 0.707106769 : f32
    %78 = vector.broadcast %cst_67 : f32 to vector<80x64xf32>
    %79 = arith.mulf %77, %78 : vector<80x64xf32>
    %c0_68 = arith.constant 0 : index
    %c0_69 = arith.constant 0 : index
    %c0_70 = arith.constant 0 : index
    %80 = vector.load %arg7[%c0_68, %c0_69, %c0_70] : memref<1x80x64xf32, #tpu.memory_space<vmem>>, vector<1x80x64xf32>
    %81 = vector.shape_cast %80 : vector<1x80x64xf32> to vector<80x64xf32>
    %82 = vector.shape_cast %79 : vector<80x64xf32> to vector<1x80x64xf32>
    tpu.vector_store %arg7[%c0_68, %c0_69, %c0_70], %82 {strides = array<i32>} : memref<1x80x64xf32, #tpu.memory_space<vmem>>, vector<1x80x64xf32>,
    return
  }
  func.func @transform_0(%arg0: i32, %arg1: i32) -> (i32, i32, i32) {
    %c0_i32 = arith.constant 0 : i32
    %c0_i32_0 = arith.constant 0 : i32
    %c0_i32_1 = arith.constant 0 : i32
    return %arg0, %c0_i32, %c0_i32_0 : i32, i32, i32
  }
  func.func @transform_1(%arg0: i32, %arg1: i32) -> (i32, i32) {
    %c0_i32 = arith.constant 0 : i32
    %c0_i32_0 = arith.constant 0 : i32
    return %c0_i32, %arg1 : i32, i32
  }
  func.func @transform_2(%arg0: i32, %arg1: i32) -> (i32, i32) {
    %c0_i32 = arith.constant 0 : i32
    %c0_i32_0 = arith.constant 0 : i32
    return %c0_i32, %arg1 : i32, i32
  }
  func.func @transform_3(%arg0: i32, %arg1: i32) -> (i32, i32, i32) {
    %c0_i32 = arith.constant 0 : i32
    %c0_i32_0 = arith.constant 0 : i32
    %c0_i32_1 = arith.constant 0 : i32
    return %arg0, %c0_i32, %c0_i32_0 : i32, i32, i32
  }
  func.func @transform_4(%arg0: i32, %arg1: i32) -> (i32, i32) {
    %c0_i32 = arith.constant 0 : i32
    %c0_i32_0 = arith.constant 0 : i32
    return %c0_i32, %arg1 : i32, i32
  }
  func.func @transform_5(%arg0: i32, %arg1: i32) -> (i32, i32, i32) {
    %c0_i32 = arith.constant 0 : i32
    %c0_i32_0 = arith.constant 0 : i32
    return %arg0, %c0_i32, %arg1 : i32, i32, i32
  }
}

</mosaic_0001>

<bundles_post_ra>
// kernel: res_block_forward.2
= control target key start
LH: loop header
LB: loop body
LE: loop exit
PB: predicated region body
PF: predicated region fallthrough
CT: control target
= control target key end

     0   :  { %s5501_s12 = smov 0   ;;  %s5503_s13 = smov 0   ;;  %s7003_s0 = inlined_call_operand.vmem [shape: bf16[2,326,64], index: 0, kind: input, shape index: {}]   ;;  %s7004_s1 = inlined_call_operand.vmem [shape: bf16[576,64], index: 1, kind: input, shape index: {}]   ;;  %s7005_s2 = inlined_call_operand.vmem [shape: f32[1,64], index: 2, kind: input, shape index: {}]   ;;  %s7006_s3 = inlined_call_operand.vmem [shape: bf16[2,288,64], index: 3, kind: output, shape index: {}]  }
   0x1   :  { %s5505_s14 = smov 0  }
   0x2 LB: > { %s25_s15 = sadd.s32 1, %s5475_s13  ;;  %p4393_p0 = scmp.ge.s32.totalorder %s5479_s14, 1  ;;  %s5479_s14 = sphi %s5505_s14, %s13_s14   ;;  %s5475_s13 = sphi %s5503_s13, %s7050_s13   ;;  %s5471_s12 = sphi %s5501_s12, %s7049_s12  }
   0x3   : > { %p27_p1 = scmp.ge.s32.totalorder %s25_s15, 2  ;;  %p168_p2 = scmp.lt.s32.totalorder %s5479_s14, 3 }
   0x5   : > { %s7052_s15 = smov (%p27_p1, %s25_s15), 0  ;;  %p169_p3 = pnand %p4393_p0, %p168_p2 }
   0x7   : > { %172 = sbr.rel (%p169_p3) target bundleno = 560 (0x230), region = 32 }
   0xc   : > { %v5359_v0 = vld [vmem:[%s7004_s1 + $0x38] sm:$0xff]   ;;  %p202_p4 = scmp.lt.s32.totalorder %s5471_s12, 1  ;;  %v5360_v1 = vld [vmem:[%s7004_s1 + $0x30] sm:$0xff]   ;;  %v5361_v2 = vld [vmem:[%s7004_s1 + $0x28] sm:$0xff]   ;;  %vm369_vm0 = vsmask.f32 7424 }
   0xd   : > { %4929 = vmatprep.subr.bf16.mxu0 %v5359_v0  ;;  %5325 = vmatprep.subr.bf16.mxu1 %v5359_v0  ;;  %v5362_v3 = vld [vmem:[%s7004_s1 + $0x20] sm:$0xff]   ;;  %v5369_v14 = vld [vmem:[%s7004_s1 + $0x58] sm:$0xff]   ;;  %vm542_vm1 = vcmask 523264   ;;  %v5375_v48 = vld [vmem:[%s7004_s1 + $0x50] sm:$0xff]   ;;  %vm1023_vm2 = vcmask 1046528   ;;  %vm2304_vm3 = vcmask 1045504  }
   0xe   : > { %s7054_s12 = smov (!%p202_p4, %s5471_s12), 1  ;;  %4930 = vmatpush3.bf16.msra.mxu0 %v5359_v0  ;;  %5329 = vmatpush3.bf16.msra.mxu1 %v5359_v0  ;;  %v5370_v15 = vld [vmem:[%s7004_s1 + $0x18] sm:$0xff]   ;;  %v5376_v57 = vld [vmem:[%s7004_s1 + $0x10] sm:$0xff]   ;;  %vm1830_vm4 = vsmask.f32 6400  ;;  %vm3585_vm5 = vcmask 1044480  }
   0xf   : > { %4931 = vmatprep.subr.bf16.mxu0 %v5360_v1  ;;  %5326 = vmatprep.subr.bf16.mxu1 %v5360_v1  ;;  %s5333_s22 = smul.u32 164, %s7054_s12  ;;  %vm3111_vm6 = vsmask.f32 5376  ;;  %vm4245_vm9 = vcmask 519168  }
  0x10   : > { %s5334_s26 = smul.u32 144, %s7054_s12 }
  0x11   : > { %s5537_s27 = scalar_lea.vmem %s7003_s0, %s5333_s22 }
  0x12   : > { %4932 = vmatpush3.bf16.msra.mxu0 %v5360_v1  ;;  %5330 = vmatpush3.bf16.msra.mxu1 %v5360_v1  ;;  %v223_v4 = vld [vmem:[%s5537_s27] sm:$0xf]  ;;  %v5541_v5 = vld [vmem:[%s5537_s27 + $0x4] sm:$0xf]  ;;  %v5547_v7 = vld [vmem:[%s5537_s27 + $0x8] sm:$0xff]   ;;  %s6856_s29 = scalar_lea.vmem %s7006_s3, %s5334_s26 }
  0x13   : > { %4933 = vmatprep.subr.bf16.mxu0 %v5361_v2  ;;  %5327 = vmatprep.subr.bf16.mxu1 %v5361_v2  ;;  %v5544_v6 = vcombine.low %v223_v4, %v5541_v5  ;;  %v378_v10 = vshll.u32 %v5547_v7, 16  ;;  %v382_v11 = vshrl.u32 %v5547_v7, 16  ;;  %v5554_v12 = vld [vmem:[%s5537_s27 + $0x50] sm:$0xff]   ;;  %v5557_v13 = vld [vmem:[%s5537_s27 + $0x58] sm:$0xff]   ;;  %v5574_v24 = vld [vmem:[%s5537_s27 + $0x60] sm:$0xff]  }
  0x14   : > { %v5566_v16 = vld [vmem:[%s5537_s27 + $0x10] sm:$0xff]   ;;  %v450_v19 = vshll.u32 %v5554_v12, 16  ;;  %v454_v20 = vshrl.u32 %v5554_v12, 16  ;;  %v458_v21 = vshll.u32 %v5557_v13, 16  ;;  %v462_v22 = vshrl.u32 %v5557_v13, 16  ;;  %v5579_v28 = vld [vmem:[%s5537_s27 + $0x18] sm:$0xff]  }
  0x15   : > { %v371_v8 = vshrl.u32 %v5544_v6, 16  ;;  %v373_v9 = vshll.u32 %v5544_v6, 16  ;;  %v380_v18 = vrot.slane %v378_v10, 1  ;;  %v386_v23 = vshll.u32 %v5566_v16, 16  ;;  %v5587_v36 = vld [vmem:[%s5537_s27 + $0x68] sm:$0xff]   ;;  %v5591_v38 = vld [vmem:[%s5537_s27 + $0x20] sm:$0xff]  }
  0x16   : > { %4934 = vmatpush3.bf16.msra.mxu0 %v5361_v2  ;;  %5331 = vmatpush3.bf16.msra.mxu1 %v5361_v2  ;;  %v5576_v27 = vrot.slane %v450_v19, 1  ;;  %v460_v29 = vrot.slane %v458_v21, 1  ;;  %v466_v31 = vshll.u32 %v5574_v24, 16  ;;  %v390_v32 = vshrl.u32 %v5566_v16, 16  ;;  %v5596_v43 = vld [vmem:[%s5537_s27 + $0x70] sm:$0xff]   ;;  %v5616_v58 = vld [vmem:[%s5537_s27 + $0x28] sm:$0xff]  }
  0x17   : > { %4935 = vmatprep.subr.bf16.mxu0 %v5362_v3  ;;  %5328 = vmatprep.subr.bf16.mxu1 %v5362_v3  ;;  %v375_v17 = vrot.slane %v373_v9, 1  ;;  %v384_v26 = vor.u32 %v382_v11, %v380_v18  ;;  %v388_v30 = vrot.slane %v386_v23, 1  ;;  %v394_v35 = vshll.u32 %v5579_v28, 16  ;;  %v5629_v9 = vld [vmem:[%s5537_s27 + $0x30] sm:$0xff]   ;;  %v5633_v11 = vld [vmem:[%s5537_s27 + $0x80] sm:$0xff]   ;;  %v5382_v23 = vld [vmem:[%s7004_s1 + $0x8] sm:$0xff]  }
  0x18   : > { %v456_v34 = vor.u32 %v454_v20, %v5576_v27  ;;  %v470_v37 = vshrl.u32 %v5574_v24, 16  ;;  %v464_v39 = vor.u32 %v462_v22, %v460_v29  ;;  %v468_v41 = vrot.slane %v466_v31, 1  ;;  %v5381_v22 = vld [vmem:[%s7004_s1 + $0x48] sm:$0xff]  }
  0x19   : > { %v376_v25 = vor.u32 %v375_v17, %v371_v8  ;;  %v389_v40 = vsel %vm369_vm0, %v384_v26, %v388_v30  ;;  %v392_v42 = vor.u32 %v390_v32, %v388_v30  ;;  %v396_v45 = vrot.slane %v394_v35, 1 }
  0x1a   : > { %4936 = vmatpush3.bf16.msra.mxu0 %v5362_v3  ;;  %5332 = vmatpush3.bf16.msra.mxu1 %v5362_v3  ;;  %v461_v44 = vsel %vm369_vm0, %v456_v34, %v460_v29  ;;  %v474_v46 = vshll.u32 %v5587_v36, 16  ;;  %v398_v47 = vshrl.u32 %v5579_v28, 16  ;;  %v469_v49 = vsel %vm369_vm0, %v464_v39, %v468_v41  ;;  %v5625_v3 = vld [vmem:[%s5537_s27 + $0x78] sm:$0xff]  }
  0x1b   : > { %v381_v33 = vsel %vm369_vm0, %v376_v25, %v380_v18  ;;  %5017 = vmatprep.subr.bf16.mxu0 %v5369_v14  ;;  %4973 = vmatprep.subr.bf16.mxu1 %v5370_v15  ;;  %v472_v50 = vor.u32 %v470_v37, %v468_v41  ;;  %v402_v51 = vshll.u32 %v5591_v38, 16  ;;  %v478_v52 = vshrl.u32 %v5587_v36, 16  ;;  %v5650_v29 = vld [vmem:[%s5537_s27 + $0x38] sm:$0xff]   ;;  %v5658_v37 = vld [vmem:[%s5537_s27 + $0x88] sm:$0xff]  }
  0x1c   : > { %4937 = vmatprep.mubr.msk.bf16.mxu0 %vm542_vm1, %v381_v33  ;;  %4957 = vmatprep.mubr.msk.bf16.mxu1 %vm542_vm1, %v461_v44  ;;  %v397_v53 = vsel %vm369_vm0, %v392_v42, %v396_v45  ;;  %v476_v54 = vrot.slane %v474_v46, 1  ;;  %v400_v55 = vor.u32 %v398_v47, %v396_v45  ;;  %v482_v56 = vshll.u32 %v5596_v43, 16  ;;  %v5663_v44 = vld [vmem:[%s5537_s27 + $0x40] sm:$0xff]  }
  0x1d   : > { %4938 = vmatmul.mubr.msk.bf16.vlgmr.msra.gmra.mxu0 %vm542_vm1, %v389_v40  ;;  %4958 = vmatmul.mubr.msk.bf16.vlgmr.msra.gmra.mxu1 %vm542_vm1, %v469_v49  ;;  %v404_v59 = vrot.slane %v402_v51, 1  ;;  %v406_v60 = vshrl.u32 %v5591_v38, 16  ;;  %v410_v0 = vshll.u32 %v5616_v58, 16  ;;  %v486_v4 = vshrl.u32 %v5596_v43, 16  ;;  %v5387_v46 = vld [vmem:[%s7004_s1] sm:$0xff]  }
  0x1e   : > { %5018 = vmatpush3.bf16.msra.mxu0 %v5369_v14  ;;  %4941 = vmatprep.mubr.msk.bf16.mxu0 %vm542_vm1, %v397_v53  ;;  %v477_v61 = vsel %vm369_vm0, %v472_v50, %v476_v54  ;;  %v480_v62 = vor.u32 %v478_v52, %v476_v54  ;;  %v484_v63 = vrot.slane %v482_v56, 1  ;;  %v414_v10 = vshrl.u32 %v5616_v58, 16  ;;  %v5386_v49 = vld [vmem:[%s5537_s27 + $0x90] ss:$0 sps:$4 sm:$0x11]   ;;  %v5388_v51 = vld [vmem:[%s7004_s1 + $0x40] sm:$0xff]  }
  0x1f   : > { %5019 = vmatprep.subr.bf16.mxu0 %v5375_v48  ;;  %4974 = vmatpush3.bf16.msra.mxu1 %v5370_v15  ;;  %v405_v1 = vsel %vm369_vm0, %v400_v55, %v404_v59  ;;  %v408_v2 = vor.u32 %v406_v60, %v404_v59  ;;  %v412_v8 = vrot.slane %v410_v0, 1  ;;  %v490_v17 = vshll.u32 %v5625_v3, 16  ;;  %v5679_v55 = vld [vmem:[%s5537_s27 + $0x48] sm:$0xff]  }
  0x20   : > { %4975 = vmatprep.subr.bf16.mxu1 %v5376_v57  ;;  %4961 = vmatprep.mubr.msk.bf16.mxu1 %vm542_vm1, %v477_v61  ;;  %v485_v14 = vsel %vm369_vm0, %v480_v62, %v484_v63  ;;  %v488_v15 = vor.u32 %v486_v4, %v484_v63  ;;  %v494_v18 = vshrl.u32 %v5625_v3, 16  ;;  %v418_v20 = vshll.u32 %v5629_v9, 16  ;;  %v5390_v4 = vld [vmem:[%s7004_s1 + $0x78] sm:$0xff]  }
  0x21   : > { %v413_v19 = vsel %vm369_vm0, %v408_v2, %v412_v8  ;;  %v498_v21 = vshll.u32 %v5633_v11, 16  ;;  %v492_v25 = vrot.slane %v490_v17, 1  ;;  %v416_v26 = vor.u32 %v414_v10, %v412_v8  ;;  %v1011_v8 = vld [vmem:[%s5537_s27] sm:$0xe]  ;;  %v5392_v10 = vld [vmem:[%s7004_s1 + $0x98] sm:$0xff]  }
  0x22   : > { %5020 = vmatpush3.bf16.msra.mxu0 %v5375_v48  ;;  %v420_v30 = vrot.slane %v418_v20, 1  ;;  %v422_v34 = vshrl.u32 %v5629_v9, 16  ;;  %v426_v35 = vshll.u32 %v5650_v29, 16  ;;  %v502_v39 = vshrl.u32 %v5633_v11, 16 }
  0x23   : > { %4976 = vmatpush3.bf16.msra.mxu1 %v5376_v57  ;;  %v500_v31 = vrot.slane %v498_v21, 1  ;;  %5021 = vmatprep.subr.bf16.mxu0 %v5381_v22  ;;  %v493_v32 = vsel %vm369_vm0, %v488_v15, %v492_v25  ;;  %v496_v33 = vor.u32 %v494_v18, %v492_v25  ;;  %v430_v45 = vshrl.u32 %v5650_v29, 16 }
  0x24   : > { %4977 = vmatprep.subr.bf16.mxu1 %v5382_v23  ;;  %v421_v40 = vsel %vm369_vm0, %v416_v26, %v420_v30  ;;  %v424_v41 = vor.u32 %v422_v34, %v420_v30  ;;  %v428_v42 = vrot.slane %v426_v35, 1  ;;  %v506_v48 = vshll.u32 %v5658_v37, 16 }
  0x25   : > { %4942 = vmatmul.mubr.msk.bf16.gmra.mxu0 %vm542_vm1, %v405_v1  ;;  %4962 = vmatmul.mubr.msk.bf16.gmra.mxu1 %vm542_vm1, %v485_v14  ;;  %v504_v47 = vor.u32 %v502_v39, %v500_v31  ;;  %v510_v50 = vshrl.u32 %v5658_v37, 16  ;;  %v501_v52 = vsel %vm369_vm0, %v496_v33, %v500_v31  ;;  %v434_v54 = vshll.u32 %v5663_v44, 16  ;;  %v5393_v31 = vld [vmem:[%s7004_s1 + $0x70] sm:$0xff]   ;;  %v5395_v33 = vld [vmem:[%s7004_s1 + $0x68] sm:$0xff]  }
  0x26   : > { %4945 = vmatprep.mubr.msk.bf16.mxu0 %vm542_vm1, %v413_v19  ;;  %5022 = vmatpush3.bf16.msra.mxu0 %v5381_v22  ;;  %v429_v53 = vsel %vm369_vm0, %v424_v41, %v428_v42  ;;  %v508_v56 = vrot.slane %v506_v48, 1  ;;  %v514_v57 = vshll.u32 %v5386_v49, 16  ;;  %v432_v59 = vor.u32 %v430_v45, %v428_v42  ;;  %v5394_v39 = vld [vmem:[%s7004_s1 + $0x90] sm:$0xff]   ;;  %v5396_v41 = vld [vmem:[%s7004_s1 + $0x88] sm:$0xff]   ;;  %v5751_v42 = vld [vmem:[%s7004_s1 + $0xb8] sm:$0xff]  }
  0x27   : > { %4965 = vmatprep.mubr.msk.bf16.mxu1 %vm542_vm1, %v493_v32  ;;  %4978 = vmatpush3.bf16.msra.mxu1 %v5382_v23  ;;  %v436_v60 = vrot.slane %v434_v54, 1  ;;  %v438_v61 = vshrl.u32 %v5663_v44, 16  ;;  %v442_v63 = vshll.u32 %v5679_v55, 16  ;;  %v446_v17 = vshrl.u32 %v5679_v55, 16  ;;  %v5768_v48 = vld [vmem:[%s7004_s1 + $0xd8] sm:$0xff]  }
  0x28   : > { %4979 = vmatprep.subr.bf16.mxu1 %v5387_v46  ;;  %5023 = vmatprep.subr.bf16.mxu0 %v5388_v51  ;;  %v509_v62 = vsel %vm369_vm0, %v504_v47, %v508_v56  ;;  %v512_v0 = vor.u32 %v510_v50, %v508_v56  ;;  %v516_v1 = vrot.slane %v514_v57, 1  ;;  %v4459_v19 = vcombine.low %v1011_v8, %v5541_v5  ;;  %v2292_v54 = vld [vmem:[%s5537_s27 + $0x8] sm:$0xc]  ;;  %v5796_v56 = vld [vmem:[%s5537_s27 + $0x10] sm:$0xff]  }
  0x29   : > { %v440_v2 = vor.u32 %v438_v61, %v436_v60  ;;  %v444_v14 = vrot.slane %v442_v63, 1  ;;  %v437_v15 = vsel %vm369_vm0, %v432_v59, %v436_v60  ;;  %v1025_v23 = vrot.slane %v5547_v7, 1  ;;  %v5800_v60 = vld [vmem:[%s5537_s27 + $0x18] sm:$0xff]   ;;  %v5803_v61 = vld [vmem:[%s5537_s27 + $0x20] sm:$0xff]   ;;  %v5808_v63 = vld [vmem:[%s5537_s27 + $0x28] sm:$0xff]  }
  0x2a   : > { %5024 = vmatpush3.bf16.msra.mxu0 %v5388_v51  ;;  %v517_v20 = vsel %vm369_vm0, %v512_v0, %v516_v1  ;;  %v1024_v22 = vrot.slane %v4459_v19, 1  ;;  %v1057_v5 = vrot.slane %v5658_v37, 1  ;;  %v1059_v30 = vrot.slane %v5386_v49, 1  ;;  %v5837_v19 = vld [vmem:[%s5537_s27 + $0x40] sm:$0xff]  }
  0x2b   : > { %4980 = vmatpush3.bf16.msra.mxu1 %v5387_v46  ;;  %5105 = vmatprep.subr.bf16.mxu0 %v5392_v10  ;;  %v445_v18 = vsel %vm369_vm0, %v440_v2, %v444_v14  ;;  %v448_v21 = vor.u32 %v446_v17, %v444_v14  ;;  %v1027_v32 = vrot.slane %v5566_v16, 1  ;;  %v5398_v46 = vld [vmem:[%s7004_s1 + $0x80] sm:$0xff]   ;;  %v1037_v47 = vrot.slane %v5650_v29, 1  ;;  %v5814_v2 = vld [vmem:[%s5537_s27 + $0x30] sm:$0xff]  }
  0x2c   : > { %5061 = vmatprep.subr.bf16.mxu1 %v5390_v4  ;;  %v1026_v26 = vsel %vm1023_vm2, %v1024_v22, %v1025_v23  ;;  %v2308_v0 = vrot.slane %v5800_v60, 2  ;;  %v2310_v1 = vrot.slane %v5803_v61, 2  ;;  %v1047_v8 = vrot.slane %v5574_v24, 1 }
  0x2d   : > { %4946 = vmatmul.mubr.msk.bf16.gmra.mxu0 %vm542_vm1, %v421_v40  ;;  %4966 = vmatmul.mubr.msk.bf16.gmra.mxu1 %vm542_vm1, %v501_v52  ;;  %v453_v25 = vsel %vm369_vm0, %v448_v21, %v5576_v27  ;;  %v1029_v27 = vrot.slane %v5579_v28, 1  ;;  %v1028_v34 = vsel %vm1023_vm2, %v1025_v23, %v1027_v32  ;;  %v1033_v40 = vrot.slane %v5616_v58, 1 }
  0x2e   : > { %4949 = vmatprep.mubr.msk.bf16.mxu0 %vm542_vm1, %v429_v53  ;;  %4969 = vmatprep.mubr.msk.bf16.mxu1 %vm542_vm1, %v509_v62  ;;  %v1043_v53 = vrot.slane %v5554_v12, 1  ;;  %v1049_v17 = vrot.slane %v5587_v36, 1  ;;  %v2314_v21 = vrot.slane %v5814_v2, 2 }
  0x2f   : > { %v1030_v35 = vsel %vm1023_vm2, %v1027_v32, %v1029_v27  ;;  %v2318_v32 = vrot.slane %v5837_v19, 2 }
  0x35   : > { %4950 = vmatmul.mubr.msk.bf16.gmra.mxu0 %vm542_vm1, %v437_v15  ;;  %4970 = vmatmul.mubr.msk.bf16.gmra.mxu1 %vm542_vm1, %v517_v20  ;;  %v5828_v15 = vsel %vm2304_vm3, %v2308_v0, %v2310_v1  ;;  %v5840_v20 = vld [vmem:[%s5537_s27 + $0x48] sm:$0xff]  }
  0x36   : > { %4953 = vmatprep.mubr.msk.bf16.mxu0 %vm542_vm1, %v445_v18  ;;  %4981 = vmatprep.mubr.msk.bf16.mxu1 %vm542_vm1, %v5544_v6  ;;  %v5719_v6 = vsel %vm1023_vm2, %v1057_v5, %v1059_v30  ;;  %v2312_v18 = vrot.slane %v5808_v63, 2 }
  0x38   : > { %v5845_v23 = vsel %vm2304_vm3, %v2310_v1, %v2312_v18 }
  0x3d   : > { %4954 = vmatmul.mubr.msk.bf16.gmra.mxu0 %vm542_vm1, %v453_v25  ;;  %4982 = vmatmul.mubr.msk.bf16.vlgmr.msra.gmra.mxu1 %vm542_vm1, %v5547_v7  ;;  %v5397_v7 = vld [vmem:[%s7004_s1 + $0x60] sm:$0xff]   ;;  %v1352_v25 = vld [vmem:[%s5537_s27 + $0x8] sm:$0xe] }
  0x3e   : > { %5025 = vmatprep.mubr.msk.bf16.mxu0 %vm542_vm1, %v1026_v26  ;;  %4985 = vmatprep.mubr.msk.bf16.mxu1 %vm542_vm1, %v5566_v16  ;;  %v1031_v16 = vrot.slane %v5591_v38, 1  ;;  %v5850_v26 = vsel %vm2304_vm3, %v2312_v18, %v2314_v21  ;;  %v1852_v18 = vshll.u32 %v5800_v60, 16 }
  0x3f   : > { %5062 = vmatpush3.bf16.msra.mxu1 %v5390_v4 }
  0x40   : > { %5063 = vmatprep.subr.bf16.mxu1 %v5393_v31  ;;  %v1032_v45 = vsel %vm1023_vm2, %v1029_v27, %v1031_v16  ;;  %v2320_v27 = vrot.slane %v5840_v20, 2 }
  0x43   : > { %5064 = vmatpush3.bf16.msra.mxu1 %v5393_v31  ;;  %v5857_v31 = vld [vmem:[%s5537_s27 + $0x50] sm:$0xff]  }
  0x44   : > { %5065 = vmatprep.subr.bf16.mxu1 %v5395_v33 }
  0x45   : > { %5026 = vmatmul.mubr.msk.bf16.vlgmr.msra.gmra.mxu0 %vm542_vm1, %v1028_v34  ;;  %4986 = vmatmul.mubr.msk.bf16.gmra.mxu1 %vm542_vm1, %v5579_v28  ;;  %v1034_v28 = vsel %vm1023_vm2, %v1031_v16, %v1033_v40 }
  0x46   : > { %5106 = vmatpush3.bf16.msra.mxu0 %v5392_v10  ;;  %5029 = vmatprep.mubr.msk.bf16.mxu0 %vm542_vm1, %v1030_v35  ;;  %v5822_v10 = vld [vmem:[%s5537_s27 + $0x38] sm:$0xff]   ;;  %v5869_v35 = vsel %vm2304_vm3, %v2318_v32, %v2320_v27 }
  0x47   : > { %5107 = vmatprep.subr.bf16.mxu0 %v5394_v39  ;;  %4989 = vmatprep.mubr.msk.bf16.mxu1 %vm542_vm1, %v5591_v38  ;;  %v1035_v38 = vrot.slane %v5629_v9, 1  ;;  %v2316_v22 = vrot.slane %v5822_v10, 2 }
  0x48   : > { %5066 = vmatpush3.bf16.msra.mxu1 %v5395_v33  ;;  %v5862_v33 = vld [vmem:[%s5537_s27 + $0x58] sm:$0xff]  }
  0x49   : > { %5067 = vmatprep.subr.bf16.mxu1 %v5397_v7  ;;  %v1036_v49 = vsel %vm1023_vm2, %v1033_v40, %v1035_v38  ;;  %v1038_v50 = vsel %vm1023_vm2, %v1035_v38, %v1037_v47  ;;  %v5853_v30 = vsel %vm2304_vm3, %v2314_v21, %v2316_v22  ;;  %v5866_v34 = vsel %vm2304_vm3, %v2316_v22, %v2318_v32 }
  0x4a   : > { %5108 = vmatpush3.bf16.msra.mxu0 %v5394_v39  ;;  %v2322_v39 = vrot.slane %v5857_v31, 2  ;;  %v2324_v16 = vrot.slane %v5862_v33, 2  ;;  %v1053_v40 = vrot.slane %v5625_v3, 1  ;;  %v1493_v32 = vrot.slane %v5800_v60, 1 }
  0x4b   : > { %5109 = vmatprep.subr.bf16.mxu0 %v5396_v41 }
  0x4c   : > { %5068 = vmatpush3.bf16.msra.mxu1 %v5397_v7  ;;  %v1051_v7 = vrot.slane %v5596_v43, 1 }
  0x4d   : > { %5030 = vmatmul.mubr.msk.bf16.gmra.mxu0 %vm542_vm1, %v1032_v45  ;;  %5149 = vmatprep.subr.bf16.mxu1 %v5751_v42  ;;  %v5879_v45 = vsel %vm2304_vm3, %v2320_v27, %v2322_v39  ;;  %v1495_v27 = vrot.slane %v5803_v61, 1 }
  0x4e   : > { %5033 = vmatprep.mubr.msk.bf16.mxu0 %vm542_vm1, %v1034_v28  ;;  %5110 = vmatpush3.bf16.msra.mxu0 %v5396_v41  ;;  %v1055_v28 = vrot.slane %v5633_v11, 1 }
  0x4f   : > { %4990 = vmatmul.mubr.msk.bf16.gmra.mxu1 %vm542_vm1, %v5616_v58  ;;  %5111 = vmatprep.subr.bf16.mxu0 %v5398_v46  ;;  %v1039_v58 = vrot.slane %v5663_v44, 1 }
  0x50   : > { %4993 = vmatprep.mubr.msk.bf16.mxu1 %vm542_vm1, %v5629_v9  ;;  %v1041_v9 = vrot.slane %v5679_v55, 1 }
  0x51   : > { %v1040_v51 = vsel %vm1023_vm2, %v1037_v47, %v1039_v58  ;;  %v5888_v47 = vld [vmem:[%s5537_s27 + $0x60] sm:$0xff]  }
  0x52   : > { %5112 = vmatpush3.bf16.msra.mxu0 %v5398_v46  ;;  %v1042_v52 = vsel %vm1023_vm2, %v1039_v58, %v1041_v9  ;;  %v1044_v59 = vsel %vm1023_vm2, %v1041_v9, %v1043_v53  ;;  %v5885_v46 = vsel %vm2304_vm3, %v2322_v39, %v2324_v16  ;;  %v1054_v58 = vsel %vm1023_vm2, %v1051_v7, %v1053_v40  ;;  %v5943_v39 = vld [vmem:[%s5537_s27 + $0x80] sm:$0xff]  }
  0x53   : > { %5193 = vmatprep.subr.bf16.mxu0 %v5768_v48  ;;  %v1840_v9 = vshrl.u32 %v5796_v56, 16 }
  0x55   : > { %5034 = vmatmul.mubr.msk.bf16.gmra.mxu0 %vm542_vm1, %v1036_v49  ;;  %v1052_v49 = vsel %vm1023_vm2, %v1049_v17, %v1051_v7  ;;  %v1842_v1 = vrot.slane %v1840_v9, 1 }
  0x56   : > { %5037 = vmatprep.mubr.msk.bf16.mxu0 %vm542_vm1, %v1038_v50  ;;  %v5892_v50 = vld [vmem:[%s5537_s27 + $0x68] sm:$0xff]  }
  0x57   : > { %4994 = vmatmul.mubr.msk.bf16.gmra.mxu1 %vm542_vm1, %v5650_v29  ;;  %v1045_v29 = vrot.slane %v5557_v13, 1 }
  0x58   : > { %4997 = vmatprep.mubr.msk.bf16.mxu1 %vm542_vm1, %v5663_v44  ;;  %v1353_v44 = vld [vmem:[%s5537_s27 + $0xc] sm:$0xf] }
  0x59   : > { %v4546_v57 = vcombine.low %v2292_v54, %v1353_v44  ;;  %v1046_v62 = vsel %vm1023_vm2, %v1043_v53, %v1045_v29  ;;  %v4482_v41 = vcombine.low %v1352_v25, %v1353_v44  ;;  %v1491_v44 = vrot.slane %v5796_v56, 1 }
  0x5a   : > { %v1858_v25 = vshrl.u32 %v5803_v61, 16 }
  0x5b   : > { %v1832_v38 = vshrl.u32 %v4482_v41, 16 }
  0x5d   : > { %5038 = vmatmul.mubr.msk.bf16.gmra.mxu0 %vm542_vm1, %v1040_v51  ;;  %v1843_v51 = vshll.u32 %v5796_v56, 16 }
  0x5e   : > { %5041 = vmatprep.mubr.msk.bf16.mxu0 %vm542_vm1, %v1042_v52  ;;  %v2328_v52 = vrot.slane %v5892_v50, 2 }
  0x5f   : > { %4998 = vmatmul.mubr.msk.bf16.gmra.mxu1 %vm542_vm1, %v5679_v55  ;;  %v2306_v55 = vrot.slane %v5796_v56, 2 }
  0x60   : > { %5001 = vmatprep.mubr.msk.bf16.mxu1 %vm542_vm1, %v5554_v12  ;;  %v2305_v12 = vrot.slane %v4546_v57, 2  ;;  %v5913_v57 = vld [vmem:[%s5537_s27 + $0x70] sm:$0xff]  }
  0x61   : > { %v5825_v14 = vsel %vm2304_vm3, %v2306_v55, %v2308_v0 }
  0x62   : > { %v5817_v4 = vsel %vm2304_vm3, %v2305_v12, %v2306_v55  ;;  %v1058_v55 = vsel %vm1023_vm2, %v1055_v28, %v1057_v5  ;;  %v5920_v12 = vld [vmem:[%s5537_s27 + $0x78] sm:$0xff]   ;;  %v1849_v5 = vshrl.u32 %v5800_v60, 16  ;;  %v1496_v60 = vsel %vm1023_vm2, %v1493_v32, %v1495_v27 }
  0x64   : > { %v1851_v7 = vrot.slane %v1849_v5, 1 }
  0x65   : > { %5042 = vmatmul.mubr.msk.bf16.gmra.mxu0 %vm542_vm1, %v1044_v59  ;;  %v1056_v59 = vsel %vm1023_vm2, %v1053_v40, %v1055_v28  ;;  %v5946_v40 = vld [vmem:[%s5537_s27 + $0x88] sm:$0xff]  }
  0x66   : > { %5045 = vmatprep.mubr.msk.bf16.mxu0 %vm542_vm1, %v1046_v62  ;;  %v1834_v62 = vrot.slane %v1832_v38, 1  ;;  %v2334_v38 = vrot.slane %v5943_v39, 2 }
  0x67   : > { %5002 = vmatmul.mubr.msk.bf16.gmra.mxu1 %vm542_vm1, %v5557_v13  ;;  %v1048_v13 = vsel %vm1023_vm2, %v1045_v29, %v1047_v8  ;;  %v1490_v29 = vrot.slane %v4482_v41, 1 }
  0x68   : > { %5005 = vmatprep.mubr.msk.bf16.mxu1 %vm542_vm1, %v5574_v24  ;;  %v1050_v24 = vsel %vm1023_vm2, %v1047_v8, %v1049_v17  ;;  %v2330_v8 = vrot.slane %v5913_v57, 2 }
  0x69   : > { %v1492_v56 = vsel %vm1023_vm2, %v1490_v29, %v1491_v44  ;;  %v1876_v29 = vshrl.u32 %v5814_v2, 16 }
  0x6a   : > { %v5927_v17 = vsel %vm2304_vm3, %v2328_v52, %v2330_v8 }
  0x6d   : > { %5046 = vmatmul.mubr.msk.bf16.gmra.mxu0 %vm542_vm1, %v1048_v13 }
  0x6e   : > { %5049 = vmatprep.mubr.msk.bf16.mxu0 %vm542_vm1, %v1050_v24  ;;  %v1861_v24 = vshll.u32 %v5803_v61, 16  ;;  %v5410_v61 = vld [vmem:[%s7004_s1 + $0xb0] sm:$0xff]  }
  0x6f   : > { %5006 = vmatmul.mubr.msk.bf16.gmra.mxu1 %vm542_vm1, %v5587_v36  ;;  %v1835_v36 = vshll.u32 %v4482_v41, 16  ;;  %v1860_v41 = vrot.slane %v1858_v25, 1  ;;  %v5422_v25 = vld [vmem:[%s7004_s1 + $0xa0] sm:$0xff]  }
  0x70   : > { %5009 = vmatprep.mubr.msk.bf16.mxu1 %vm542_vm1, %v5596_v43  ;;  %v2326_v43 = vrot.slane %v5888_v47, 2  ;;  %v1863_v28 = vrot.slane %v1861_v24, 2 }
  0x71   : > { %v1837_v0 = vrot.slane %v1835_v36, 2  ;;  %v2336_v36 = vrot.slane %v5946_v40, 2 }
  0x72   : > { %v5901_v53 = vsel %vm2304_vm3, %v2324_v16, %v2326_v43  ;;  %v5905_v54 = vsel %vm2304_vm3, %v2326_v43, %v2328_v52  ;;  %v1854_v16 = vrot.slane %v1852_v18, 2  ;;  %v1867_v43 = vshrl.u32 %v5808_v63, 16 }
  0x73   : > { %v1838_v22 = vor.u32 %v1837_v0, %v1834_v62  ;;  %v1864_v52 = vor.u32 %v1863_v28, %v1860_v41  ;;  %v5416_v62 = vld [vmem:[%s7004_s1 + $0xa8] sm:$0xff]   ;;  %v5978_v0 = vld [vmem:[%s5537_s27 + $0x90] sm:$0xff]   ;;  %v1894_v41 = vshrl.u32 %v5837_v19, 16  ;;  %v1897_v28 = vshll.u32 %v5837_v19, 16 }
  0x74   : > { %v1855_v9 = vor.u32 %v1854_v16, %v1851_v7  ;;  %v1888_v7 = vshll.u32 %v5822_v10, 16 }
  0x75   : > { %5050 = vmatmul.mubr.msk.bf16.gmra.mxu0 %vm542_vm1, %v1052_v49  ;;  %v1494_v49 = vsel %vm1023_vm2, %v1491_v44, %v1493_v32  ;;  %v1879_v44 = vshll.u32 %v5814_v2, 16 }
  0x76   : > { %5053 = vmatprep.mubr.msk.bf16.mxu0 %vm542_vm1, %v1054_v58 }
  0x77   : > { %5010 = vmatmul.mubr.msk.bf16.gmra.mxu1 %vm542_vm1, %v5625_v3  ;;  %v1845_v3 = vrot.slane %v1843_v51, 2  ;;  %v1870_v51 = vshll.u32 %v5808_v63, 16  ;;  %v1881_v5 = vrot.slane %v1879_v44, 2 }
  0x78   : > { %5013 = vmatprep.mubr.msk.bf16.mxu1 %vm542_vm1, %v5633_v11  ;;  %v2332_v11 = vrot.slane %v5920_v12, 2 }
  0x79   : > { %v1846_v13 = vor.u32 %v1845_v3, %v1842_v1  ;;  %v1869_v3 = vrot.slane %v1867_v43, 1 }
  0x7a   : > { %v5933_v21 = vsel %vm2304_vm3, %v2330_v8, %v2332_v11  ;;  %v5959_v58 = vsel %vm2304_vm3, %v2332_v11, %v2334_v38  ;;  %v1872_v8 = vrot.slane %v1870_v51, 2  ;;  %v5982_v11 = vld [vmem:[%s5537_s27 + $0x98] ss:$0 sps:$4 sm:$0x33]   ;;  %v1896_v51 = vrot.slane %v1894_v41, 1 }
  0x7b   : > { %v1856_v1 = vsel %vm1830_vm4, %v1846_v13, %v1855_v9 }
  0x7c   : > { %v1873_v32 = vor.u32 %v1872_v8, %v1869_v3  ;;  %v1915_v3 = vshll.u32 %v5857_v31, 16  ;;  %v6038_v8 = vld [vmem:[%s7004_s1 + $0x118] sm:$0xff]  }
  0x7d   : > { %5054 = vmatmul.mubr.msk.bf16.gmra.mxu0 %vm542_vm1, %v1056_v59  ;;  %v1497_v59 = vrot.slane %v5808_v63, 1  ;;  %v5411_v63 = vld [vmem:[%s7004_s1 + $0xd0] sm:$0xff]  }
  0x7e   : > { %5057 = vmatprep.mubr.msk.bf16.mxu0 %vm542_vm1, %v1058_v55  ;;  %v1499_v55 = vrot.slane %v5814_v2, 1  ;;  %v2338_v2 = vrot.slane %v5978_v0, 2 }
  0x7f   : > { %5014 = vmatmul.mubr.msk.bf16.gmra.mxu1 %vm542_vm1, %v5658_v37  ;;  %v1847_v37 = vsel %vm1830_vm4, %v1838_v22, %v1846_v13  ;;  %v1498_v18 = vsel %vm1023_vm2, %v1495_v27, %v1497_v59  ;;  %v2340_v22 = vrot.slane %v5982_v11, 2  ;;  %v1885_v27 = vshrl.u32 %v5822_v10, 16 }
  0x80   : > { %5069 = vmatprep.mubr.msk.bf16.mxu1 %vm542_vm1, %v1492_v56  ;;  %v1865_v56 = vsel %vm1830_vm4, %v1855_v9, %v1864_v52  ;;  %v1500_v13 = vsel %vm1023_vm2, %v1497_v59, %v1499_v55  ;;  %v5997_v24 = vsel %vm2304_vm3, %v2336_v36, %v2338_v2  ;;  %v1890_v9 = vrot.slane %v1888_v7, 2 }
  0x81   : > { %v6004_v16 = vsel %vm2304_vm3, %v2338_v2, %v2340_v22  ;;  %v1903_v59 = vshrl.u32 %v5840_v20, 16  ;;  %v6048_v2 = vld [vmem:[%s5537_s27 + $0x18] sm:$0xff]  }
  0x85   : > { %5058 = vmatmul.mubr.msk.bf16.gmra.mxu0 %vm542_vm1, %v5719_v6  ;;  %v5965_v6 = vsel %vm2304_vm3, %v2334_v38, %v2336_v36  ;;  %v1501_v38 = vrot.slane %v5822_v10, 1  ;;  %v6018_v36 = vld [vmem:[%s7004_s1 + $0xf8] sm:$0xff]   ;;  %v5423_v10 = vld [vmem:[%s7004_s1 + $0xc0] sm:$0xff]  }
  0x86   : > { %5113 = vmatprep.mubr.msk.bf16.mxu0 %vm542_vm1, %v1847_v37 }
  0x87   : > { %5070 = vmatmul.mubr.msk.bf16.vlgmr.msra.gmra.mxu1 %vm542_vm1, %v1494_v49  ;;  %v1503_v49 = vrot.slane %v5837_v19, 1  ;;  %v1502_v19 = vsel %vm1023_vm2, %v1499_v55, %v1501_v38 }
  0x88   : > { %5073 = vmatprep.mubr.msk.bf16.mxu1 %vm542_vm1, %v1496_v60  ;;  %5150 = vmatpush3.bf16.msra.mxu1 %v5751_v42  ;;  %v1878_v42 = vrot.slane %v1876_v29, 1  ;;  %v1874_v60 = vsel %vm1830_vm4, %v1864_v52, %v1873_v32  ;;  %v1899_v29 = vrot.slane %v1897_v28, 2 }
  0x89   : > { %5151 = vmatprep.subr.bf16.mxu1 %v5410_v61  ;;  %v1504_v52 = vsel %vm1023_vm2, %v1501_v38, %v1503_v49 }
  0x8a   : > { %v1882_v37 = vor.u32 %v1881_v5, %v1878_v42  ;;  %v1900_v55 = vor.u32 %v1899_v29, %v1896_v51  ;;  %v6043_v42 = vld [vmem:[%s5537_s27 + $0x14] sm:$0xf]  ;;  %v3573_v5 = vld [vmem:[%s5537_s27 + $0x10] sm:$0x8]  ;;  %v1930_v51 = vshrl.u32 %v5888_v47, 16  ;;  %v1933_v29 = vshll.u32 %v5888_v47, 16 }
  0x8c   : > { %5152 = vmatpush3.bf16.msra.mxu1 %v5410_v61  ;;  %v1887_v61 = vrot.slane %v1885_v27, 1  ;;  %v1883_v43 = vsel %vm1830_vm4, %v1873_v32, %v1882_v37  ;;  %v6053_v27 = vld [vmem:[%s5537_s27 + $0x20] sm:$0xff]  }
  0x8d   : > { %5114 = vmatmul.mubr.msk.bf16.vlgmr.msra.gmra.mxu0 %vm542_vm1, %v1856_v1  ;;  %5153 = vmatprep.subr.bf16.mxu1 %v5416_v62  ;;  %v1912_v1 = vshrl.u32 %v5857_v31, 16 }
  0x8e   : > { %5194 = vmatpush3.bf16.msra.mxu0 %v5768_v48  ;;  %5117 = vmatprep.mubr.msk.bf16.mxu0 %vm542_vm1, %v1865_v56  ;;  %v5417_v48 = vld [vmem:[%s7004_s1 + $0xc8] sm:$0xff]   ;;  %v1891_v44 = vor.u32 %v1890_v9, %v1887_v61  ;;  %v1505_v56 = vrot.slane %v5840_v20, 1  ;;  %v1921_v61 = vshrl.u32 %v5862_v33, 16  ;;  %v1924_v9 = vshll.u32 %v5862_v33, 16 }
  0x8f   : > { %5074 = vmatmul.mubr.msk.bf16.gmra.mxu1 %vm542_vm1, %v1498_v18  ;;  %5195 = vmatprep.subr.bf16.mxu0 %v5411_v63  ;;  %v4633_v18 = vcombine.low %v3573_v5, %v6043_v42  ;;  %v1914_v32 = vrot.slane %v1912_v1, 1  ;;  %v6082_v1 = vld [vmem:[%s5537_s27 + $0x30] sm:$0xff]   ;;  %v1935_v5 = vrot.slane %v1933_v29, 2 }
  0x90   : > { %5077 = vmatprep.mubr.msk.bf16.mxu1 %vm542_vm1, %v1500_v13  ;;  %5154 = vmatpush3.bf16.msra.mxu1 %v5416_v62  ;;  %v1906_v62 = vshll.u32 %v5840_v20, 16  ;;  %v1892_v22 = vsel %vm1830_vm4, %v1882_v37, %v1891_v44  ;;  %v1905_v13 = vrot.slane %v1903_v59, 1  ;;  %v1901_v7 = vsel %vm1830_vm4, %v1891_v44, %v1900_v55 }
  0x91   : > { %5155 = vmatprep.subr.bf16.mxu1 %v5422_v25  ;;  %v1917_v20 = vrot.slane %v1915_v3, 2  ;;  %v3586_v41 = vrot.slane %v4633_v18, 3  ;;  %v1506_v28 = vsel %vm1023_vm2, %v1503_v49, %v1505_v56  ;;  %v1923_v59 = vrot.slane %v1921_v61, 1 }
  0x92   : > { %5196 = vmatpush3.bf16.msra.mxu0 %v5411_v63  ;;  %v1507_v63 = vrot.slane %v5857_v31, 1  ;;  %v3587_v31 = vrot.slane %v6048_v2, 3 }
  0x93   : > { %5197 = vmatprep.subr.bf16.mxu0 %v5417_v48 }
  0x94   : > { %5156 = vmatpush3.bf16.msra.mxu1 %v5422_v25  ;;  %v1908_v25 = vrot.slane %v1906_v62, 2  ;;  %v1508_v37 = vsel %vm1023_vm2, %v1505_v56, %v1507_v63  ;;  %v6063_v38 = vsel %vm3585_vm5, %v3586_v41, %v3587_v31  ;;  %v1926_v62 = vrot.slane %v1924_v9, 2  ;;  %v6110_v9 = vld [vmem:[%s5537_s27 + $0x40] sm:$0xff]  }
  0x95   : > { %5118 = vmatmul.mubr.msk.bf16.gmra.mxu0 %vm542_vm1, %v1874_v60  ;;  %5237 = vmatprep.subr.bf16.mxu1 %v6018_v36  ;;  %v1932_v56 = vrot.slane %v1930_v51, 1  ;;  %v1951_v41 = vshll.u32 %v5913_v57, 16 }
  0x96   : > { %5121 = vmatprep.mubr.msk.bf16.mxu0 %vm542_vm1, %v1883_v43  ;;  %5198 = vmatpush3.bf16.msra.mxu0 %v5417_v48  ;;  %v3589_v48 = vrot.slane %v6053_v27, 3  ;;  %v1909_v60 = vor.u32 %v1908_v25, %v1905_v13  ;;  %v1918_v43 = vor.u32 %v1917_v20, %v1914_v32  ;;  %v1927_v13 = vor.u32 %v1926_v62, %v1923_v59 }
  0x97   : > { %5078 = vmatmul.mubr.msk.bf16.gmra.mxu1 %vm542_vm1, %v1502_v19  ;;  %5199 = vmatprep.subr.bf16.mxu0 %v5423_v10  ;;  %v1511_v19 = vrot.slane %v5888_v47, 1  ;;  %v1939_v25 = vshrl.u32 %v5892_v50, 16  ;;  %v1942_v32 = vshll.u32 %v5892_v50, 16  ;;  %v1948_v20 = vshrl.u32 %v5913_v57, 16 }
  0x98   : > { %5081 = vmatprep.mubr.msk.bf16.mxu1 %vm542_vm1, %v1504_v52  ;;  %v6069_v49 = vsel %vm3585_vm5, %v3587_v31, %v3589_v48  ;;  %v6078_v52 = vld [vmem:[%s5537_s27 + $0x28] sm:$0xff]   ;;  %v1910_v44 = vsel %vm1830_vm4, %v1900_v55, %v1909_v60  ;;  %v1919_v3 = vsel %vm1830_vm4, %v1909_v60, %v1918_v43  ;;  %v1513_v31 = vrot.slane %v5892_v50, 1 }
  0x99   : > { %v3591_v18 = vrot.slane %v6078_v52, 3  ;;  %v1941_v60 = vrot.slane %v1939_v25, 1  ;;  %v1944_v61 = vrot.slane %v1942_v32, 2  ;;  %v1950_v29 = vrot.slane %v1948_v20, 1 }
  0x9a   : > { %5200 = vmatpush3.bf16.msra.mxu0 %v5423_v10  ;;  %v1509_v10 = vrot.slane %v5862_v33, 1  ;;  %v3593_v33 = vrot.slane %v6082_v1, 3  ;;  %v1514_v59 = vsel %vm1023_vm2, %v1511_v19, %v1513_v31  ;;  %v7007_v50 = vrot.slane %v6110_v9, 3 }
  0x9b   : > { %5281 = vmatprep.subr.bf16.mxu0 %v6038_v8  ;;  %v6091_v55 = vsel %vm3585_vm5, %v3589_v48, %v3591_v18  ;;  %v6106_v48 = vld [vmem:[%s5537_s27 + $0x38] sm:$0xff]   ;;  %v1945_v62 = vor.u32 %v1944_v61, %v1941_v60 }
  0x9c   : > { %v1512_v47 = vsel %vm1023_vm2, %v1509_v10, %v1511_v19 }
  0x9d   : > { %5122 = vmatmul.mubr.msk.bf16.gmra.mxu0 %vm542_vm1, %v1892_v22  ;;  %v1510_v22 = vsel %vm1023_vm2, %v1507_v63, %v1509_v10  ;;  %v6097_v63 = vsel %vm3585_vm5, %v3591_v18, %v3593_v33  ;;  %v1953_v10 = vrot.slane %v1951_v41, 2  ;;  %v1966_v18 = vshrl.u32 %v5943_v39, 16 }
  0x9e   : > { %5125 = vmatprep.mubr.msk.bf16.mxu0 %vm542_vm1, %v1901_v7  ;;  %v1936_v7 = vor.u32 %v1935_v5, %v1932_v56  ;;  %v1960_v56 = vshll.u32 %v5920_v12, 16 }
  0x9f   : > { %5082 = vmatmul.mubr.msk.bf16.gmra.mxu1 %vm542_vm1, %v1506_v28  ;;  %v1515_v28 = vrot.slane %v5913_v57, 1  ;;  %v1954_v5 = vor.u32 %v1953_v10, %v1950_v29  ;;  %v1968_v41 = vrot.slane %v1966_v18, 1  ;;  %v1987_v29 = vshll.u32 %v5978_v0, 16 }
  0xa0   : > { %5085 = vmatprep.mubr.msk.bf16.mxu1 %vm542_vm1, %v1508_v37  ;;  %v1928_v37 = vsel %vm1830_vm4, %v1918_v43, %v1927_v13  ;;  %v1937_v51 = vsel %vm1830_vm4, %v1927_v13, %v1936_v7  ;;  %v1946_v13 = vsel %vm1830_vm4, %v1936_v7, %v1945_v62  ;;  %v1962_v32 = vrot.slane %v1960_v56, 2 }
  0xa1   : > { %v1516_v57 = vsel %vm1023_vm2, %v1513_v31, %v1515_v28  ;;  %v1955_v20 = vsel %vm1830_vm4, %v1945_v62, %v1954_v5  ;;  %v1523_v10 = vrot.slane %v5978_v0, 1  ;;  %v1989_v56 = vrot.slane %v1987_v29, 2 }
  0xa2   : > { %v2776_v29 = vrot.slane %v6078_v52, 2 }
  0xa5   : > { %5126 = vmatmul.mubr.msk.bf16.gmra.mxu0 %vm542_vm1, %v1910_v44  ;;  %v3595_v44 = vrot.slane %v6106_v48, 3 }
  0xa6   : > { %5129 = vmatprep.mubr.msk.bf16.mxu0 %vm542_vm1, %v1919_v3  ;;  %v1957_v3 = vshrl.u32 %v5920_v12, 16 }
  0xa7   : > { %5086 = vmatmul.mubr.msk.bf16.gmra.mxu1 %vm542_vm1, %v1510_v22  ;;  %v6119_v43 = vsel %vm3585_vm5, %v3593_v33, %v3595_v44  ;;  %v6127_v19 = vsel %vm3585_vm5, %v3595_v44, %v7007_v50  ;;  %v1969_v22 = vshll.u32 %v5943_v39, 16  ;;  %v1517_v33 = vrot.slane %v5920_v12, 1  ;;  %v6343_v50 = vld [vmem:[%s5537_s27 + $0x88] sm:$0xff]  }
  0xa8   : > { %5089 = vmatprep.mubr.msk.bf16.mxu1 %vm542_vm1, %v1512_v47  ;;  %v1519_v47 = vrot.slane %v5943_v39, 1  ;;  %v1959_v25 = vrot.slane %v1957_v3, 1  ;;  %v1975_v12 = vshrl.u32 %v5946_v40, 16  ;;  %v1978_v39 = vshll.u32 %v5946_v40, 16  ;;  %7028 = vst [vmem:[#allocation16_spill] sm:$0xff] %v6343_v50 }
  0xa9   : > { %v1971_v31 = vrot.slane %v1969_v22, 2  ;;  %v5425_v22 = vld [vmem:[%s5537_s27 + $0x98] ss:$0 sps:$4 sm:$0x11]  }
  0xaa   : > { %v1520_v60 = vsel %vm1023_vm2, %v1517_v33, %v1519_v47  ;;  %v1963_v61 = vor.u32 %v1962_v32, %v1959_v25  ;;  %v1525_v25 = vrot.slane %v5425_v22, 1  ;;  %v2633_v32 = vld [vmem:[%s5537_s27 + $0x10] sm:$0xc] }
  0xab   : > { %v1972_v7 = vor.u32 %v1971_v31, %v1968_v41 }
  0xac   : > { %v1964_v44 = vsel %vm1830_vm4, %v1954_v5, %v1963_v61  ;;  %v1996_v5 = vshll.u32 %v5982_v11, 16 }
  0xad   : > { %5130 = vmatmul.mubr.msk.bf16.gmra.mxu0 %vm542_vm1, %v1928_v37  ;;  %v1518_v37 = vsel %vm1023_vm2, %v1515_v28, %v1517_v33  ;;  %v1521_v28 = vrot.slane %v5946_v40, 1  ;;  %v1973_v62 = vsel %vm1830_vm4, %v1963_v61, %v1972_v7 }
  0xae   : > { %5133 = vmatprep.mubr.msk.bf16.mxu0 %vm542_vm1, %v1937_v51  ;;  %v1984_v51 = vshrl.u32 %v5978_v0, 16  ;;  %v1993_v0 = vshrl.u32 %v5982_v11, 16  ;;  %v1998_v41 = vrot.slane %v1996_v5, 2  ;;  %v6239_v5 = vld [vmem:[%s5537_s27 + $0x50] sm:$0xff]  }
  0xaf   : > { %5090 = vmatmul.mubr.msk.bf16.gmra.mxu1 %vm542_vm1, %v1514_v59  ;;  %v1977_v59 = vrot.slane %v1975_v12, 1  ;;  %v1522_v18 = vsel %vm1023_vm2, %v1519_v47, %v1521_v28  ;;  %v1524_v33 = vsel %vm1023_vm2, %v1521_v28, %v1523_v10  ;;  %v2772_v12 = vrot.slane %v6048_v2, 2 }
  0xb0   : > { %5093 = vmatprep.mubr.msk.bf16.mxu1 %vm542_vm1, %v1516_v57  ;;  %v1980_v57 = vrot.slane %v1978_v39, 2  ;;  %v1986_v3 = vrot.slane %v1984_v51, 1  ;;  %v2774_v51 = vrot.slane %v6053_v27, 2 }
  0xb2   : > { %v1981_v40 = vor.u32 %v1980_v57, %v1977_v59  ;;  %v2775_v28 = vsel %vm2304_vm3, %v2772_v12, %v2774_v51  ;;  %v5444_v59 = vld [vmem:[%s7004_s1 + $0x108] sm:$0xff]  }
  0xb4   : > { %v1982_v47 = vsel %vm1830_vm4, %v1972_v7, %v1981_v40  ;;  %v5437_v7 = vld [vmem:[%s7004_s1 + $0xf0] sm:$0xff]  }
  0xb5   : > { %5134 = vmatmul.mubr.msk.bf16.gmra.mxu0 %vm542_vm1, %v1946_v13  ;;  %v1990_v13 = vor.u32 %v1989_v56, %v1986_v3 }
  0xb6   : > { %5137 = vmatprep.mubr.msk.bf16.mxu0 %vm542_vm1, %v1955_v20  ;;  %v1995_v20 = vrot.slane %v1993_v0, 1 }
  0xb7   : > { %5094 = vmatmul.mubr.msk.bf16.gmra.mxu1 %vm542_vm1, %v1518_v37  ;;  %v1991_v31 = vsel %vm1830_vm4, %v1981_v40, %v1990_v13  ;;  %v6164_v37 = vcombine.low %v2633_v32, %v6043_v42  ;;  %v6247_v32 = vld [vmem:[%s5537_s27 + $0x58] sm:$0xff]  }
  0xb8   : > { %5097 = vmatprep.mubr.msk.bf16.mxu1 %vm542_vm1, %v1520_v60  ;;  %v1526_v60 = vsel %vm1023_vm2, %v1523_v10, %v1525_v25  ;;  %v1999_v11 = vor.u32 %v1998_v41, %v1995_v20  ;;  %v2777_v10 = vsel %vm2304_vm3, %v2774_v51, %v2776_v29  ;;  %v2786_v20 = vrot.slane %v6239_v5, 2  ;;  %v6279_v51 = vld [vmem:[%s5537_s27 + $0x68] sm:$0xff]  }
  0xb9   : > { %v2771_v61 = vrot.slane %v6164_v37, 2 }
  0xba   : > { %v2000_v39 = vsel %vm1830_vm4, %v1990_v13, %v1999_v11 }
  0xbb   : > { %v2773_v42 = vsel %vm2304_vm3, %v2771_v61, %v2772_v12 }
  0xbd   : > { %5138 = vmatmul.mubr.msk.bf16.gmra.mxu0 %vm542_vm1, %v1964_v44  ;;  %v2780_v44 = vrot.slane %v6106_v48, 2 }
  0xbe   : > { %5141 = vmatprep.mubr.msk.bf16.mxu0 %vm542_vm1, %v1973_v62  ;;  %v6214_v62 = vld [vmem:[%s5537_s27 + $0x48] sm:$0xff]  }
  0xbf   : > { %5098 = vmatmul.mubr.msk.bf16.gmra.mxu1 %vm542_vm1, %v1522_v18  ;;  %v2784_v22 = vrot.slane %v6214_v62, 2 }
  0xc0   : > { %5101 = vmatprep.mubr.msk.bf16.mxu1 %vm542_vm1, %v1524_v33 }
  0xc1   : > { %v2787_v12 = vsel %vm2304_vm3, %v2784_v22, %v2786_v20 }
  0xc5   : > { %5142 = vmatmul.mubr.msk.bf16.gmra.mxu0 %vm542_vm1, %v1982_v47 }
  0xc6   : > { %5145 = vmatprep.mubr.msk.bf16.mxu0 %vm542_vm1, %v1991_v31 }
  0xc7   : > { %5102 = vmatmul.mubr.msk.bf16.gmra.mxu1 %vm542_vm1, %v1526_v60  ;;  %v2788_v60 = vrot.slane %v6247_v32, 2 }
  0xc8   : > { %5157 = vmatprep.mubr.msk.bf16.mxu1 %vm542_vm1, %v5817_v4  ;;  %v5443_v4 = vld [vmem:[%s7004_s1 + $0xe8] sm:$0xff]  }
  0xcd   : > { %5146 = vmatmul.mubr.msk.bf16.gmra.mxu0 %vm542_vm1, %v2000_v39  ;;  %v6271_v39 = vld [vmem:[%s5537_s27 + $0x60] sm:$0xff]  }
  0xce   : > { %5201 = vmatprep.mubr.msk.bf16.mxu0 %vm542_vm1, %v2773_v42 }
  0xcf   : > { %5158 = vmatmul.mubr.msk.bf16.vlgmr.msra.gmra.mxu1 %vm542_vm1, %v5825_v14  ;;  %v5438_v14 = vld [vmem:[%s7004_s1 + $0x110] sm:$0xff]  }
  0xd0   : > { %5161 = vmatprep.mubr.msk.bf16.mxu1 %vm542_vm1, %v5828_v15  ;;  %5238 = vmatpush3.bf16.msra.mxu1 %v6018_v36  ;;  %v5449_v15 = vld [vmem:[%s7004_s1 + $0xe0] sm:$0xff]   ;;  %v2778_v36 = vrot.slane %v6082_v1, 2 }
  0xd1   : > { %5239 = vmatprep.subr.bf16.mxu1 %v5437_v7 }
  0xd2   : > { %v2781_v57 = vsel %vm2304_vm3, %v2778_v36, %v2780_v44 }
  0xd4   : > { %5240 = vmatpush3.bf16.msra.mxu1 %v5437_v7 }
  0xd5   : > { %5202 = vmatmul.mubr.msk.bf16.vlgmr.msra.gmra.mxu0 %vm542_vm1, %v2775_v28  ;;  %5241 = vmatprep.subr.bf16.mxu1 %v5443_v4 }
  0xd6   : > { %5282 = vmatpush3.bf16.msra.mxu0 %v6038_v8  ;;  %5205 = vmatprep.mubr.msk.bf16.mxu0 %vm542_vm1, %v2777_v10  ;;  %v2779_v8 = vsel %vm2304_vm3, %v2776_v29, %v2778_v36 }
  0xd7   : > { %5162 = vmatmul.mubr.msk.bf16.gmra.mxu1 %vm542_vm1, %v5845_v23  ;;  %5283 = vmatprep.subr.bf16.mxu0 %v5438_v14  ;;  %v5450_v23 = vld [vmem:[%s7004_s1 + $0x100] sm:$0xff]  }
  0xd8   : > { %5165 = vmatprep.mubr.msk.bf16.mxu1 %vm542_vm1, %v5850_v26  ;;  %5242 = vmatpush3.bf16.msra.mxu1 %v5443_v4  ;;  %v2782_v26 = vrot.slane %v6110_v9, 2  ;;  %v2790_v4 = vrot.slane %v6271_v39, 2 }
  0xd9   : > { %5243 = vmatprep.subr.bf16.mxu1 %v5449_v15 }
  0xda   : > { %5284 = vmatpush3.bf16.msra.mxu0 %v5438_v14  ;;  %v2783_v0 = vsel %vm2304_vm3, %v2780_v44, %v2782_v26  ;;  %v2785_v25 = vsel %vm2304_vm3, %v2782_v26, %v2784_v22  ;;  %v2792_v14 = vrot.slane %v6279_v51, 2  ;;  %v2791_v44 = vsel %vm2304_vm3, %v2788_v60, %v2790_v4 }
  0xdb   : > { %5285 = vmatprep.subr.bf16.mxu0 %v5444_v59 }
  0xdc   : > { %5244 = vmatpush3.bf16.msra.mxu1 %v5449_v15 }
  0xdd   : > { %v6219_v3 = vpop.f32.mrf.mxu0  ;;  %5206 = vmatmul.mubr.msk.bf16.gmra.mxu0 %vm542_vm1, %v2779_v8  ;;  %v6224_v56 = vpop.f32.mrf.mxu1 }
  0xde   : > { %5209 = vmatprep.mubr.msk.bf16.mxu0 %vm542_vm1, %v2781_v57  ;;  %5286 = vmatpush3.bf16.msra.mxu0 %v5444_v59  ;;  %v6303_v59 = vld [vmem:[%s5537_s27 + $0x70] sm:$0xff]  }
  0xdf   : > { %5166 = vmatmul.mubr.msk.bf16.gmra.mxu1 %vm542_vm1, %v5853_v30  ;;  %v6228_v18 = vpop.f32.mrf.mxu0  ;;  %5287 = vmatprep.subr.bf16.mxu0 %v5450_v23  ;;  %v6233_v33 = vpop.f32.mrf.mxu1  ;;  %v2794_v22 = vrot.slane %v6303_v59, 2 }
  0xe0   : > { %5169 = vmatprep.mubr.msk.bf16.mxu1 %vm542_vm1, %v5866_v34 }
  0xe1   : > { %v6235_v40 = vpop.f32.mrf.mxu0  ;;  %v6241_v13 = vpop.f32.mrf.mxu1 }
  0xe2   : > { %5288 = vmatpush3.bf16.msra.mxu0 %v5450_v23  ;;  %v6311_v23 = vld [vmem:[%s5537_s27 + $0x78] sm:$0xff]  }
  0xe3   : > { %v6243_v30 = vpop.f32.mrf.mxu0  ;;  %v6249_v47 = vpop.f32.mrf.mxu1  ;;  %7022 = vst [vmem:[#allocation10_spill] sm:$0xff] %v6311_v23 }
  0xe4   : > { %7014 = vst [vmem:[#allocation2_spill] sm:$0xff] %v6249_v47 }
  0xe5   : > { %v6251_v34 = vpop.f32.mrf.mxu0  ;;  %5210 = vmatmul.mubr.msk.bf16.gmra.mxu0 %vm542_vm1, %v2783_v0  ;;  %v6256_v41 = vpop.f32.mrf.mxu1 }
  0xe6   : > { %5213 = vmatprep.mubr.msk.bf16.mxu0 %vm542_vm1, %v2785_v25  ;;  %7015 = vst [vmem:[#allocation3_spill] sm:$0xff] %v6256_v41 }
  0xe7   : > { %5170 = vmatmul.mubr.msk.bf16.gmra.mxu1 %vm542_vm1, %v5869_v35  ;;  %v6260_v31 = vpop.f32.mrf.mxu0  ;;  %v6265_v11 = vpop.f32.mrf.mxu1  ;;  %v2789_v35 = vsel %vm2304_vm3, %v2786_v20, %v2788_v60  ;;  %v2796_v20 = vrot.slane %v6311_v23, 2 }
  0xe8   : > { %5173 = vmatprep.mubr.msk.bf16.mxu1 %vm542_vm1, %v5879_v45  ;;  %7016 = vst [vmem:[#allocation4_spill] sm:$0xff] %v6265_v11 }
  0xe9   : > { %v6267_v61 = vpop.f32.mrf.mxu0  ;;  %v6273_v42 = vpop.f32.mrf.mxu1 }
  0xea   : > { %7017 = vst [vmem:[#allocation5_spill] sm:$0xff] %v6273_v42 }
  0xeb   : > { %v6275_v7 = vpop.f32.mrf.mxu0  ;;  %v6281_v29 = vpop.f32.mrf.mxu1 }
  0xec   : > { %7018 = vst [vmem:[#allocation6_spill] sm:$0xff] %v6281_v29 }
  0xed   : > { %v6283_v45 = vpop.f32.mrf.mxu0  ;;  %5214 = vmatmul.mubr.msk.bf16.gmra.mxu0 %vm542_vm1, %v2787_v12  ;;  %v6288_v28 = vpop.f32.mrf.mxu1 }
  0xee   : > { %5217 = vmatprep.mubr.msk.bf16.mxu0 %vm542_vm1, %v2789_v35  ;;  %7019 = vst [vmem:[#allocation7_spill] sm:$0xff] %v6288_v28  ;;  %v2795_v35 = vsel %vm2304_vm3, %v2792_v14, %v2794_v22 }
  0xef   : > { %5174 = vmatmul.mubr.msk.bf16.gmra.mxu1 %vm542_vm1, %v5885_v46  ;;  %v6292_v10 = vpop.f32.mrf.mxu0  ;;  %v6297_v15 = vpop.f32.mrf.mxu1  ;;  %v2793_v46 = vsel %vm2304_vm3, %v2790_v4, %v2792_v14  ;;  %v6335_v4 = vld [vmem:[%s5537_s27 + $0x80] sm:$0xff]  }
  0xf0   : > { %5177 = vmatprep.mubr.msk.bf16.mxu1 %vm542_vm1, %v5901_v53  ;;  %7020 = vst [vmem:[#allocation8_spill] sm:$0xff] %v6297_v15  ;;  %7026 = vst [vmem:[#allocation14_spill] sm:$0xff] %v6335_v4  ;;  %v3121_v15 = vshrl.u32 %v6048_v2, 16 }
  0xf1   : > { %v6299_v36 = vpop.f32.mrf.mxu0  ;;  %v6305_v8 = vpop.f32.mrf.mxu1 }
  0xf2   : > { %7021 = vst [vmem:[#allocation9_spill] sm:$0xff] %v6305_v8  ;;  %v3116_v8 = vshll.u32 %v6164_v37, 16 }
  0xf3   : > { %v6307_v57 = vpop.f32.mrf.mxu0  ;;  %v6313_v26 = vpop.f32.mrf.mxu1 }
  0xf4   : > { %7023 = vst [vmem:[#allocation11_spill] sm:$0xff] %v6313_v26  ;;  %v3118_v41 = vrot.slane %v3116_v8, 3 }
  0xf5   : > { %v6315_v53 = vpop.f32.mrf.mxu0  ;;  %5218 = vmatmul.mubr.msk.bf16.gmra.mxu0 %vm542_vm1, %v2791_v44  ;;  %v6320_v0 = vpop.f32.mrf.mxu1 }
  0xf6   : > { %5221 = vmatprep.mubr.msk.bf16.mxu0 %vm542_vm1, %v2793_v46  ;;  %7024 = vst [vmem:[#allocation12_spill] sm:$0xff] %v6320_v0 }
  0xf7   : > { %5178 = vmatmul.mubr.msk.bf16.gmra.mxu1 %vm542_vm1, %v5905_v54  ;;  %v6324_v25 = vpop.f32.mrf.mxu0  ;;  %v6329_v60 = vpop.f32.mrf.mxu1  ;;  %v2797_v54 = vsel %vm2304_vm3, %v2794_v22, %v2796_v20  ;;  %v2800_v22 = vrot.slane %v6343_v50, 2  ;;  %v6369_v50 = vld [vmem:[%s5537_s27 + $0x90] sm:$0xff]  }
  0xf8   : > { %5181 = vmatprep.mubr.msk.bf16.mxu1 %vm542_vm1, %v5927_v17  ;;  %7025 = vst [vmem:[#allocation13_spill] sm:$0xff] %v6329_v60  ;;  %v2798_v17 = vrot.slane %v6335_v4, 2  ;;  %v6375_v4 = vld [vmem:[%s5537_s27 + $0x98] sm:$0xff]  }
  0xf9   : > { %v6331_v12 = vpop.f32.mrf.mxu0  ;;  %v6337_v44 = vpop.f32.mrf.mxu1 }
  0xfa   : > { %7027 = vst [vmem:[#allocation15_spill] sm:$0xff] %v6337_v44  ;;  %v2799_v29 = vsel %vm2304_vm3, %v2796_v20, %v2798_v17 }
  0xfb   : > { %v6339_v46 = vpop.f32.mrf.mxu0  ;;  %v6345_v0 = vpop.f32.mrf.mxu1 }
  0xfc   : > { %7029 = vst [vmem:[#allocation17_spill] sm:$0xff] %v6345_v0 }
  0xfd   : > { %v6347_v26 = vpop.f32.mrf.mxu0  ;;  %5222 = vmatmul.mubr.msk.bf16.gmra.mxu0 %vm542_vm1, %v2795_v35  ;;  %v4983_v14 = vpop.f32.mrf.mxu1 }
  0xfe   : > { %5225 = vmatprep.mubr.msk.bf16.mxu0 %vm542_vm1, %v2797_v54  ;;  %v877_v0 = vadd.f32 %v4983_v14, %v6219_v3  ;;  %v3113_v54 = vshrl.u32 %v6164_v37, 16 }
  0xff   : > { %5182 = vmatmul.mubr.msk.bf16.gmra.mxu1 %vm542_vm1, %v5933_v21  ;;  %v6354_v44 = vpop.f32.mrf.mxu0  ;;  %v868_v35 = vpop.f32.mrf.mxu1  ;;  %v3124_v21 = vshll.u32 %v6048_v2, 16 }
 0x100   : > { %5185 = vmatprep.mubr.msk.bf16.mxu1 %vm542_vm1, %v5959_v58  ;;  %v869_v28 = vadd.f32 %v868_v35, %v6228_v18  ;;  %v2801_v58 = vsel %vm2304_vm3, %v2798_v17, %v2800_v22  ;;  %v3115_v2 = vrot.slane %v3113_v54, 2  ;;  %v3123_v18 = vrot.slane %v3121_v15, 2 }
 0x101   : > { %v6360_v60 = vpop.f32.mrf.mxu0  ;;  %v4984_v3 = vpop.f32.mrf.mxu1  ;;  %v3126_v35 = vrot.slane %v3124_v21, 3  ;;  %v2802_v17 = vrot.slane %v6369_v50, 2 }
 0x102   : > { %v880_v42 = vadd.f32 %v4984_v3, %v6235_v40  ;;  %v2804_v3 = vrot.slane %v6375_v4, 2  ;;  %v3119_v54 = vor.u32 %v3118_v41, %v3115_v2 }
 0x103   : > { %v6371_v14 = vpop.f32.mrf.mxu0  ;;  %v871_v37 = vpop.f32.mrf.mxu1  ;;  %v3127_v21 = vor.u32 %v3126_v35, %v3123_v18 }
 0x104   : > { %v872_v20 = vadd.f32 %v871_v37, %v6243_v30  ;;  %v3130_v30 = vshrl.u32 %v6053_v27, 16 }
 0x105   : > { %v5027_v11 = vpop.f32.mrf.mxu0  ;;  %5226 = vmatmul.mubr.msk.bf16.gmra.mxu0 %vm542_vm1, %v2799_v29  ;;  %v4987_v23 = vpop.f32.mrf.mxu1 }
 0x106   : > { %v6380_v47 = vadd.f32 %v5027_v11, %v877_v0  ;;  %5229 = vmatprep.mubr.msk.bf16.mxu0 %vm542_vm1, %v2801_v58  ;;  %v893_v29 = vadd.f32 %v4987_v23, %v6251_v34  ;;  %v3133_v11 = vshll.u32 %v6053_v27, 16  ;;  %v3142_v58 = vshll.u32 %v6078_v52, 16 }
 0x107   : > { %5186 = vmatmul.mubr.msk.bf16.gmra.mxu1 %vm542_vm1, %v5965_v6  ;;  %v1173_v40 = vpop.f32.mrf.mxu0  ;;  %v884_v8 = vpop.f32.mrf.mxu1  ;;  %v3139_v6 = vshrl.u32 %v6078_v52, 16  ;;  %v2805_v27 = vsel %vm2304_vm3, %v2802_v17, %v2804_v3  ;;  %v3132_v2 = vrot.slane %v3130_v30, 2  ;;  %v3148_v30 = vshrl.u32 %v6082_v1, 16 }
 0x108   : > { %v6388_v15 = vadd.f32 %v1173_v40, %v869_v28  ;;  %5189 = vmatprep.mubr.msk.bf16.mxu1 %vm542_vm1, %v5997_v24  ;;  %v885_v37 = vadd.f32 %v884_v8, %v6260_v31  ;;  %v2803_v28 = vsel %vm2304_vm3, %v2800_v22, %v2802_v17  ;;  %v5454_v24 = vld [vmem:[%s5537_s27 + $0xa0] ss:$0 sps:$4 sm:$0x33]   ;;  %v3135_v18 = vrot.slane %v3133_v11, 3 }
 0x109   : > { %v5028_v0 = vpop.f32.mrf.mxu0  ;;  %v4988_v23 = vpop.f32.mrf.mxu1  ;;  %v3128_v31 = vsel %vm3111_vm6, %v3119_v54, %v3127_v21  ;;  %v3144_v22 = vrot.slane %v3142_v58, 3  ;;  %v2806_v17 = vrot.slane %v5454_v24, 2  ;;  %v3151_v11 = vshll.u32 %v6082_v1, 16 }
 0x10a   : > { %7030 = vst [vmem:[#allocation18_spill] sm:$0xff] %v6388_v15  ;;  %v6397_v34 = vadd.f32 %v5028_v0, %v880_v42  ;;  %v896_v15 = vadd.f32 %v4988_v23, %v6267_v61  ;;  %v3141_v42 = vrot.slane %v3139_v6, 2  ;;  %v3157_v24 = vshrl.u32 %v6106_v48, 16 }
 0x10b   : > { %v1176_v40 = vpop.f32.mrf.mxu0  ;;  %v887_v35 = vpop.f32.mrf.mxu1  ;;  %v3160_v23 = vshll.u32 %v6106_v48, 16  ;;  %v2807_v1 = vsel %vm2304_vm3, %v2804_v3, %v2806_v17 }
 0x10c   : > { %v6403_v41 = vadd.f32 %v1176_v40, %v872_v20  ;;  %v888_v8 = vadd.f32 %v887_v35, %v6275_v7  ;;  %v3136_v7 = vor.u32 %v3135_v18, %v3132_v2  ;;  %v3153_v35 = vrot.slane %v3151_v11, 3 }
 0x10d   : > { %v5031_v52 = vpop.f32.mrf.mxu0  ;;  %5230 = vmatmul.mubr.msk.bf16.gmra.mxu0 %vm542_vm1, %v2803_v28  ;;  %v3145_v28 = vor.u32 %v3144_v22, %v3141_v42 }
 0x10e   : > { %v6408_v0 = vadd.f32 %v5031_v52, %v893_v29  ;;  %5233 = vmatprep.mubr.msk.bf16.mxu0 %vm542_vm1, %v2805_v27  ;;  %v3137_v18 = vsel %vm3111_vm6, %v3127_v21, %v3136_v7 }
 0x10f   : > { %v4991_v61 = vpop.f32.mrf.mxu1  ;;  %5190 = vmatmul.mubr.msk.bf16.gmra.mxu1 %vm542_vm1, %v6004_v16  ;;  %v1189_v20 = vpop.f32.mrf.mxu0  ;;  %v3146_v48 = vsel %vm3111_vm6, %v3136_v7, %v3145_v28  ;;  %v3178_v7 = vshll.u32 %v6214_v62, 16 }
 0x110   : > { %v909_v54 = vadd.f32 %v4991_v61, %v6283_v45  ;;  %v6416_v6 = vadd.f32 %v1189_v20, %v885_v37  ;;  %5245 = vmatprep.mubr.msk.bf16.mxu1 %vm542_vm1, %v3128_v31  ;;  %v3150_v37 = vrot.slane %v3148_v30, 2  ;;  %v3166_v20 = vshrl.u32 %v6110_v9, 16 }
 0x111   : > { %v900_v29 = vpop.f32.mrf.mxu1  ;;  %v5032_v58 = vpop.f32.mrf.mxu0 }
 0x112   : > { %v901_v16 = vadd.f32 %v900_v29, %v6292_v10  ;;  %v6422_v40 = vadd.f32 %v5032_v58, %v896_v15  ;;  %v3159_v10 = vrot.slane %v3157_v24, 2  ;;  %v3162_v15 = vrot.slane %v3160_v23, 3 }
 0x113   : > { %v4992_v27 = vpop.f32.mrf.mxu1  ;;  %v1192_v45 = vpop.f32.mrf.mxu0  ;;  %v3154_v21 = vor.u32 %v3153_v35, %v3150_v37 }
 0x114   : > { %v912_v52 = vadd.f32 %v4992_v27, %v6299_v36  ;;  %v6426_v2 = vadd.f32 %v1192_v45, %v888_v8  ;;  %v3168_v27 = vrot.slane %v3166_v20, 2 }
 0x115   : > { %v903_v31 = vpop.f32.mrf.mxu1  ;;  %v5035_v42 = vpop.f32.mrf.mxu0  ;;  %5234 = vmatmul.mubr.msk.bf16.gmra.mxu0 %vm542_vm1, %v2807_v1  ;;  %v3155_v23 = vsel %vm3111_vm6, %v3145_v28, %v3154_v21 }
 0x116   : > { %v904_v3 = vadd.f32 %v903_v31, %v6307_v57  ;;  %v6432_v22 = vadd.f32 %v5035_v42, %v909_v54  ;;  %5289 = vmatprep.mubr.msk.bf16.mxu0 %vm542_vm1, %v6063_v38  ;;  %v3169_v57 = vshll.u32 %v6110_v9, 16  ;;  %v3163_v54 = vor.u32 %v3162_v15, %v3159_v10 }
 0x117   : > { %v4995_v36 = vpop.f32.mrf.mxu1  ;;  %5246 = vmatmul.mubr.msk.bf16.vlgmr.msra.gmra.mxu1 %vm542_vm1, %v3137_v18  ;;  %v1205_v8 = vpop.f32.mrf.mxu0  ;;  %v3175_v38 = vshrl.u32 %v6214_v62, 16  ;;  %v3187_v10 = vshll.u32 %v6239_v5, 16 }
 0x118   : > { %v925_v17 = vadd.f32 %v4995_v36, %v6315_v53  ;;  %v6438_v61 = vadd.f32 %v1205_v8, %v901_v16  ;;  %5249 = vmatprep.mubr.msk.bf16.mxu1 %vm542_vm1, %v3146_v48  ;;  %v3171_v45 = vrot.slane %v3169_v57, 3  ;;  %v3164_v18 = vsel %vm3111_vm6, %v3154_v21, %v3163_v54 }
 0x119   : > { %v916_v30 = vpop.f32.mrf.mxu1  ;;  %v5036_v11 = vpop.f32.mrf.mxu0  ;;  %v3184_v48 = vshrl.u32 %v6239_v5, 16  ;;  %v3196_v21 = vshll.u32 %v6247_v32, 16 }
 0x11a   : > { %v917_v29 = vadd.f32 %v916_v30, %v6324_v25  ;;  %v6446_v58 = vadd.f32 %v5036_v11, %v912_v52  ;;  %v3177_v25 = vrot.slane %v3175_v38, 2  ;;  %v3180_v52 = vrot.slane %v3178_v7, 3 }
 0x11b   : > { %v4996_v53 = vpop.f32.mrf.mxu1  ;;  %v1208_v24 = vpop.f32.mrf.mxu0  ;;  %v3186_v11 = vrot.slane %v3184_v48, 2 }
 0x11c   : > { %v928_v16 = vadd.f32 %v4996_v53, %v6331_v12  ;;  %v6450_v1 = vadd.f32 %v1208_v24, %v904_v3  ;;  %v3181_v8 = vor.u32 %v3180_v52, %v3177_v25 }
 0x11d   : > { %v919_v37 = vpop.f32.mrf.mxu1  ;;  %v5039_v35 = vpop.f32.mrf.mxu0  ;;  %5290 = vmatmul.mubr.msk.bf16.vlgmr.msra.gmra.mxu0 %vm542_vm1, %v6069_v49 }
 0x11e   : > { %v920_v31 = vadd.f32 %v919_v37, %v6339_v46  ;;  %v6456_v42 = vadd.f32 %v5039_v35, %v925_v17  ;;  %5293 = vmatprep.mubr.msk.bf16.mxu0 %vm542_vm1, %v6091_v55  ;;  %v3172_v46 = vor.u32 %v3171_v45, %v3168_v27  ;;  %v3193_v55 = vshrl.u32 %v6247_v32, 16 }
 0x11f   : > { %v4999_v12 = vpop.f32.mrf.mxu1  ;;  %5250 = vmatmul.mubr.msk.bf16.gmra.mxu1 %vm542_vm1, %v3155_v23  ;;  %v1221_v28 = vpop.f32.mrf.mxu0  ;;  %v3599_v35 = vrot.slane %v6214_v62, 3 }
 0x120   : > { %v941_v49 = vadd.f32 %v4999_v12, %v6347_v26  ;;  %v6464_v15 = vadd.f32 %v1221_v28, %v917_v29  ;;  %5253 = vmatprep.mubr.msk.bf16.mxu1 %vm542_vm1, %v3164_v18  ;;  %v3189_v26 = vrot.slane %v3187_v10, 3  ;;  %v3173_v29 = vsel %vm3111_vm6, %v3163_v54, %v3172_v46 }
 0x121   : > { %v932_v3 = vpop.f32.mrf.mxu1  ;;  %v5040_v36 = vpop.f32.mrf.mxu0  ;;  %v3182_v23 = vsel %vm3111_vm6, %v3172_v46, %v3181_v8  ;;  %v3214_v12 = vshll.u32 %v6279_v51, 16 }
 0x122   : > { %v933_v17 = vadd.f32 %v932_v3, %v6354_v44  ;;  %v6470_v20 = vadd.f32 %v5040_v36, %v928_v16  ;;  %v3195_v44 = vrot.slane %v3193_v55, 2  ;;  %v3198_v16 = vrot.slane %v3196_v21, 3 }
 0x123   : > { %v5000_v57 = vpop.f32.mrf.mxu1  ;;  %v1224_v30 = vpop.f32.mrf.mxu0  ;;  %v3190_v37 = vor.u32 %v3189_v26, %v3186_v11  ;;  %v3216_v26 = vrot.slane %v3214_v12, 3 }
 0x124   : > { %v944_v38 = vadd.f32 %v5000_v57, %v6360_v60  ;;  %v6473_v7 = vadd.f32 %v1224_v30, %v920_v31  ;;  %v3199_v31 = vor.u32 %v3198_v16, %v3195_v44 }
 0x125   : > { %v935_v53 = vpop.f32.mrf.mxu1  ;;  %v5043_v24 = vpop.f32.mrf.mxu0  ;;  %5294 = vmatmul.mubr.msk.bf16.gmra.mxu0 %vm542_vm1, %v6097_v63  ;;  %v3202_v63 = vshrl.u32 %v6271_v39, 16  ;;  %v3191_v62 = vsel %vm3111_vm6, %v3181_v8, %v3190_v37 }
 0x126   : > { %v936_v27 = vadd.f32 %v935_v53, %v6371_v14  ;;  %v6480_v45 = vadd.f32 %v5043_v24, %v941_v49  ;;  %5297 = vmatprep.mubr.msk.bf16.mxu0 %vm542_vm1, %v6119_v43  ;;  %v3205_v14 = vshll.u32 %v6271_v39, 16  ;;  %v3211_v43 = vshrl.u32 %v6279_v51, 16 }
 0x127   : > { %v5003_v60 = vpop.f32.mrf.mxu1  ;;  %5254 = vmatmul.mubr.msk.bf16.gmra.mxu1 %vm542_vm1, %v3173_v29  ;;  %v1237_v54 = vpop.f32.mrf.mxu0  ;;  %v7031_v49 = vrot.slane %v6110_v9, 3  ;;  %v3204_v55 = vrot.slane %v3202_v63, 2  ;;  %v3200_v30 = vsel %vm3111_vm6, %v3190_v37, %v3199_v31  ;;  %v3603_v53 = vrot.slane %v6247_v32, 3  ;;  %v7033_v63 = vld [vmem:[#allocation2_spill] sm:$0xff] }
 0x128   : > { %v6486_v18 = vadd.f32 %v1237_v54, %v933_v17  ;;  %5257 = vmatprep.mubr.msk.bf16.mxu1 %vm542_vm1, %v3182_v23  ;;  %v957_v3 = vadd.f32 %v5003_v60, %v6224_v56  ;;  %v3207_v21 = vrot.slane %v3205_v14, 3  ;;  %v3213_v11 = vrot.slane %v3211_v43, 2  ;;  %v7032_v60 = vld [vmem:[#allocation10_spill] sm:$0xff] }
 0x129   : > { %v948_v25 = vpop.f32.mrf.mxu1  ;;  %v5044_v52 = vpop.f32.mrf.mxu0  ;;  %v3600_v46 = vsel %vm3585_vm5, %v7031_v49, %v3599_v35  ;;  %v3601_v56 = vrot.slane %v6239_v5, 3  ;;  %v3223_v24 = vshll.u32 %v6303_v59, 16  ;;  %v3229_v54 = vshrl.u32 %v7032_v60, 16 }
 0x12a   : > { %v6493_v28 = vadd.f32 %v5044_v52, %v944_v38  ;;  %v949_v8 = vadd.f32 %v948_v25, %v6233_v33  ;;  %v3208_v33 = vor.u32 %v3207_v21, %v3204_v55  ;;  %v3217_v5 = vor.u32 %v3216_v26, %v3213_v11 }
 0x12b   : > { %v5004_v48 = vpop.f32.mrf.mxu1  ;;  %v1240_v10 = vpop.f32.mrf.mxu0  ;;  %v3232_v37 = vshll.u32 %v7032_v60, 16  ;;  %v3602_v25 = vsel %vm3585_vm5, %v3599_v35, %v3601_v56  ;;  %v3604_v43 = vsel %vm3585_vm5, %v3601_v56, %v3603_v53  ;;  %v3605_v26 = vrot.slane %v6271_v39, 3 }
 0x12c   : > { %v6500_v36 = vadd.f32 %v1240_v10, %v936_v27  ;;  %v960_v23 = vadd.f32 %v5004_v48, %v6241_v13  ;;  %v3225_v48 = vrot.slane %v3223_v24, 3  ;;  %v7034_v10 = vld [vmem:[#allocation3_spill] sm:$0xff]  ;;  %v3218_v21 = vsel %vm3111_vm6, %v3208_v33, %v3217_v5 }
 0x12d   : > { %v951_v17 = vpop.f32.mrf.mxu1  ;;  %v5047_v57 = vpop.f32.mrf.mxu0  ;;  %5298 = vmatmul.mubr.msk.bf16.gmra.mxu0 %vm542_vm1, %v6127_v19  ;;  %v3220_v19 = vshrl.u32 %v6303_v59, 16  ;;  %v3234_v35 = vrot.slane %v3232_v37, 3  ;;  %v7038_v37 = vld [vmem:[#allocation16_spill] sm:$0xff] }
 0x12e   : > { %v6506_v9 = vadd.f32 %v5047_v57, %v957_v3  ;;  %5301 = vmatprep.mubr.msk.bf16.mxu0 %vm542_vm1, %v3600_v46  ;;  %v952_v32 = vadd.f32 %v951_v17, %v7033_v63  ;;  %v3209_v46 = vsel %vm3111_vm6, %v3199_v31, %v3208_v33  ;;  %v3231_v17 = vrot.slane %v3229_v54, 2  ;;  %v7035_v57 = vld [vmem:[#allocation4_spill] sm:$0xff] }
 0x12f   : > { %v5007_v38 = vpop.f32.mrf.mxu1  ;;  %5258 = vmatmul.mubr.msk.bf16.gmra.mxu1 %vm542_vm1, %v3191_v62  ;;  %v1253_v29 = vpop.f32.mrf.mxu0  ;;  %v3222_v12 = vrot.slane %v3220_v19, 2  ;;  %v3247_v63 = vshrl.u32 %v7038_v37, 16 }
 0x130   : > { %v6515_v44 = vadd.f32 %v1253_v29, %v949_v8  ;;  %5261 = vmatprep.mubr.msk.bf16.mxu1 %vm542_vm1, %v3200_v30  ;;  %v973_v62 = vadd.f32 %v5007_v38, %v7034_v10  ;;  %v3607_v38 = vrot.slane %v6279_v51, 3  ;;  %v7036_v29 = vld [vmem:[#allocation5_spill] sm:$0xff]  ;;  %v3235_v39 = vor.u32 %v3234_v35, %v3231_v17 }
 0x131   : > { %v964_v16 = vpop.f32.mrf.mxu1  ;;  %v5048_v27 = vpop.f32.mrf.mxu0  ;;  %v3226_v56 = vor.u32 %v3225_v48, %v3222_v12 }
 0x132   : > { %v6521_v14 = vadd.f32 %v5048_v27, %v960_v23  ;;  %v965_v30 = vadd.f32 %v964_v16, %v7035_v57  ;;  %v7037_v23 = vld [vmem:[#allocation14_spill] sm:$0xff]  ;;  %v3608_v10 = vsel %vm3585_vm5, %v3605_v26, %v3607_v38 }
 0x133   : > { %v5008_v52 = vpop.f32.mrf.mxu1  ;;  %v1256_v13 = vpop.f32.mrf.mxu0  ;;  %v3238_v33 = vshrl.u32 %v7037_v23, 16  ;;  %v3241_v16 = vshll.u32 %v7037_v23, 16  ;;  %v3227_v48 = vsel %vm3111_vm6, %v3217_v5, %v3226_v56  ;;  %v3609_v5 = vrot.slane %v6303_v59, 3 }
 0x134   : > { %v6526_v49 = vadd.f32 %v1256_v13, %v952_v32  ;;  %v976_v19 = vadd.f32 %v5008_v52, %v7036_v29  ;;  %v3250_v32 = vshll.u32 %v7038_v37, 16  ;;  %v3606_v52 = vsel %vm3585_vm5, %v3603_v53, %v3605_v26 }
 0x135   : > { %v967_v3 = vpop.f32.mrf.mxu1  ;;  %v5051_v55 = vpop.f32.mrf.mxu0  ;;  %5302 = vmatmul.mubr.msk.bf16.gmra.mxu0 %vm542_vm1, %v3602_v25  ;;  %v7039_v25 = vld [vmem:[#allocation6_spill] sm:$0xff]  ;;  %v3243_v17 = vrot.slane %v3241_v16, 3  ;;  %v3256_v16 = vshrl.u32 %v6369_v50, 16 }
 0x136   : > { %v6532_v11 = vadd.f32 %v5051_v55, %v973_v62  ;;  %5305 = vmatprep.mubr.msk.bf16.mxu0 %vm542_vm1, %v3604_v43  ;;  %v968_v13 = vadd.f32 %v967_v3, %v7039_v25  ;;  %v7040_v62 = vld [vmem:[#allocation7_spill] sm:$0xff]  ;;  %v3236_v3 = vsel %vm3111_vm6, %v3226_v56, %v3235_v39  ;;  %v3252_v53 = vrot.slane %v3250_v32, 3 }
 0x137   : > { %v5011_v8 = vpop.f32.mrf.mxu1  ;;  %5262 = vmatmul.mubr.msk.bf16.gmra.mxu1 %vm542_vm1, %v3209_v46  ;;  %v1269_v31 = vpop.f32.mrf.mxu0  ;;  %v3259_v56 = vshll.u32 %v6369_v50, 16 }
 0x138   : > { %v6539_v24 = vadd.f32 %v1269_v31, %v965_v30  ;;  %5265 = vmatprep.mubr.msk.bf16.mxu1 %vm542_vm1, %v3218_v21  ;;  %v989_v46 = vadd.f32 %v5011_v8, %v7040_v62  ;;  %v3240_v21 = vrot.slane %v3238_v33, 2  ;;  %v3249_v30 = vrot.slane %v3247_v63, 2  ;;  %v7041_v31 = vld [vmem:[#allocation8_spill] sm:$0xff] }
 0x139   : > { %v980_v27 = vpop.f32.mrf.mxu1  ;;  %v5052_v54 = vpop.f32.mrf.mxu0  ;;  %v3611_v33 = vrot.slane %v7032_v60, 3  ;;  %v7043_v60 = vld [vmem:[#allocation11_spill] sm:$0xff]  ;;  %v3610_v62 = vsel %vm3585_vm5, %v3607_v38, %v3609_v5 }
 0x13a   : > { %v6547_v51 = vadd.f32 %v5052_v54, %v976_v19  ;;  %v981_v29 = vadd.f32 %v980_v27, %v7041_v31  ;;  %v7042_v54 = vld [vmem:[#allocation9_spill] sm:$0xff]  ;;  %v3244_v27 = vor.u32 %v3243_v17, %v3240_v21  ;;  %v3258_v31 = vrot.slane %v3256_v16, 2  ;;  %v6578_v21 = vld [vmem:[%s5537_s27 + $0xa0] ss:$0 sps:$4 sm:$0x77]   ;;  %v7044_v17 = vld [vmem:[#allocation12_spill] sm:$0xff] }
 0x13b   : > { %v5012_v43 = vpop.f32.mrf.mxu1  ;;  %v1272_v12 = vpop.f32.mrf.mxu0 }
 0x13c   : > { %v6553_v55 = vadd.f32 %v1272_v12, %v968_v13  ;;  %v992_v63 = vadd.f32 %v5012_v43, %v7042_v54  ;;  %v3253_v13 = vor.u32 %v3252_v53, %v3249_v30  ;;  %v3268_v12 = vshll.u32 %v6375_v4, 16 }
 0x13d   : > { %v983_v35 = vpop.f32.mrf.mxu1  ;;  %v5055_v57 = vpop.f32.mrf.mxu0  ;;  %5306 = vmatmul.mubr.msk.bf16.gmra.mxu0 %vm542_vm1, %v3606_v52  ;;  %v3265_v52 = vshrl.u32 %v6375_v4, 16 }
 0x13e   : > { %v6558_v19 = vadd.f32 %v5055_v57, %v989_v46  ;;  %5309 = vmatprep.mubr.msk.bf16.mxu0 %vm542_vm1, %v3608_v10  ;;  %v3612_v57 = vsel %vm3585_vm5, %v3609_v5, %v3611_v33  ;;  %v3254_v38 = vsel %vm3111_vm6, %v3244_v27, %v3253_v13 }
 0x13f   : > { %v5015_v26 = vpop.f32.mrf.mxu1  ;;  %5266 = vmatmul.mubr.msk.bf16.gmra.mxu1 %vm542_vm1, %v3227_v48  ;;  %v1285_v8 = vpop.f32.mrf.mxu0  ;;  %v984_v48 = vadd.f32 %v983_v35, %v7043_v60  ;;  %v3267_v54 = vrot.slane %v3265_v52, 2 }
 0x140   : > { %v6567_v32 = vadd.f32 %v1285_v8, %v981_v29  ;;  %5269 = vmatprep.mubr.msk.bf16.mxu1 %vm542_vm1, %v3236_v3  ;;  %v3261_v3 = vrot.slane %v3259_v56, 3  ;;  %v1005_v30 = vadd.f32 %v5015_v26, %v7044_v17  ;;  %v3245_v29 = vsel %vm3111_vm6, %v3235_v39, %v3244_v27  ;;  %v7046_v27 = vld [vmem:[#allocation15_spill] sm:$0xff] }
 0x141   : > { %v996_v25 = vpop.f32.mrf.mxu1  ;;  %v5056_v59 = vpop.f32.mrf.mxu0  ;;  %v3613_v26 = vrot.slane %v7037_v23, 3 }
 0x142   : > { %v6573_v10 = vadd.f32 %v5056_v59, %v992_v63  ;;  %v3270_v63 = vrot.slane %v3268_v12, 3  ;;  %v7045_v59 = vld [vmem:[#allocation13_spill] sm:$0xff]  ;;  %v3262_v60 = vor.u32 %v3261_v3, %v3258_v31  ;;  %v7048_v31 = vld [vmem:[#allocation18_spill] sm:$0xff] }
 0x143   : > { %v5016_v43 = vpop.f32.mrf.mxu1  ;;  %v1288_v46 = vpop.f32.mrf.mxu0  ;;  %v997_v5 = vadd.f32 %v996_v25, %v7045_v59 }
 0x144   : > { %v6581_v53 = vadd.f32 %v1288_v46, %v984_v48  ;;  %v3615_v48 = vrot.slane %v7038_v37, 3  ;;  %v1008_v52 = vadd.f32 %v5016_v43, %v7046_v27  ;;  %v3277_v46 = vshll.u32 %v6578_v21, 16 }
 0x145   : > { %v999_v8 = vpop.f32.mrf.mxu1  ;;  %v5059_v35 = vpop.f32.mrf.mxu0  ;;  %5310 = vmatmul.mubr.msk.bf16.gmra.mxu0 %vm542_vm1, %v3610_v62  ;;  %v3274_v62 = vshrl.u32 %v6578_v21, 16  ;;  %v3271_v17 = vor.u32 %v3270_v63, %v3267_v54 }
 0x146   : > { %v6587_v16 = vadd.f32 %v5059_v35, %v1005_v30  ;;  %5313 = vmatprep.mubr.msk.bf16.mxu0 %vm542_vm1, %v3612_v57  ;;  %v7047_v30 = vld [vmem:[#allocation17_spill] sm:$0xff]  ;;  %v3614_v35 = vsel %vm3585_vm5, %v3611_v33, %v3613_v26  ;;  %v3279_v54 = vrot.slane %v3277_v46, 3 }
 0x147   : > { %v5071_v56 = vpop.f32.mrf.mxu1  ;;  %5270 = vmatmul.mubr.msk.bf16.gmra.mxu1 %vm542_vm1, %v3245_v29  ;;  %v1301_v39 = vpop.f32.mrf.mxu0  ;;  %v1000_v29 = vadd.f32 %v999_v8, %v7047_v30  ;;  %v3272_v27 = vsel %vm3111_vm6, %v3262_v60, %v3271_v17 }
 0x148   : > { %v1784_v12 = vadd.f32 %v5071_v56, %v6380_v47  ;;  %v6596_v25 = vadd.f32 %v1301_v39, %v997_v5  ;;  %5273 = vmatprep.mubr.msk.bf16.mxu1 %vm542_vm1, %v3254_v38  ;;  %v3263_v47 = vsel %vm3111_vm6, %v3253_v13, %v3262_v60  ;;  %v3616_v5 = vsel %vm3585_vm5, %v3613_v26, %v3615_v48 }
 0x149   : > { %v1639_v23 = vpop.f32.mrf.mxu1  ;;  %v5060_v57 = vpop.f32.mrf.mxu0  ;;  %v3276_v39 = vrot.slane %v3274_v62, 2  ;;  %v3617_v13 = vrot.slane %v6369_v50, 3  ;;  %v3619_v62 = vrot.slane %v6375_v4, 3 }
 0x14a   : > { %v1782_v3 = vadd.f32 %v1639_v23, %v7048_v31  ;;  %v6602_v37 = vadd.f32 %v5060_v57, %v1008_v52 }
 0x14b   : > { %v5072_v43 = vpop.f32.mrf.mxu1  ;;  %v1304_v59 = vpop.f32.mrf.mxu0  ;;  %v3280_v60 = vor.u32 %v3279_v54, %v3276_v39  ;;  %v3618_v50 = vsel %vm3585_vm5, %v3615_v48, %v3617_v13  ;;  %v3621_v48 = vrot.slane %v6578_v21, 3 }
 0x14c   : > { %v1785_v38 = vadd.f32 %v5072_v43, %v6397_v34  ;;  %v6608_v56 = vadd.f32 %v1304_v59, %v1000_v29 }
 0x14d   : > { %v1642_v63 = vpop.f32.mrf.mxu1  ;;  %v5115_v8 = vpop.f32.mrf.mxu0  ;;  %5314 = vmatmul.mubr.msk.bf16.gmra.mxu0 %vm542_vm1, %v3614_v35  ;;  %v3620_v35 = vsel %vm3585_vm5, %v3617_v13, %v3619_v62 }
 0x14e   : > { %v1783_v33 = vadd.f32 %v1642_v63, %v6403_v41  ;;  %v6613_v52 = vadd.f32 %v5115_v8, %v1784_v12  ;;  %5317 = vmatprep.mubr.msk.bf16.mxu0 %vm542_vm1, %v3616_v5 }
 0x14f   : > { %v5075_v26 = vpop.f32.mrf.mxu1  ;;  %5274 = vmatmul.mubr.msk.bf16.gmra.mxu1 %vm542_vm1, %v3263_v47  ;;  %v2113_v34 = vpop.f32.mrf.mxu0 }
 0x150   : > { %v1788_v46 = vadd.f32 %v5075_v26, %v6408_v0  ;;  %v6620_v23 = vadd.f32 %v2113_v34, %v1782_v3  ;;  %5277 = vmatprep.mubr.msk.bf16.mxu1 %vm542_vm1, %v3272_v27  ;;  %v3281_v3 = vsel %vm3111_vm6, %v3271_v17, %v3280_v60 }
 0x151   : > { %v1655_v41 = vpop.f32.mrf.mxu1  ;;  %v5116_v12 = vpop.f32.mrf.mxu0 }
 0x152   : > { %v1786_v57 = vadd.f32 %v1655_v41, %v6416_v6  ;;  %v6624_v30 = vadd.f32 %v5116_v12, %v1785_v38 }
 0x153   : > { %v5076_v29 = vpop.f32.mrf.mxu1  ;;  %v2116_v31 = vpop.f32.mrf.mxu0 }
 0x154   : > { %v1789_v4 = vadd.f32 %v5076_v29, %v6422_v40  ;;  %v6629_v0 = vadd.f32 %v2116_v31, %v1783_v33 }
 0x155   : > { %v1658_v43 = vpop.f32.mrf.mxu1  ;;  %v5119_v59 = vpop.f32.mrf.mxu0  ;;  %5318 = vmatmul.mubr.msk.bf16.gmra.mxu0 %vm542_vm1, %v3618_v50 }
 0x156   : > { %v1787_v6 = vadd.f32 %v1658_v43, %v6426_v2  ;;  %v6634_v47 = vadd.f32 %v5119_v59, %v1788_v46  ;;  %5321 = vmatprep.mubr.msk.bf16.mxu0 %vm542_vm1, %v3620_v35  ;;  %v3622_v2 = vsel %vm3585_vm5, %v3619_v62, %v3621_v48 }
 0x157   : > { %v5079_v5 = vpop.f32.mrf.mxu1  ;;  %5278 = vmatmul.mubr.msk.bf16.gmra.mxu1 %vm542_vm1, %v3281_v3  ;;  %v2129_v40 = vpop.f32.mrf.mxu0 }
 0x158   : > { %v1792_v38 = vadd.f32 %v5079_v5, %v6432_v22  ;;  %v6640_v39 = vadd.f32 %v2129_v40, %v1786_v57 }
 0x159   : > { %v1671_v17 = vpop.f32.mrf.mxu1  ;;  %v5120_v54 = vpop.f32.mrf.mxu0 }
 0x15a   : > { %v1790_v63 = vadd.f32 %v1671_v17, %v6438_v61  ;;  %v6643_v8 = vadd.f32 %v5120_v54, %v1789_v4 }
 0x15b   : > { %v5080_v27 = vpop.f32.mrf.mxu1  ;;  %v2132_v33 = vpop.f32.mrf.mxu0 }
 0x15c   : > { %v1793_v21 = vadd.f32 %v5080_v27, %v6446_v58  ;;  %v6647_v13 = vadd.f32 %v2132_v33, %v1787_v6 }
 0x15d   : > { %v1674_v26 = vpop.f32.mrf.mxu1  ;;  %v5123_v34 = vpop.f32.mrf.mxu0  ;;  %5322 = vmatmul.mubr.msk.bf16.gmra.mxu0 %vm542_vm1, %v3622_v2 }
 0x15e   : > { %v1791_v22 = vadd.f32 %v1674_v26, %v6450_v1  ;;  %v6651_v46 = vadd.f32 %v5123_v34, %v1792_v38 }
 0x15f   : > { %v5083_v60 = vpop.f32.mrf.mxu1  ;;  %v2145_v61 = vpop.f32.mrf.mxu0 }
 0x160   : > { %v1796_v41 = vadd.f32 %v5083_v60, %v6456_v42  ;;  %v6654_v12 = vadd.f32 %v2145_v61, %v1790_v63 }
 0x161   : > { %v1687_v62 = vpop.f32.mrf.mxu1  ;;  %v5124_v57 = vpop.f32.mrf.mxu0 }
 0x162   : > { %v1794_v58 = vadd.f32 %v1687_v62, %v6464_v15  ;;  %v6657_v50 = vadd.f32 %v5124_v57, %v1793_v21 }
 0x163   : > { %v5084_v29 = vpop.f32.mrf.mxu1  ;;  %v2148_v31 = vpop.f32.mrf.mxu0 }
 0x164   : > { %v1797_v35 = vadd.f32 %v5084_v29, %v6470_v20  ;;  %v6660_v4 = vadd.f32 %v2148_v31, %v1791_v22 }
 0x165   : > { %v1690_v1 = vpop.f32.mrf.mxu1  ;;  %v5127_v3 = vpop.f32.mrf.mxu0 }
 0x166   : > { %v1795_v43 = vadd.f32 %v1690_v1, %v6473_v7  ;;  %v6663_v59 = vadd.f32 %v5127_v3, %v1796_v41 }
 0x167   : > { %v5087_v42 = vpop.f32.mrf.mxu1  ;;  %v2161_v6 = vpop.f32.mrf.mxu0 }
 0x168   : > { %v1800_v48 = vadd.f32 %v5087_v42, %v6480_v45  ;;  %v6666_v5 = vadd.f32 %v2161_v6, %v1794_v58 }
 0x169   : > { %v1703_v15 = vpop.f32.mrf.mxu1  ;;  %v5128_v40 = vpop.f32.mrf.mxu0 }
 0x16a   : > { %v1798_v38 = vadd.f32 %v1703_v15, %v6486_v18  ;;  %v6669_v17 = vadd.f32 %v5128_v40, %v1797_v35 }
 0x16b   : > { %v5088_v20 = vpop.f32.mrf.mxu1  ;;  %v2164_v54 = vpop.f32.mrf.mxu0 }
 0x16c   : > { %v1801_v63 = vadd.f32 %v5088_v20, %v6493_v28  ;;  %v6672_v2 = vadd.f32 %v2164_v54, %v1795_v43 }
 0x16d   : > { %v1706_v7 = vpop.f32.mrf.mxu1  ;;  %v5131_v27 = vpop.f32.mrf.mxu0 }
 0x16e   : > { %v1799_v33 = vadd.f32 %v1706_v7, %v6500_v36  ;;  %v6675_v21 = vadd.f32 %v5131_v27, %v1800_v48 }
 0x16f   : > { %v5091_v45 = vpop.f32.mrf.mxu1  ;;  %v2177_v26 = vpop.f32.mrf.mxu0 }
 0x170   : > { %v1804_v34 = vadd.f32 %v5091_v45, %v6506_v9  ;;  %v6678_v22 = vadd.f32 %v2177_v26, %v1798_v38 }
 0x171   : > { %v1719_v18 = vpop.f32.mrf.mxu1  ;;  %v5132_v60 = vpop.f32.mrf.mxu0 }
 0x172   : > { %v1802_v61 = vadd.f32 %v1719_v18, %v6515_v44  ;;  %v6681_v41 = vadd.f32 %v5132_v60, %v1801_v63 }
 0x173   : > { %v5092_v28 = vpop.f32.mrf.mxu1  ;;  %v2180_v62 = vpop.f32.mrf.mxu0 }
 0x174   : > { %v1805_v57 = vadd.f32 %v5092_v28, %v6521_v14  ;;  %v6684_v58 = vadd.f32 %v2180_v62, %v1799_v33 }
 0x175   : > { %v1722_v36 = vpop.f32.mrf.mxu1  ;;  %v5135_v29 = vpop.f32.mrf.mxu0 }
 0x176   : > { %v1803_v31 = vadd.f32 %v1722_v36, %v6526_v49  ;;  %v6687_v35 = vadd.f32 %v5135_v29, %v1804_v34 }
 0x177   : > { %v5095_v9 = vpop.f32.mrf.mxu1  ;;  %v2193_v1 = vpop.f32.mrf.mxu0 }
 0x178   : > { %v1808_v3 = vadd.f32 %v5095_v9, %v6532_v11  ;;  %v6690_v43 = vadd.f32 %v2193_v1, %v1802_v61 }
 0x179   : > { %v1735_v44 = vpop.f32.mrf.mxu1  ;;  %v5136_v42 = vpop.f32.mrf.mxu0 }
 0x17a   : > { %v1806_v6 = vadd.f32 %v1735_v44, %v6539_v24  ;;  %v6693_v48 = vadd.f32 %v5136_v42, %v1805_v57 }
 0x17b   : > { %v5096_v14 = vpop.f32.mrf.mxu1  ;;  %v2196_v15 = vpop.f32.mrf.mxu0 }
 0x17c   : > { %v1809_v40 = vadd.f32 %v5096_v14, %v6547_v51  ;;  %v6696_v38 = vadd.f32 %v2196_v15, %v1803_v31 }
 0x17d   : > { %v1738_v49 = vpop.f32.mrf.mxu1  ;;  %v5139_v20 = vpop.f32.mrf.mxu0 }
 0x17e   : > { %v1807_v54 = vadd.f32 %v1738_v49, %v6553_v55  ;;  %v6699_v63 = vadd.f32 %v5139_v20, %v1808_v3 }
 0x17f   : > { %v5099_v11 = vpop.f32.mrf.mxu1  ;;  %v2209_v7 = vpop.f32.mrf.mxu0 }
 0x180   : > { %v1812_v27 = vadd.f32 %v5099_v11, %v6558_v19  ;;  %v6702_v33 = vadd.f32 %v2209_v7, %v1806_v6 }
 0x181   : > { %v1751_v24 = vpop.f32.mrf.mxu1  ;;  %v5140_v45 = vpop.f32.mrf.mxu0 }
 0x182   : > { %v1810_v26 = vadd.f32 %v1751_v24, %v6567_v32  ;;  %v6705_v34 = vadd.f32 %v5140_v45, %v1809_v40 }
 0x183   : > { %v5100_v51 = vpop.f32.mrf.mxu1  ;;  %v2212_v18 = vpop.f32.mrf.mxu0 }
 0x184   : > { %v1813_v60 = vadd.f32 %v5100_v51, %v6573_v10  ;;  %v6708_v61 = vadd.f32 %v2212_v18, %v1807_v54 }
 0x185   : > { %v1754_v55 = vpop.f32.mrf.mxu1  ;;  %v5143_v28 = vpop.f32.mrf.mxu0 }
 0x186   : > { %v1811_v62 = vadd.f32 %v1754_v55, %v6581_v53  ;;  %v6711_v57 = vadd.f32 %v5143_v28, %v1812_v27 }
 0x187   : > { %v5103_v19 = vpop.f32.mrf.mxu1  ;;  %v2225_v36 = vpop.f32.mrf.mxu0 }
 0x188   : > { %v1816_v29 = vadd.f32 %v5103_v19, %v6587_v16  ;;  %v6714_v31 = vadd.f32 %v2225_v36, %v1810_v26 }
 0x189   : > { %v1767_v32 = vpop.f32.mrf.mxu1  ;;  %v5144_v9 = vpop.f32.mrf.mxu0 }
 0x18a   : > { %v1814_v1 = vadd.f32 %v1767_v32, %v6596_v25  ;;  %v6717_v3 = vadd.f32 %v5144_v9, %v1813_v60 }
 0x18b   : > { %v5104_v10 = vpop.f32.mrf.mxu1  ;;  %v2228_v44 = vpop.f32.mrf.mxu0 }
 0x18c   : > { %v1817_v42 = vadd.f32 %v5104_v10, %v6602_v37  ;;  %v6720_v6 = vadd.f32 %v2228_v44, %v1811_v62 }
 0x18d   : > { %v1770_v53 = vpop.f32.mrf.mxu1  ;;  %v5147_v14 = vpop.f32.mrf.mxu0 }
 0x18e   : > { %v1815_v15 = vadd.f32 %v1770_v53, %v6608_v56  ;;  %v6723_v40 = vadd.f32 %v5147_v14, %v1816_v29 }
 0x18f   : > { %v5159_v16 = vpop.f32.mrf.mxu1  ;;  %v2241_v49 = vpop.f32.mrf.mxu0 }
 0x190   : > { %v2599_v20 = vadd.f32 %v5159_v16, %v6613_v52  ;;  %v6726_v54 = vadd.f32 %v2241_v49, %v1814_v1 }
 0x191   : > { %v2454_v25 = vpop.f32.mrf.mxu1  ;;  %v5148_v11 = vpop.f32.mrf.mxu0 }
 0x192   : > { %v2597_v7 = vadd.f32 %v2454_v25, %v6620_v23  ;;  %v6729_v27 = vadd.f32 %v5148_v11, %v1817_v42 }
 0x193   : > { %v5160_v37 = vpop.f32.mrf.mxu1  ;;  %v2244_v24 = vpop.f32.mrf.mxu0 }
 0x194   : > { %v2600_v45 = vadd.f32 %v5160_v37, %v6624_v30  ;;  %v6732_v26 = vadd.f32 %v2244_v24, %v1815_v15 }
 0x195   : > { %v2457_v56 = vpop.f32.mrf.mxu1  ;;  %v5203_v51 = vpop.f32.mrf.mxu0 }
 0x196   : > { %v2598_v18 = vadd.f32 %v2457_v56, %v6629_v0  ;;  %v6735_v60 = vadd.f32 %v5203_v51, %v2599_v20 }
 0x197   : > { %v5163_v52 = vpop.f32.mrf.mxu1  ;;  %v2920_v55 = vpop.f32.mrf.mxu0 }
 0x198   : > { %v2603_v28 = vadd.f32 %v5163_v52, %v6634_v47  ;;  %v6738_v62 = vadd.f32 %v2920_v55, %v2597_v7 }
 0x199   : > { %v2470_v23 = vpop.f32.mrf.mxu1  ;;  %v5204_v19 = vpop.f32.mrf.mxu0 }
 0x19a   : > { %v2601_v36 = vadd.f32 %v2470_v23, %v6640_v39  ;;  %v6741_v29 = vadd.f32 %v5204_v19, %v2600_v45 }
 0x19b   : > { %v5164_v30 = vpop.f32.mrf.mxu1  ;;  %v2923_v32 = vpop.f32.mrf.mxu0 }
 0x19c   : > { %v2604_v9 = vadd.f32 %v5164_v30, %v6643_v8  ;;  %v6744_v1 = vadd.f32 %v2923_v32, %v2598_v18 }
 0x19d   : > { %v2473_v0 = vpop.f32.mrf.mxu1  ;;  %v5207_v10 = vpop.f32.mrf.mxu0 }
 0x19e   : > { %v2602_v44 = vadd.f32 %v2473_v0, %v6647_v13  ;;  %v6747_v42 = vadd.f32 %v5207_v10, %v2603_v28 }
 0x19f   : > { %v5167_v47 = vpop.f32.mrf.mxu1  ;;  %v2936_v53 = vpop.f32.mrf.mxu0 }
 0x1a0   : > { %v2607_v14 = vadd.f32 %v5167_v47, %v6651_v46  ;;  %v6750_v15 = vadd.f32 %v2936_v53, %v2601_v36 }
 0x1a1   : > { %v2486_v39 = vpop.f32.mrf.mxu1  ;;  %v5208_v16 = vpop.f32.mrf.mxu0 }
 0x1a2   : > { %v2605_v49 = vadd.f32 %v2486_v39, %v6654_v12  ;;  %v6753_v20 = vadd.f32 %v5208_v16, %v2604_v9 }
 0x1a3   : > { %v5168_v8 = vpop.f32.mrf.mxu1  ;;  %v2939_v25 = vpop.f32.mrf.mxu0 }
 0x1a4   : > { %v2608_v11 = vadd.f32 %v5168_v8, %v6657_v50  ;;  %v6756_v7 = vadd.f32 %v2939_v25, %v2602_v44 }
 0x1a5   : > { %v2489_v13 = vpop.f32.mrf.mxu1  ;;  %v5211_v37 = vpop.f32.mrf.mxu0 }
 0x1a6   : > { %v2606_v24 = vadd.f32 %v2489_v13, %v6660_v4  ;;  %v6759_v45 = vadd.f32 %v5211_v37, %v2607_v14 }
 0x1a7   : > { %v5171_v46 = vpop.f32.mrf.mxu1  ;;  %v2952_v56 = vpop.f32.mrf.mxu0 }
 0x1a8   : > { %v2611_v51 = vadd.f32 %v5171_v46, %v6663_v59  ;;  %v6762_v18 = vadd.f32 %v2952_v56, %v2605_v49 }
 0x1a9   : > { %v2502_v12 = vpop.f32.mrf.mxu1  ;;  %v5212_v52 = vpop.f32.mrf.mxu0 }
 0x1aa   : > { %v2609_v55 = vadd.f32 %v2502_v12, %v6666_v5  ;;  %v6765_v28 = vadd.f32 %v5212_v52, %v2608_v11 }
 0x1ab   : > { %v5172_v50 = vpop.f32.mrf.mxu1  ;;  %v2955_v23 = vpop.f32.mrf.mxu0 }
 0x1ac   : > { %v2612_v19 = vadd.f32 %v5172_v50, %v6669_v17  ;;  %v6768_v36 = vadd.f32 %v2955_v23, %v2606_v24 }
 0x1ad   : > { %v2505_v4 = vpop.f32.mrf.mxu1  ;;  %v5215_v30 = vpop.f32.mrf.mxu0 }
 0x1ae   : > { %v2610_v32 = vadd.f32 %v2505_v4, %v6672_v2  ;;  %v6771_v9 = vadd.f32 %v5215_v30, %v2611_v51 }
 0x1af   : > { %v5175_v59 = vpop.f32.mrf.mxu1  ;;  %v2968_v0 = vpop.f32.mrf.mxu0 }
 0x1b0   : > { %v2615_v10 = vadd.f32 %v5175_v59, %v6675_v21  ;;  %v6774_v44 = vadd.f32 %v2968_v0, %v2609_v55 }
 0x1b1   : > { %v2518_v5 = vpop.f32.mrf.mxu1  ;;  %v5216_v47 = vpop.f32.mrf.mxu0 }
 0x1b2   : > { %v2613_v53 = vadd.f32 %v2518_v5, %v6678_v22  ;;  %v6777_v14 = vadd.f32 %v5216_v47, %v2612_v19 }
 0x1b3   : > { %v5176_v17 = vpop.f32.mrf.mxu1  ;;  %v2971_v39 = vpop.f32.mrf.mxu0 }
 0x1b4   : > { %v2616_v16 = vadd.f32 %v5176_v17, %v6681_v41  ;;  %v6780_v49 = vadd.f32 %v2971_v39, %v2610_v32 }
 0x1b5   : > { %v2521_v2 = vpop.f32.mrf.mxu1  ;;  %v5219_v8 = vpop.f32.mrf.mxu0 }
 0x1b6   : > { %v2614_v25 = vadd.f32 %v2521_v2, %v6684_v58  ;;  %v6783_v11 = vadd.f32 %v5219_v8, %v2615_v10 }
 0x1b7   : > { %v5179_v21 = vpop.f32.mrf.mxu1  ;;  %v2984_v13 = vpop.f32.mrf.mxu0 }
 0x1b8   : > { %v2619_v37 = vadd.f32 %v5179_v21, %v6687_v35  ;;  %v6786_v24 = vadd.f32 %v2984_v13, %v2613_v53 }
 0x1b9   : > { %v2534_v22 = vpop.f32.mrf.mxu1  ;;  %v5220_v46 = vpop.f32.mrf.mxu0 }
 0x1ba   : > { %v2617_v56 = vadd.f32 %v2534_v22, %v6690_v43  ;;  %v6789_v51 = vadd.f32 %v5220_v46, %v2616_v16 }
 0x1bb   : > { %v5180_v41 = vpop.f32.mrf.mxu1  ;;  %v2987_v12 = vpop.f32.mrf.mxu0 }
 0x1bc   : > { %v2620_v52 = vadd.f32 %v5180_v41, %v6693_v48  ;;  %v6792_v55 = vadd.f32 %v2987_v12, %v2614_v25 }
 0x1bd   : > { %v2537_v58 = vpop.f32.mrf.mxu1  ;;  %v5223_v50 = vpop.f32.mrf.mxu0 }
 0x1be   : > { %v2618_v23 = vadd.f32 %v2537_v58, %v6696_v38  ;;  %v6795_v19 = vadd.f32 %v5223_v50, %v2619_v37 }
 0x1bf   : > { %v5183_v35 = vpop.f32.mrf.mxu1  ;;  %v3000_v4 = vpop.f32.mrf.mxu0 }
 0x1c0   : > { %v2623_v30 = vadd.f32 %v5183_v35, %v6699_v63  ;;  %v6798_v32 = vadd.f32 %v3000_v4, %v2617_v56 }
 0x1c1   : > { %v2550_v43 = vpop.f32.mrf.mxu1  ;;  %v5224_v59 = vpop.f32.mrf.mxu0 }
 0x1c2   : > { %v2621_v0 = vadd.f32 %v2550_v43, %v6702_v33  ;;  %v6801_v10 = vadd.f32 %v5224_v59, %v2620_v52 }
 0x1c3   : > { %v5184_v48 = vpop.f32.mrf.mxu1  ;;  %v3003_v5 = vpop.f32.mrf.mxu0 }
 0x1c4   : > { %v2624_v47 = vadd.f32 %v5184_v48, %v6705_v34  ;;  %v6804_v53 = vadd.f32 %v3003_v5, %v2618_v23 }
 0x1c5   : > { %v2553_v38 = vpop.f32.mrf.mxu1  ;;  %v5227_v17 = vpop.f32.mrf.mxu0 }
 0x1c6   : > { %v2622_v39 = vadd.f32 %v2553_v38, %v6708_v61  ;;  %v6807_v16 = vadd.f32 %v5227_v17, %v2623_v30 }
 0x1c7   : > { %v5187_v63 = vpop.f32.mrf.mxu1  ;;  %v3016_v2 = vpop.f32.mrf.mxu0 }
 0x1c8   : > { %v2627_v8 = vadd.f32 %v5187_v63, %v6711_v57  ;;  %v6810_v25 = vadd.f32 %v3016_v2, %v2621_v0 }
 0x1c9   : > { %v2566_v33 = vpop.f32.mrf.mxu1  ;;  %v5228_v21 = vpop.f32.mrf.mxu0 }
 0x1ca   : > { %v2625_v13 = vadd.f32 %v2566_v33, %v6714_v31  ;;  %v6813_v37 = vadd.f32 %v5228_v21, %v2624_v47 }
 0x1cb   : > { %v5188_v34 = vpop.f32.mrf.mxu1  ;;  %v3019_v22 = vpop.f32.mrf.mxu0 }
 0x1cc   : > { %v2628_v46 = vadd.f32 %v5188_v34, %v6717_v3  ;;  %v6816_v56 = vadd.f32 %v3019_v22, %v2622_v39 }
 0x1cd   : > { %v2569_v61 = vpop.f32.mrf.mxu1  ;;  %v5231_v41 = vpop.f32.mrf.mxu0 }
 0x1ce   : > { %v2626_v12 = vadd.f32 %v2569_v61, %v6720_v6  ;;  %v6819_v52 = vadd.f32 %v5231_v41, %v2627_v8 }
 0x1cf   : > { %v5191_v57 = vpop.f32.mrf.mxu1  ;;  %v3032_v58 = vpop.f32.mrf.mxu0 }
 0x1d0   : > { %v2631_v50 = vadd.f32 %v5191_v57, %v6723_v40  ;;  %v6822_v23 = vadd.f32 %v3032_v58, %v2625_v13 }
 0x1d1   : > { %v2582_v31 = vpop.f32.mrf.mxu1  ;;  %v5232_v35 = vpop.f32.mrf.mxu0 }
 0x1d2   : > { %v2629_v4 = vadd.f32 %v2582_v31, %v6726_v54  ;;  %v6825_v30 = vadd.f32 %v5232_v35, %v2628_v46 }
 0x1d3   : > { %v5192_v3 = vpop.f32.mrf.mxu1  ;;  %v3035_v43 = vpop.f32.mrf.mxu0 }
 0x1d4   : > { %v2632_v59 = vadd.f32 %v5192_v3, %v6729_v27  ;;  %v6828_v0 = vadd.f32 %v3035_v43, %v2626_v12 }
 0x1d5   : > { %v2585_v6 = vpop.f32.mrf.mxu1  ;;  %v5235_v48 = vpop.f32.mrf.mxu0 }
 0x1d6   : > { %v2630_v5 = vadd.f32 %v2585_v6, %v6732_v26  ;;  %v6831_v47 = vadd.f32 %v5235_v48, %v2631_v50  ;;  %v6843_v26 = vld [vmem:[%s7005_s2] ss:$0 sm:$0xff] }
 0x1d7   : > { %v5247_v40 = vpop.f32.mrf.mxu1  ;;  %v3048_v38 = vpop.f32.mrf.mxu0 }
 0x1d8   : > { %v6833_v17 = vadd.f32 %v3048_v38, %v2629_v4  ;;  %v3539_v27 = vadd.f32 %v5247_v40, %v6735_v60 }
 0x1d9   : > { %v3394_v39 = vpop.f32.mrf.mxu1  ;;  %v5236_v54 = vpop.f32.mrf.mxu0 }
 0x1da   : > { %v6835_v63 = vadd.f32 %v5236_v54, %v2632_v59  ;;  %v3537_v34 = vadd.f32 %v3394_v39, %v6738_v62 }
 0x1db   : > { %v5248_v2 = vpop.f32.mrf.mxu1  ;;  %v3051_v8 = vpop.f32.mrf.mxu0 }
 0x1dc   : > { %v6838_v33 = vadd.f32 %v3051_v8, %v2630_v5  ;;  %v3540_v57 = vadd.f32 %v5248_v2, %v6741_v29 }
 0x1dd   : > { %v3397_v21 = vpop.f32.mrf.mxu1  ;;  %v5291_v13 = vpop.f32.mrf.mxu0 }
 0x1de   : > { %v3880_v22 = vadd.f32 %v5291_v13, %v3539_v27  ;;  %v3538_v35 = vadd.f32 %v3397_v21, %v6744_v1 }
 0x1df   : > { %v5251_v46 = vpop.f32.mrf.mxu1  ;;  %v3735_v61 = vpop.f32.mrf.mxu0 }
 0x1e0   : > { %v3923_v41 = vadd.f32 %v6843_v26, %v3880_v22  ;;  %v3878_v12 = vadd.f32 %v3735_v61, %v3537_v34  ;;  %v3543_v43 = vadd.f32 %v5251_v46, %v6747_v42 }
 0x1e1   : > { %v3410_v60 = vpop.f32.mrf.mxu1  ;;  %v5292_v58 = vpop.f32.mrf.mxu0 }
 0x1e2   : > { %vm3959_vm7 = vcmp.ge.f32.partialorder %v3923_v41, 0.0  ;;  %v3995_v50 = vmul.f32 0.2, %v3923_v41  ;;  %v3921_v31 = vadd.f32 %v6843_v26, %v3878_v12  ;;  %v3881_v3 = vadd.f32 %v5292_v58, %v3540_v57 }
 0x1e3   : > { %v5252_v4 = vpop.f32.mrf.mxu1  ;;  %v3738_v62 = vpop.f32.mrf.mxu0  ;;  %v3541_v1 = vadd.f32 %v3410_v60, %v6750_v15 }
 0x1e4   : > { %v4031_v59 = vsel %vm3959_vm7, %v3923_v41, %v3995_v50  ;;  %vm3957_vm8 = vcmp.ge.f32.partialorder %v3921_v31, 0.0  ;;  %v3993_v6 = vmul.f32 0.2, %v3921_v31  ;;  %v3924_v29 = vadd.f32 %v6843_v26, %v3881_v3 }
 0x1e5   : > { %v4067_v48 = vmul.f32 1.4142135, %v4031_v59  ;;  %v3413_v5 = vpop.f32.mrf.mxu1  ;;  %v3879_v40 = vadd.f32 %v3738_v62, %v3538_v35  ;;  %v5295_v38 = vpop.f32.mrf.mxu0  ;;  %v3544_v61 = vadd.f32 %v5252_v4, %v6753_v20 }
 0x1e6   : > { %v4029_v39 = vsel %vm3957_vm8, %v3921_v31, %v3993_v6  ;;  %v3884_v42 = vadd.f32 %v5295_v38, %v3543_v43  ;;  %vm3960_vm10 = vcmp.ge.f32.partialorder %v3924_v29, 0.0  ;;  %v3996_v8 = vmul.f32 0.2, %v3924_v29 }
 0x1e7   : > { %v4697_v54 = vpack.c.bf16 %v4067_v48, %v4067_v48  ;;  %v4065_v2 = vmul.f32 1.4142135, %v4029_v39  ;;  %v5255_v27 = vpop.f32.mrf.mxu1  ;;  %v3751_v21 = vpop.f32.mrf.mxu0  ;;  %v3922_v13 = vadd.f32 %v6843_v26, %v3879_v40  ;;  %v3542_v41 = vadd.f32 %v3413_v5, %v6756_v7 }
 0x1e8   : > { %v3927_v34 = vadd.f32 %v6843_v26, %v3884_v42  ;;  %v3882_v22 = vadd.f32 %v3751_v21, %v3541_v1  ;;  %v4032_v15 = vsel %vm3960_vm10, %v3924_v29, %v3996_v8  ;;  %v3547_v4 = vadd.f32 %v5255_v27, %v6759_v45 }
 0x1e9   : > { %4248 = vst.msk [vmem:[%s6856_s29 + $0x8] sm:$0xf] %vm4245_vm9, %v4697_v54  ;;  %v4695_v46 = vpack.c.bf16 %v4065_v2, %v4065_v2  ;;  %v3426_v12 = vpop.f32.mrf.mxu1  ;;  %v5296_v57 = vpop.f32.mrf.mxu0  ;;  %v4068_v60 = vmul.f32 1.4142135, %v4032_v15  ;;  %vm3958_vm11 = vcmp.ge.f32.partialorder %v3922_v13, 0.0 }
 0x1ea   : > { %v3994_v58 = vmul.f32 0.2, %v3922_v13  ;;  %vm3963_vm12 = vcmp.ge.f32.partialorder %v3927_v34, 0.0  ;;  %v3999_v50 = vmul.f32 0.2, %v3927_v34  ;;  %v3925_v31 = vadd.f32 %v6843_v26, %v3882_v22 }
 0x1eb   : > { %4246 = vst.msk [vmem:[%s6856_s29] sm:$0xf] %vm4245_vm9, %v4695_v46  ;;  %v5256_v35 = vpop.f32.mrf.mxu1  ;;  %v3885_v3 = vadd.f32 %v5296_v57, %v3544_v61  ;;  %v3754_v62 = vpop.f32.mrf.mxu0  ;;  %v4698_v43 = vpack.c.bf16 %v4068_v60, %v4068_v60  ;;  %v3545_v42 = vadd.f32 %v3426_v12, %v6762_v18 }
 0x1ec   : > { %v4030_v20 = vsel %vm3958_vm11, %v3922_v13, %v3994_v58  ;;  %v3883_v7 = vadd.f32 %v3754_v62, %v3542_v41  ;;  %v4035_v6 = vsel %vm3963_vm12, %v3927_v34, %v3999_v50  ;;  %vm3961_vm13 = vcmp.ge.f32.partialorder %v3925_v31, 0.0 }
 0x1ed   : > { %v4066_v59 = vmul.f32 1.4142135, %v4030_v20  ;;  %v3997_v48 = vmul.f32 0.2, %v3925_v31  ;;  %v3429_v29 = vpop.f32.mrf.mxu1  ;;  %v5299_v5 = vpop.f32.mrf.mxu0  ;;  %4249 = vst.msk [vmem:[%s6856_s29 + $0xc] sm:$0xf] %vm4245_vm9, %v4698_v43  ;;  %v3928_v38 = vadd.f32 %v6843_v26, %v3885_v3  ;;  %v3548_v34 = vadd.f32 %v5256_v35, %v6765_v28 }
 0x1ee   : > { %v4071_v40 = vmul.f32 1.4142135, %v4035_v6  ;;  %v3926_v1 = vadd.f32 %v6843_v26, %v3883_v7  ;;  %v3888_v2 = vadd.f32 %v5299_v5, %v3547_v4  ;;  %v3546_v12 = vadd.f32 %v3429_v29, %v6768_v36 }
 0x1ef   : > { %v4696_v39 = vpack.c.bf16 %v4066_v59, %v4066_v59  ;;  %v4033_v45 = vsel %vm3961_vm13, %v3925_v31, %v3997_v48  ;;  %v5259_v54 = vpop.f32.mrf.mxu1  ;;  %v3767_v8 = vpop.f32.mrf.mxu0  ;;  %vm3964_vm14 = vcmp.ge.f32.partialorder %v3928_v38, 0.0  ;;  %v4000_v13 = vmul.f32 0.2, %v3928_v38 }
 0x1f0   : > { %v4701_v27 = vpack.c.bf16 %v4071_v40, %v4071_v40  ;;  %v4069_v21 = vmul.f32 1.4142135, %v4033_v45  ;;  %vm3962_vm15 = vcmp.ge.f32.partialorder %v3926_v1, 0.0  ;;  %v3998_v22 = vmul.f32 0.2, %v3926_v1 }
 0x1f1   : > { %4247 = vst.msk [vmem:[%s6856_s29 + $0x4] sm:$0xf] %vm4245_vm9, %v4696_v39  ;;  %v3931_v46 = vadd.f32 %v6843_v26, %v3888_v2  ;;  %v3442_v61 = vpop.f32.mrf.mxu1  ;;  %v5300_v18 = vpop.f32.mrf.mxu0  ;;  %v4036_v41 = vsel %vm3964_vm14, %v3928_v38, %v4000_v13  ;;  %v3886_v57 = vadd.f32 %v3767_v8, %v3545_v42  ;;  %v3551_v3 = vadd.f32 %v5259_v54, %v6771_v9 }
 0x1f2   : > { %4252 = vst.msk [vmem:[%s6856_s29 + $0x18] sm:$0xf] %vm4245_vm9, %v4701_v27  ;;  %v4699_v15 = vpack.c.bf16 %v4069_v21, %v4069_v21  ;;  %v4072_v60 = vmul.f32 1.4142135, %v4036_v41  ;;  %v4034_v58 = vsel %vm3962_vm15, %v3926_v1, %v3998_v22  ;;  %v3889_v43 = vadd.f32 %v5300_v18, %v3548_v34 }
 0x1f3   : > { %vm3967_vm0 = vcmp.ge.f32.partialorder %v3931_v46, 0.0  ;;  %v4003_v50 = vmul.f32 0.2, %v3931_v46  ;;  %v5260_v31 = vpop.f32.mrf.mxu1  ;;  %v3770_v28 = vpop.f32.mrf.mxu0  ;;  %v4070_v35 = vmul.f32 1.4142135, %v4034_v58  ;;  %v3929_v62 = vadd.f32 %v6843_v26, %v3886_v57 }
 0x1f4   : > { %4250 = vst.msk [vmem:[%s6856_s29 + $0x10] sm:$0xf] %vm4245_vm9, %v4699_v15  ;;  %v4702_v20 = vpack.c.bf16 %v4072_v60, %v4072_v60  ;;  %v3549_v36 = vadd.f32 %v3442_v61, %v6774_v44  ;;  %v3887_v59 = vadd.f32 %v3770_v28, %v3546_v12  ;;  %v3932_v40 = vadd.f32 %v6843_v26, %v3889_v43 }
 0x1f5   : > { %v4039_v4 = vsel %vm3967_vm0, %v3931_v46, %v4003_v50  ;;  %v3445_v7 = vpop.f32.mrf.mxu1  ;;  %v5303_v6 = vpop.f32.mrf.mxu0  ;;  %v4700_v48 = vpack.c.bf16 %v4070_v35, %v4070_v35  ;;  %vm3965_vm1 = vcmp.ge.f32.partialorder %v3929_v62, 0.0  ;;  %v4001_v5 = vmul.f32 0.2, %v3929_v62 }
 0x1f6   : > { %v4075_v29 = vmul.f32 1.4142135, %v4039_v4  ;;  %4253 = vst.msk [vmem:[%s6856_s29 + $0x1c] sm:$0xf] %vm4245_vm9, %v4702_v20  ;;  %v3930_v9 = vadd.f32 %v6843_v26, %v3887_v59  ;;  %v3892_v1 = vadd.f32 %v5303_v6, %v3551_v3  ;;  %v3552_v45 = vadd.f32 %v5260_v31, %v6777_v14 }
 0x1f7   : > { %v5263_v38 = vpop.f32.mrf.mxu1  ;;  %v3783_v39 = vpop.f32.mrf.mxu0  ;;  %4251 = vst.msk [vmem:[%s6856_s29 + $0x14] sm:$0xf] %vm4245_vm9, %v4700_v48  ;;  %v4037_v42 = vsel %vm3965_vm1, %v3929_v62, %v4001_v5  ;;  %vm3968_vm2 = vcmp.ge.f32.partialorder %v3932_v40, 0.0  ;;  %v4004_v8 = vmul.f32 0.2, %v3932_v40  ;;  %v3550_v18 = vadd.f32 %v3445_v7, %v6780_v49 }
 0x1f8   : > { %v4705_v44 = vpack.c.bf16 %v4075_v29, %v4075_v29  ;;  %v3890_v54 = vadd.f32 %v3783_v39, %v3549_v36  ;;  %v4073_v2 = vmul.f32 1.4142135, %v4037_v42  ;;  %vm3966_vm3 = vcmp.ge.f32.partialorder %v3930_v9, 0.0 }
 0x1f9   : > { %v3458_v27 = vpop.f32.mrf.mxu1  ;;  %v5304_v21 = vpop.f32.mrf.mxu0  ;;  %v4002_v13 = vmul.f32 0.2, %v3930_v9  ;;  %v3935_v34 = vadd.f32 %v6843_v26, %v3892_v1  ;;  %v4040_v61 = vsel %vm3968_vm2, %v3932_v40, %v4004_v8  ;;  %v3555_v50 = vadd.f32 %v5263_v38, %v6783_v11 }
 0x1fa   : > { %4256 = vst.msk [vmem:[%s6856_s29 + $0x28] sm:$0xf] %vm4245_vm9, %v4705_v44  ;;  %v3933_v22 = vadd.f32 %v6843_v26, %v3890_v54  ;;  %v4703_v46 = vpack.c.bf16 %v4073_v2, %v4073_v2  ;;  %v3893_v15 = vadd.f32 %v5304_v21, %v3552_v45  ;;  %v4076_v12 = vmul.f32 1.4142135, %v4040_v61 }
 0x1fb   : > { %v5264_v14 = vpop.f32.mrf.mxu1  ;;  %v3786_v41 = vpop.f32.mrf.mxu0  ;;  %v4038_v57 = vsel %vm3966_vm3, %v3930_v9, %v4002_v13  ;;  %vm3971_vm4 = vcmp.ge.f32.partialorder %v3935_v34, 0.0  ;;  %v4007_v60 = vmul.f32 0.2, %v3935_v34  ;;  %v3553_v62 = vadd.f32 %v3458_v27, %v6786_v24 }
 0x1fc   : > { %4254 = vst.msk [vmem:[%s6856_s29 + $0x20] sm:$0xf] %vm4245_vm9, %v4703_v46  ;;  %v4074_v58 = vmul.f32 1.4142135, %v4038_v57  ;;  %vm3969_vm5 = vcmp.ge.f32.partialorder %v3933_v22, 0.0  ;;  %v4706_v3 = vpack.c.bf16 %v4076_v12, %v4076_v12  ;;  %v3936_v43 = vadd.f32 %v6843_v26, %v3893_v15 }
 0x1fd   : > { %v4005_v31 = vmul.f32 0.2, %v3933_v22  ;;  %v3461_v28 = vpop.f32.mrf.mxu1  ;;  %v5307_v35 = vpop.f32.mrf.mxu0  ;;  %v4043_v49 = vsel %vm3971_vm4, %v3935_v34, %v4007_v60  ;;  %v3891_v7 = vadd.f32 %v3786_v41, %v3550_v18  ;;  %v3556_v48 = vadd.f32 %v5264_v14, %v6789_v51 }
 0x1fe   : > { %v4704_v20 = vpack.c.bf16 %v4074_v58, %v4074_v58  ;;  %v4079_v4 = vmul.f32 1.4142135, %v4043_v49  ;;  %4257 = vst.msk [vmem:[%s6856_s29 + $0x2c] sm:$0xf] %vm4245_vm9, %v4706_v3  ;;  %vm3972_vm6 = vcmp.ge.f32.partialorder %v3936_v43, 0.0  ;;  %v3896_v40 = vadd.f32 %v5307_v35, %v3555_v50 }
 0x1ff   : > { %v4041_v36 = vsel %vm3969_vm5, %v3933_v22, %v4005_v31  ;;  %v5267_v59 = vpop.f32.mrf.mxu1  ;;  %v3799_v6 = vpop.f32.mrf.mxu0  ;;  %v4008_v29 = vmul.f32 0.2, %v3936_v43  ;;  %v3934_v24 = vadd.f32 %v6843_v26, %v3891_v7  ;;  %v3554_v42 = vadd.f32 %v3461_v28, %v6792_v55 }
 0x200   : > { %v4077_v11 = vmul.f32 1.4142135, %v4041_v36  ;;  %4255 = vst.msk [vmem:[%s6856_s29 + $0x24] sm:$0xf] %vm4245_vm9, %v4704_v20  ;;  %v4709_v5 = vpack.c.bf16 %v4079_v4, %v4079_v4  ;;  %v3894_v38 = vadd.f32 %v3799_v6, %v3553_v62  ;;  %v3939_v2 = vadd.f32 %v6843_v26, %v3896_v40 }
 0x201   : > { %v3474_v9 = vpop.f32.mrf.mxu1  ;;  %v5308_v1 = vpop.f32.mrf.mxu0  ;;  %v4044_v44 = vsel %vm3972_vm6, %v3936_v43, %v4008_v29  ;;  %vm3970_vm7 = vcmp.ge.f32.partialorder %v3934_v24, 0.0  ;;  %v4006_v54 = vmul.f32 0.2, %v3934_v24  ;;  %v3559_v21 = vadd.f32 %v5267_v59, %v6795_v19 }
 0x202   : > { %v4707_v39 = vpack.c.bf16 %v4077_v11, %v4077_v11  ;;  %v3897_v45 = vadd.f32 %v5308_v1, %v3556_v48  ;;  %4260 = vst.msk [vmem:[%s6856_s29 + $0x38] sm:$0xf] %vm4245_vm9, %v4709_v5  ;;  %v4080_v51 = vmul.f32 1.4142135, %v4044_v44  ;;  %v3937_v13 = vadd.f32 %v6843_v26, %v3894_v38 }
 0x203   : > { %v5268_v8 = vpop.f32.mrf.mxu1  ;;  %v3802_v27 = vpop.f32.mrf.mxu0  ;;  %v4042_v46 = vsel %vm3970_vm7, %v3934_v24, %v4006_v54  ;;  %vm3975_vm8 = vcmp.ge.f32.partialorder %v3939_v2, 0.0  ;;  %v4011_v61 = vmul.f32 0.2, %v3939_v2  ;;  %v3557_v19 = vadd.f32 %v3474_v9, %v6798_v32 }
 0x204   : > { %4258 = vst.msk [vmem:[%s6856_s29 + $0x30] sm:$0xf] %vm4245_vm9, %v4707_v39  ;;  %v3940_v34 = vadd.f32 %v6843_v26, %v3897_v45  ;;  %v3895_v55 = vadd.f32 %v3802_v27, %v3554_v42  ;;  %v4710_v22 = vpack.c.bf16 %v4080_v51, %v4080_v51  ;;  %v4078_v15 = vmul.f32 1.4142135, %v4042_v46 }
 0x205   : > { %v3477_v18 = vpop.f32.mrf.mxu1  ;;  %v5311_v14 = vpop.f32.mrf.mxu0  ;;  %vm3973_vm10 = vcmp.ge.f32.partialorder %v3937_v13, 0.0  ;;  %v4009_v41 = vmul.f32 0.2, %v3937_v13  ;;  %v4047_v12 = vsel %vm3975_vm8, %v3939_v2, %v4011_v61  ;;  %v3560_v3 = vadd.f32 %v5268_v8, %v6801_v10 }
 0x206   : > { %vm3976_vm11 = vcmp.ge.f32.partialorder %v3940_v34, 0.0  ;;  %4261 = vst.msk [vmem:[%s6856_s29 + $0x3c] sm:$0xf] %vm4245_vm9, %v4710_v22  ;;  %v4012_v57 = vmul.f32 0.2, %v3940_v34  ;;  %v3938_v60 = vadd.f32 %v6843_v26, %v3895_v55  ;;  %v4708_v31 = vpack.c.bf16 %v4078_v15, %v4078_v15 }
 0x207   : > { %v5271_v58 = vpop.f32.mrf.mxu1  ;;  %v3815_v50 = vpop.f32.mrf.mxu0  ;;  %v4083_v28 = vmul.f32 1.4142135, %v4047_v12  ;;  %v4045_v35 = vsel %vm3973_vm10, %v3937_v13, %v4009_v41  ;;  %v3558_v7 = vadd.f32 %v3477_v18, %v6804_v53  ;;  %v3900_v59 = vadd.f32 %v5311_v14, %v3559_v21 }
 0x208   : > { %v4081_v49 = vmul.f32 1.4142135, %v4045_v35  ;;  %v4048_v62 = vsel %vm3976_vm11, %v3940_v34, %v4012_v57  ;;  %vm3974_vm12 = vcmp.ge.f32.partialorder %v3938_v60, 0.0  ;;  %v4010_v43 = vmul.f32 0.2, %v3938_v60 }
 0x209   : > { %v3490_v20 = vpop.f32.mrf.mxu1  ;;  %v5312_v4 = vpop.f32.mrf.mxu0  ;;  %4259 = vst.msk [vmem:[%s6856_s29 + $0x34] sm:$0xf] %vm4245_vm9, %v4708_v31  ;;  %v4713_v32 = vpack.c.bf16 %v4083_v28, %v4083_v28  ;;  %v4084_v36 = vmul.f32 1.4142135, %v4048_v62  ;;  %v3898_v48 = vadd.f32 %v3815_v50, %v3557_v19  ;;  %v3563_v9 = vadd.f32 %v5271_v58, %v6807_v16 }
 0x20a   : > { %v4711_v6 = vpack.c.bf16 %v4081_v49, %v4081_v49  ;;  %v4046_v11 = vsel %vm3974_vm12, %v3938_v60, %v4010_v43  ;;  %v3901_v29 = vadd.f32 %v5312_v4, %v3560_v3  ;;  %v3943_v38 = vadd.f32 %v6843_v26, %v3900_v59 }
 0x20b   : > { %v5272_v10 = vpop.f32.mrf.mxu1  ;;  %v3818_v5 = vpop.f32.mrf.mxu0  ;;  %4264 = vst.msk [vmem:[%s6856_s29 + $0x48] sm:$0xf] %vm4245_vm9, %v4713_v32  ;;  %v4714_v24 = vpack.c.bf16 %v4084_v36, %v4084_v36  ;;  %v4082_v40 = vmul.f32 1.4142135, %v4046_v11  ;;  %v3561_v53 = vadd.f32 %v3490_v20, %v6810_v25  ;;  %v3941_v1 = vadd.f32 %v6843_v26, %v3898_v48 }
 0x20c   : > { %4262 = vst.msk [vmem:[%s6856_s29 + $0x40] sm:$0xf] %vm4245_vm9, %v4711_v6  ;;  %v3944_v39 = vadd.f32 %v6843_v26, %v3901_v29  ;;  %v3899_v42 = vadd.f32 %v3818_v5, %v3558_v7  ;;  %vm3979_vm13 = vcmp.ge.f32.partialorder %v3943_v38, 0.0  ;;  %v4015_v54 = vmul.f32 0.2, %v3943_v38 }
 0x20d   : > { %v3493_v44 = vpop.f32.mrf.mxu1  ;;  %v5315_v45 = vpop.f32.mrf.mxu0  ;;  %4265 = vst.msk [vmem:[%s6856_s29 + $0x4c] sm:$0xf] %vm4245_vm9, %v4714_v24  ;;  %v4712_v51 = vpack.c.bf16 %v4082_v40, %v4082_v40  ;;  %v3564_v16 = vadd.f32 %v5272_v10, %v6813_v37  ;;  %vm3977_vm14 = vcmp.ge.f32.partialorder %v3941_v1, 0.0  ;;  %v4013_v2 = vmul.f32 0.2, %v3941_v1 }
 0x20e   : > { %vm3980_vm15 = vcmp.ge.f32.partialorder %v3944_v39, 0.0  ;;  %v4016_v8 = vmul.f32 0.2, %v3944_v39  ;;  %v4051_v21 = vsel %vm3979_vm13, %v3943_v38, %v4015_v54  ;;  %v3562_v13 = vadd.f32 %v3493_v44, %v6816_v56 }
 0x20f   : > { %v5275_v25 = vpop.f32.mrf.mxu1  ;;  %v3831_v27 = vpop.f32.mrf.mxu0  ;;  %4263 = vst.msk [vmem:[%s6856_s29 + $0x44] sm:$0xf] %vm4245_vm9, %v4712_v51  ;;  %v3942_v34 = vadd.f32 %v6843_v26, %v3899_v42  ;;  %v3904_v55 = vadd.f32 %v5315_v45, %v3563_v9  ;;  %v4087_v22 = vmul.f32 1.4142135, %v4051_v21  ;;  %v4049_v46 = vsel %vm3977_vm14, %v3941_v1, %v4013_v2 }
 0x210   : > { %v4052_v61 = vsel %vm3980_vm15, %v3944_v39, %v4016_v8  ;;  %v3902_v14 = vadd.f32 %v3831_v27, %v3561_v53  ;;  %v4085_v15 = vmul.f32 1.4142135, %v4049_v46  ;;  %v3567_v56 = vadd.f32 %v5275_v25, %v6819_v52 }
 0x211   : > { %v3506_v18 = vpop.f32.mrf.mxu1  ;;  %v5316_v37 = vpop.f32.mrf.mxu0  ;;  %v4088_v41 = vmul.f32 1.4142135, %v4052_v61  ;;  %vm3978_vm0 = vcmp.ge.f32.partialorder %v3942_v34, 0.0  ;;  %v3947_v12 = vadd.f32 %v6843_v26, %v3904_v55  ;;  %v4717_v19 = vpack.c.bf16 %v4087_v22, %v4087_v22 }
 0x212   : > { %v4014_v57 = vmul.f32 0.2, %v3942_v34  ;;  %v3945_v60 = vadd.f32 %v6843_v26, %v3902_v14  ;;  %v4715_v31 = vpack.c.bf16 %v4085_v15, %v4085_v15  ;;  %v3565_v49 = vadd.f32 %v3506_v18, %v6822_v23 }
 0x213   : > { %v5276_v58 = vpop.f32.mrf.mxu1  ;;  %v3834_v50 = vpop.f32.mrf.mxu0  ;;  %v4718_v28 = vpack.c.bf16 %v4088_v41, %v4088_v41  ;;  %vm3983_vm1 = vcmp.ge.f32.partialorder %v3947_v12, 0.0  ;;  %v4019_v35 = vmul.f32 0.2, %v3947_v12  ;;  %4268 = vst.msk [vmem:[%s6856_s29 + $0x58] sm:$0xf] %vm4245_vm9, %v4717_v19  ;;  %v3905_v36 = vadd.f32 %v5316_v37, %v3564_v16 }
 0x214   : > { %v4050_v3 = vsel %vm3978_vm0, %v3942_v34, %v4014_v57  ;;  %vm3981_vm2 = vcmp.ge.f32.partialorder %v3945_v60, 0.0  ;;  %v4017_v62 = vmul.f32 0.2, %v3945_v60  ;;  %4266 = vst.msk [vmem:[%s6856_s29 + $0x50] sm:$0xf] %vm4245_vm9, %v4715_v31  ;;  %v3568_v32 = vadd.f32 %v5276_v58, %v6825_v30 }
 0x215   : > { %v3509_v43 = vpop.f32.mrf.mxu1  ;;  %v5319_v20 = vpop.f32.mrf.mxu0  ;;  %4269 = vst.msk [vmem:[%s6856_s29 + $0x5c] sm:$0xf] %vm4245_vm9, %v4718_v28  ;;  %v4086_v52 = vmul.f32 1.4142135, %v4050_v3  ;;  %v4055_v4 = vsel %vm3983_vm1, %v3947_v12, %v4019_v35  ;;  %v3903_v6 = vadd.f32 %v3834_v50, %v3562_v13  ;;  %v3948_v5 = vadd.f32 %v6843_v26, %v3905_v36 }
 0x216   : > { %v4091_v7 = vmul.f32 1.4142135, %v4055_v4  ;;  %v4053_v59 = vsel %vm3981_vm2, %v3945_v60, %v4017_v62  ;;  %v3908_v48 = vadd.f32 %v5319_v20, %v3567_v56  ;;  %v3566_v24 = vadd.f32 %v3509_v43, %v6828_v0 }
 0x217   : > { %v5279_v11 = vpop.f32.mrf.mxu1  ;;  %v3847_v23 = vpop.f32.mrf.mxu0  ;;  %v4716_v10 = vpack.c.bf16 %v4086_v52, %v4086_v52  ;;  %v4089_v29 = vmul.f32 1.4142135, %v4053_v59  ;;  %v3946_v9 = vadd.f32 %v6843_v26, %v3903_v6  ;;  %vm3984_vm3 = vcmp.ge.f32.partialorder %v3948_v5, 0.0 }
 0x218   : > { %v4721_v40 = vpack.c.bf16 %v4091_v7, %v4091_v7  ;;  %v3951_v30 = vadd.f32 %v6843_v26, %v3908_v48  ;;  %v3906_v53 = vadd.f32 %v3847_v23, %v3565_v49  ;;  %v4020_v44 = vmul.f32 0.2, %v3948_v5 }
 0x219   : > { %v3522_v38 = vpop.f32.mrf.mxu1  ;;  %v5320_v1 = vpop.f32.mrf.mxu0  ;;  %4267 = vst.msk [vmem:[%s6856_s29 + $0x54] sm:$0xf] %vm4245_vm9, %v4716_v10  ;;  %v4719_v39 = vpack.c.bf16 %v4089_v29, %v4089_v29  ;;  %v3571_v42 = vadd.f32 %v5279_v11, %v6831_v47  ;;  %vm3982_vm4 = vcmp.ge.f32.partialorder %v3946_v9, 0.0  ;;  %v4018_v0 = vmul.f32 0.2, %v3946_v9 }
 0x21a   : > { %4272 = vst.msk [vmem:[%s6856_s29 + $0x68] sm:$0xf] %vm4245_vm9, %v4721_v40  ;;  %vm3987_vm5 = vcmp.ge.f32.partialorder %v3951_v30, 0.0  ;;  %v4023_v45 = vmul.f32 0.2, %v3951_v30  ;;  %v4056_v54 = vsel %vm3984_vm3, %v3948_v5, %v4020_v44  ;;  %v3569_v16 = vadd.f32 %v3522_v38, %v6833_v17 }
 0x21b   : > { %v3850_v51 = vpop.f32.mrf.mxu0  ;;  %4270 = vst.msk [vmem:[%s6856_s29 + $0x60] sm:$0xf] %vm4245_vm9, %v4719_v39  ;;  %v3949_v2 = vadd.f32 %v6843_v26, %v3906_v53  ;;  %v5280_v8 = vpop.f32.mrf.mxu1  ;;  %v3909_v25 = vadd.f32 %v5320_v1, %v3568_v32  ;;  %v4092_v27 = vmul.f32 1.4142135, %v4056_v54  ;;  %v4054_v21 = vsel %vm3982_vm4, %v3946_v9, %v4018_v0 }
 0x21c   : > { %v4059_v13 = vsel %vm3987_vm5, %v3951_v30, %v4023_v45  ;;  %v3907_v47 = vadd.f32 %v3850_v51, %v3566_v24  ;;  %v4090_v55 = vmul.f32 1.4142135, %v4054_v21  ;;  %v3572_v17 = vadd.f32 %v5280_v8, %v6835_v63 }
 0x21d   : > { %v5323_v34 = vpop.f32.mrf.mxu0  ;;  %v4095_v22 = vmul.f32 1.4142135, %v4059_v13  ;;  %vm3985_vm6 = vcmp.ge.f32.partialorder %v3949_v2, 0.0  ;;  %v3952_v46 = vadd.f32 %v6843_v26, %v3909_v25  ;;  %v4722_v61 = vpack.c.bf16 %v4092_v27, %v4092_v27  ;;  %v3525_v19 = vpop.f32.mrf.mxu1 }
 0x21e   : > { %v4021_v18 = vmul.f32 0.2, %v3949_v2  ;;  %v3950_v14 = vadd.f32 %v6843_v26, %v3907_v47  ;;  %v4720_v15 = vpack.c.bf16 %v4090_v55, %v4090_v55  ;;  %v3912_v60 = vadd.f32 %v5323_v34, %v3571_v42 }
 0x21f   : > { %v3863_v37 = vpop.f32.mrf.mxu0  ;;  %v4725_v41 = vpack.c.bf16 %v4095_v22, %v4095_v22  ;;  %vm3988_vm7 = vcmp.ge.f32.partialorder %v3952_v46, 0.0  ;;  %v4024_v12 = vmul.f32 0.2, %v3952_v46  ;;  %4273 = vst.msk [vmem:[%s6856_s29 + $0x6c] sm:$0xf] %vm4245_vm9, %v4722_v61  ;;  %v3570_v3 = vadd.f32 %v3525_v19, %v6838_v33 }
 0x220   : > { %v4057_v57 = vsel %vm3985_vm6, %v3949_v2, %v4021_v18  ;;  %vm3986_vm8 = vcmp.ge.f32.partialorder %v3950_v14, 0.0  ;;  %v4022_v56 = vmul.f32 0.2, %v3950_v14  ;;  %4271 = vst.msk [vmem:[%s6856_s29 + $0x64] sm:$0xf] %vm4245_vm9, %v4720_v15  ;;  %v3910_v31 = vadd.f32 %v3863_v37, %v3569_v16 }
 0x221   : > { %v5324_v58 = vpop.f32.mrf.mxu0  ;;  %4276 = vst.msk [vmem:[%s6856_s29 + $0x78] sm:$0xf] %vm4245_vm9, %v4725_v41  ;;  %v4093_v63 = vmul.f32 1.4142135, %v4057_v57  ;;  %v4060_v50 = vsel %vm3988_vm7, %v3952_v46, %v4024_v12  ;;  %v3955_v62 = vadd.f32 %v6843_v26, %v3912_v60 }
 0x222   : > { %v3913_v28 = vadd.f32 %v5324_v58, %v3572_v17  ;;  %v4096_v35 = vmul.f32 1.4142135, %v4060_v50  ;;  %v4058_v49 = vsel %vm3986_vm8, %v3950_v14, %v4022_v56  ;;  %v3953_v4 = vadd.f32 %v6843_v26, %v3910_v31 }
 0x223   : > { %v3866_v43 = vpop.f32.mrf.mxu0  ;;  %v4723_v20 = vpack.c.bf16 %v4093_v63, %v4093_v63  ;;  %v4094_v52 = vmul.f32 1.4142135, %v4058_v49  ;;  %vm3991_vm10 = vcmp.ge.f32.partialorder %v3955_v62, 0.0  ;;  %v4027_v7 = vmul.f32 0.2, %v3955_v62 }
 0x224   : > { %v3956_v32 = vadd.f32 %v6843_v26, %v3913_v28  ;;  %v4726_v36 = vpack.c.bf16 %v4096_v35, %v4096_v35  ;;  %v3911_v59 = vadd.f32 %v3866_v43, %v3570_v3  ;;  %vm3989_vm11 = vcmp.ge.f32.partialorder %v3953_v4, 0.0 }
 0x225   : > { %4274 = vst.msk [vmem:[%s6856_s29 + $0x70] sm:$0xf] %vm4245_vm9, %v4723_v20  ;;  %v4724_v6 = vpack.c.bf16 %v4094_v52, %v4094_v52  ;;  %v4025_v33 = vmul.f32 0.2, %v3953_v4  ;;  %v4063_v11 = vsel %vm3991_vm10, %v3955_v62, %v4027_v7 }
 0x226   : > { %vm3992_vm12 = vcmp.ge.f32.partialorder %v3956_v32, 0.0  ;;  %4277 = vst.msk [vmem:[%s6856_s29 + $0x7c] sm:$0xf] %vm4245_vm9, %v4726_v36  ;;  %v4028_v48 = vmul.f32 0.2, %v3956_v32  ;;  %v3954_v23 = vadd.f32 %v6843_v26, %v3911_v59 }
 0x227   : > { %4275 = vst.msk [vmem:[%s6856_s29 + $0x74] sm:$0xf] %vm4245_vm9, %v4724_v6  ;;  %v4099_v10 = vmul.f32 1.4142135, %v4063_v11  ;;  %v4061_v29 = vsel %vm3989_vm11, %v3953_v4, %v4025_v33 }
 0x228   : > { %v4097_v5 = vmul.f32 1.4142135, %v4061_v29  ;;  %v4064_v24 = vsel %vm3992_vm12, %v3956_v32, %v4028_v48  ;;  %vm3990_vm13 = vcmp.ge.f32.partialorder %v3954_v23, 0.0  ;;  %v4026_v40 = vmul.f32 0.2, %v3954_v23 }
 0x229   : > { %v4729_v9 = vpack.c.bf16 %v4099_v10, %v4099_v10  ;;  %v4100_v30 = vmul.f32 1.4142135, %v4064_v24 }
 0x22a   : > { %v4727_v38 = vpack.c.bf16 %v4097_v5, %v4097_v5  ;;  %v4062_v53 = vsel %vm3990_vm13, %v3954_v23, %v4026_v40 }
 0x22b   : > { %4280 = vst.msk [vmem:[%s6856_s29 + $0x88] sm:$0xf] %vm4245_vm9, %v4729_v9  ;;  %v4730_v1 = vpack.c.bf16 %v4100_v30, %v4100_v30  ;;  %v4098_v39 = vmul.f32 1.4142135, %v4062_v53 }
 0x22c   : > { %4278 = vst.msk [vmem:[%s6856_s29 + $0x80] sm:$0xf] %vm4245_vm9, %v4727_v38 }
 0x22d   : > { %4281 = vst.msk [vmem:[%s6856_s29 + $0x8c] sm:$0xf] %vm4245_vm9, %v4730_v1  ;;  %v4728_v26 = vpack.c.bf16 %v4098_v39, %v4098_v39 }
 0x22f   : > { %4279 = vst.msk [vmem:[%s6856_s29 + $0x84] sm:$0xf] %vm4245_vm9, %v4728_v26 }
 0x230 PF: > { %s13_s14 = sadd.s32 1, %s5479_s14   ;;  %s7049_s12 = smov %s5475_s13 }
 0x231   : > { %p10_p5 = scmp.ge.s32.totalorder %s13_s14, 4   ;;  %s7050_s13 = smov %s7052_s15 }
 0x233   :  { %12 = sbr.rel (!%p10_p5) target bundleno = 2 (0x2), region = 68 }

// kernel: res_block_forward.3
= control target key start
LH: loop header
LB: loop body
LE: loop exit
PB: predicated region body
PF: predicated region fallthrough
CT: control target
= control target key end

     0   :  { %s5588_s18 = smov 0   ;;  %s5590_s19 = smov 0   ;;  %s7262_s0 = inlined_call_operand.vmem [shape: bf16[2,102,256], index: 0, kind: input, shape index: {}]   ;;  %s7263_s1 = inlined_call_operand.vmem [shape: bf16[2304,64], index: 1, kind: input, shape index: {}]   ;;  %s7264_s2 = inlined_call_operand.vmem [shape: f32[1,64], index: 2, kind: input, shape index: {}]   ;;  %s7265_s3 = inlined_call_operand.vmem [shape: bf16[2,91,256], index: 3, kind: input, shape index: {}]   ;;  %s7266_s4 = inlined_call_operand.vmem [shape: bf16[1024,64], index: 4, kind: input, shape index: {}]   ;;  %s7267_s5 = inlined_call_operand.vmem [shape: f32[2,80,64], index: 5, kind: output, shape index: {}]  }
   0x1   :  { %s5592_s20 = smov 0  }
   0x2 LB: > { %s27_s21 = sadd.s32 1, %s5552_s19  ;;  %p4322_p0 = scmp.ge.s32.totalorder %s5556_s20, 1  ;;  %s5556_s20 = sphi %s5592_s20, %s15_s20   ;;  %s5552_s19 = sphi %s5590_s19, %s7291_s19   ;;  %s5548_s18 = sphi %s5588_s18, %s7290_s18  }
   0x3   : > { %p29_p1 = scmp.ge.s32.totalorder %s27_s21, 2  ;;  %p237_p2 = scmp.lt.s32.totalorder %s5556_s20, 3 }
   0x5   : > { %s7293_s21 = smov (%p29_p1, %s27_s21), 0  ;;  %p238_p3 = pnand %p4322_p0, %p237_p2 }
   0x7   : > { %241 = sbr.rel (%p238_p3) target bundleno = 512 (0x200), region = 40 }
   0xc   : > { %v5250_v0 = vld [vmem:[%s7263_s1 + $0xf8] sm:$0xff]   ;;  %v5254_v4 = vld [vmem:[%s7263_s1 + $0xf0] sm:$0xff]   ;;  %v5258_v8 = vld [vmem:[%s7263_s1 + $0xe8] sm:$0xff]   ;;  %p284_p4 = scmp.lt.s32.totalorder %s5548_s18, 1  ;;  %vm434_vm0 = vsmask.f32 7424 }
   0xd   : > { %v5251_v1 = vld [vmem:[%s7263_s1 + $0x78] sm:$0xff]   ;;  %4609 = vmatprep.subr.bf16.mxu0 %v5250_v0  ;;  %v5255_v5 = vld [vmem:[%s7263_s1 + $0x70] sm:$0xff]   ;;  %v5259_v9 = vld [vmem:[%s7263_s1 + $0x68] sm:$0xff]   ;;  %vm919_vm1 = vcmask 1046528   ;;  %vm1802_vm2 = vcmask 1045504   ;;  %vm2685_vm5 = vcmask 1044480  }
   0xe   : > { %v5252_v2 = vld [vmem:[%s7263_s1 + $0xb8] sm:$0xff]   ;;  %4655 = vmatprep.subr.bf16.mxu1 %v5251_v1  ;;  %v5256_v6 = vld [vmem:[%s7263_s1 + $0xb0] sm:$0xff]   ;;  %v5260_v10 = vld [vmem:[%s7263_s1 + $0xa8] sm:$0xff]   ;;  %s7295_s18 = smov (!%p284_p4, %s5548_s18), 1  ;;  %vm1468_vm3 = vsmask.f32 6400 }
   0xf   : > { %v5253_v3 = vld [vmem:[%s7263_s1 + $0x38] sm:$0xff]   ;;  %4610 = vmatpush3.bf16.msra.mxu0 %v5252_v2  ;;  %v5257_v7 = vld [vmem:[%s7263_s1 + $0x30] sm:$0xff]   ;;  %v5261_v11 = vld [vmem:[%s7263_s1 + $0x28] sm:$0xff]   ;;  %s5223_s7 = smul.u32 104, %s7295_s18  ;;  %vm2351_vm4 = vsmask.f32 5376 }
  0x10   : > { %4656 = vmatpush3.bf16.msra.mxu1 %v5253_v3  ;;  %4611 = vmatprep.subr.bf16.mxu0 %v5254_v4  ;;  %v5262_v12 = vld [vmem:[%s7263_s1 + $0xe0] sm:$0xff]   ;;  %v5266_v16 = vld [vmem:[%s7263_s1 + $0xd8] sm:$0xff]   ;;  %v5270_v20 = vld [vmem:[%s7263_s1 + $0xd0] sm:$0xff]   ;;  %s5224_s25 = smul.u32 96, %s7295_s18  ;;  %vm4172_vm10 = vcmask 523264  }
  0x11   : > { %4657 = vmatprep.subr.bf16.mxu1 %v5255_v5  ;;  %v5263_v13 = vld [vmem:[%s7263_s1 + $0x60] sm:$0xff]   ;;  %v5267_v17 = vld [vmem:[%s7263_s1 + $0x58] sm:$0xff]   ;;  %v5271_v21 = vld [vmem:[%s7263_s1 + $0x50] sm:$0xff]   ;;  %s5706_s22 = scalar_lea.vmem %s7262_s0, %s5223_s7  ;;  %s5225_s24 = smul.u32 80, %s7295_s18 }
  0x12   : > { %v5264_v14 = vld [vmem:[%s7263_s1 + $0xa0] sm:$0xff]   ;;  %v5268_v18 = vld [vmem:[%s7263_s1 + $0x98] sm:$0xff]   ;;  %v5272_v22 = vld [vmem:[%s7263_s1 + $0x90] sm:$0xff]   ;;  %s6463_s11 = scalar_lea.vmem %s7265_s3, %s5224_s25 }
  0x13   : > { %4612 = vmatpush3.bf16.msra.mxu0 %v5256_v6  ;;  %v5265_v15 = vld [vmem:[%s7263_s1 + $0x20] sm:$0xff]   ;;  %v5269_v19 = vld [vmem:[%s7263_s1 + $0x18] sm:$0xff]   ;;  %v5273_v23 = vld [vmem:[%s7263_s1 + $0x10] sm:$0xff]   ;;  %s7198_s25 = scalar_lea.vmem %s7267_s5, %s5225_s24 }
  0x14   : > { %4658 = vmatpush3.bf16.msra.mxu1 %v5257_v7  ;;  %4613 = vmatprep.subr.bf16.mxu0 %v5258_v8  ;;  %v5274_v24 = vld [vmem:[%s7263_s1 + $0xc8] sm:$0xff]   ;;  %v5278_v28 = vld [vmem:[%s7263_s1 + $0xc0] sm:$0xff]   ;;  %v5719_v34 = vld [vmem:[%s5706_s22 + $0x10] sm:$0xff] }
  0x15   : > { %4659 = vmatprep.subr.bf16.mxu1 %v5259_v9  ;;  %v5275_v25 = vld [vmem:[%s7263_s1 + $0x48] sm:$0xff]   ;;  %v5279_v29 = vld [vmem:[%s7263_s1 + $0x40] sm:$0xff]   ;;  %v5722_v35 = vld [vmem:[%s5706_s22 + $0x18] sm:$0xff] }
  0x16   : > { %v5276_v26 = vld [vmem:[%s7263_s1 + $0x88] sm:$0xff]   ;;  %v5280_v30 = vld [vmem:[%s7263_s1 + $0x80] sm:$0xff]   ;;  %v5728_v38 = vcombine.high %v5719_v34, %v5722_v35  ;;  %v5732_v39 = vcombine.low %v5719_v34, %v5722_v35  ;;  %v5286_v40 = vld [vmem:[%s7263_s1 + $0x178] sm:$0xff]  }
  0x17   : > { %4614 = vmatpush3.bf16.msra.mxu0 %v5260_v10  ;;  %v5277_v27 = vld [vmem:[%s7263_s1 + $0x8] sm:$0xff]   ;;  %v5281_v31 = vld [vmem:[%s7263_s1] sm:$0xff]   ;;  %v5287_v51 = vld [vmem:[%s7263_s1 + $0x138] sm:$0xff]  }
  0x18   : > { %4660 = vmatpush3.bf16.msra.mxu1 %v5261_v11  ;;  %4615 = vmatprep.subr.bf16.mxu0 %v5262_v12  ;;  %v314_v32 = vld [vmem:[%s5706_s22] sm:$0xff]  ;;  %v5716_v33 = vld [vmem:[%s5706_s22 + $0x8] sm:$0xff]  ;;  %v455_v45 = vshll.u32 %v5728_v38, 16  ;;  %v443_v46 = vshll.u32 %v5732_v39, 16  ;;  %v467_v54 = vshrl.u32 %v5728_v38, 16  ;;  %v5288_v57 = vld [vmem:[%s7263_s1 + $0x170] sm:$0xff]  }
  0x19   : > { %4661 = vmatprep.subr.bf16.mxu1 %v5263_v13  ;;  %v4327_v36 = vcombine.high %v314_v32, %v5716_v33  ;;  %v4326_v37 = vcombine.low %v314_v32, %v5716_v33  ;;  %v5744_v52 = vld [vmem:[%s5706_s22 + $0x20] sm:$0xff]  ;;  %v5747_v53 = vld [vmem:[%s5706_s22 + $0x28] sm:$0xff]  ;;  %v5292_v60 = vld [vmem:[%s7263_s1 + $0x1f8] sm:$0xff]   ;;  %v459_v62 = vshrl.u32 %v5732_v39, 16 }
  0x1a   : > { %v457_v49 = vrot.slane %v455_v45, 1  ;;  %v445_v50 = vrot.slane %v443_v46, 1  ;;  %v5755_v58 = vcombine.high %v5744_v52, %v5747_v53  ;;  %v5759_v59 = vcombine.low %v5744_v52, %v5747_v53  ;;  %v5293_v63 = vld [vmem:[%s7263_s1 + $0x1b8] sm:$0xff]   ;;  %v5289_v4 = vld [vmem:[%s7263_s1 + $0x130] sm:$0xff]   ;;  %v5294_v7 = vld [vmem:[%s7263_s1 + $0x168] sm:$0xff]  }
  0x1b   : > { %4616 = vmatpush3.bf16.msra.mxu0 %v5264_v14  ;;  %v448_v41 = vshrl.u32 %v4327_v36, 16  ;;  %v450_v42 = vshll.u32 %v4327_v36, 16  ;;  %840 = vmatprep.mubr.bf16.mxu1 %v4327_v36  ;;  %v436_v43 = vshrl.u32 %v4326_v37, 16  ;;  %v438_v44 = vshll.u32 %v4326_v37, 16  ;;  %v5296_v8 = vld [vmem:[%s7263_s1 + $0x1f0] sm:$0xff]   ;;  %v5791_v14 = vld [vmem:[%s5706_s22 + $0x38] sm:$0xff] }
  0x1c   : > { %4662 = vmatpush3.bf16.msra.mxu1 %v5265_v15  ;;  %4617 = vmatprep.subr.bf16.mxu0 %v5266_v16  ;;  %v469_v61 = vor.u32 %v467_v54, %v457_v49  ;;  %v471_v2 = vshll.u32 %v5755_v58, 16  ;;  %v463_v3 = vshll.u32 %v5759_v59, 16  ;;  %v483_v9 = vshrl.u32 %v5755_v58, 16  ;;  %v5297_v12 = vld [vmem:[%s7263_s1 + $0x1b0] sm:$0xff]   ;;  %v5295_v15 = vld [vmem:[%s7263_s1 + $0x128] sm:$0xff]   ;;  %v5304_v32 = vld [vmem:[%s7263_s1 + $0x158] sm:$0xff]  }
  0x1d   : > { %4663 = vmatprep.subr.bf16.mxu1 %v5267_v17  ;;  %v452_v47 = vrot.slane %v450_v42, 1  ;;  %v440_v48 = vrot.slane %v438_v44, 1  ;;  %v461_v10 = vor.u32 %v459_v62, %v445_v50  ;;  %v5788_v13 = vld [vmem:[%s5706_s22 + $0x30] sm:$0xff]  ;;  %v5840_v42 = vld [vmem:[%s5706_s22 + $0x48] sm:$0xff]  ;;  %v5310_v45 = vld [vmem:[%s7263_s1 + $0x1d8] sm:$0xff]  }
  0x1e   : > { %v473_v5 = vrot.slane %v471_v2, 1  ;;  %v465_v6 = vrot.slane %v463_v3, 1  ;;  %v5798_v16 = vcombine.high %v5788_v13, %v5791_v14  ;;  %v5803_v17 = vcombine.low %v5788_v13, %v5791_v14  ;;  %v5312_v54 = vld [vmem:[%s7263_s1 + $0x198] sm:$0xff]   ;;  %v5316_v2 = vld [vmem:[%s7263_s1 + $0x148] sm:$0xff]   ;;  %v356_v3 = vld [vmem:[%s5706_s22 + $0x50] sm:$0x11] }
  0x1f   : > { %4618 = vmatpush3.bf16.msra.mxu0 %v5268_v18  ;;  %v453_v55 = vor.u32 %v452_v47, %v448_v41  ;;  %v441_v56 = vor.u32 %v440_v48, %v436_v43  ;;  %v5299_v18 = vld [vmem:[%s7263_s1 + $0x160] sm:$0xff]   ;;  %v5311_v48 = vld [vmem:[%s7263_s1 + $0x150] sm:$0xff]  }
  0x20   : > { %4664 = vmatpush3.bf16.msra.mxu1 %v5269_v19  ;;  %4619 = vmatprep.subr.bf16.mxu0 %v5270_v20  ;;  %v474_v11 = vsel %vm434_vm0, %v469_v61, %v473_v5  ;;  %v475_v19 = vshrl.u32 %v5759_v59, 16  ;;  %v466_v20 = vsel %vm434_vm0, %v461_v10, %v465_v6  ;;  %v499_v36 = vshrl.u32 %v5798_v16, 16  ;;  %v5837_v41 = vld [vmem:[%s5706_s22 + $0x40] sm:$0xff] }
  0x21   : > { %4665 = vmatprep.subr.bf16.mxu1 %v5271_v21  ;;  %v458_v0 = vsel %vm434_vm0, %v453_v55, %v457_v49  ;;  %v446_v1 = vsel %vm434_vm0, %v441_v56, %v445_v50  ;;  %v485_v21 = vor.u32 %v483_v9, %v473_v5  ;;  %v5845_v43 = vcombine.high %v5837_v41, %v5840_v42 }
  0x22   : > { %661 = vmatprep.mubr.bf16.mxu0 %v458_v0  ;;  %v5849_v44 = vcombine.low %v5837_v41, %v5840_v42  ;;  %v491_v47 = vshrl.u32 %v5803_v17, 16  ;;  %v5872_v61 = vcombine.high %v5722_v35, %v5744_v52  ;;  %v5315_v0 = vld [vmem:[%s7263_s1 + $0x190] sm:$0xff]   ;;  %v5886_v5 = vcombine.high %v356_v3, %v356_v3 }
  0x23   : > { %4620 = vmatpush3.bf16.msra.mxu0 %v5272_v22  ;;  %v487_v22 = vshll.u32 %v5798_v16, 16  ;;  %v503_v50 = vshll.u32 %v5845_v43, 16 }
  0x24   : > { %4666 = vmatpush3.bf16.msra.mxu1 %v5273_v23  ;;  %4621 = vmatprep.subr.bf16.mxu0 %v5274_v24  ;;  %v479_v23 = vshll.u32 %v5803_v17, 16  ;;  %v5302_v24 = vld [vmem:[%s7263_s1 + $0x1e8] sm:$0xff]   ;;  %v507_v10 = vshrl.u32 %v5849_v44, 16 }
  0x25   : > { %4667 = vmatprep.subr.bf16.mxu1 %v5275_v25  ;;  %v489_v25 = vrot.slane %v487_v22, 1  ;;  %v505_v55 = vrot.slane %v503_v50, 1 }
  0x27   : > { %4622 = vmatpush3.bf16.msra.mxu0 %v5276_v26  ;;  %v5301_v26 = vld [vmem:[%s7263_s1 + $0x120] sm:$0xff]   ;;  %v501_v49 = vor.u32 %v499_v36, %v489_v25 }
  0x28   : > { %4668 = vmatpush3.bf16.msra.mxu1 %v5277_v27  ;;  %4623 = vmatprep.subr.bf16.mxu0 %v5278_v28  ;;  %v5303_v27 = vld [vmem:[%s7263_s1 + $0x1a8] sm:$0xff]   ;;  %v490_v28 = vsel %vm434_vm0, %v485_v21, %v489_v25  ;;  %v5909_v21 = vcombine.low %v5722_v35, %v5744_v52  ;;  %v5324_v25 = vld [vmem:[%s7263_s1 + $0x1c0] sm:$0xff]  }
  0x29   : > { %4669 = vmatprep.subr.bf16.mxu1 %v5279_v29  ;;  %v477_v29 = vor.u32 %v475_v19, %v465_v6  ;;  %v5318_v6 = vld [vmem:[%s7263_s1 + $0x108] sm:$0xff]  }
  0x2a   : > { %v5321_v19 = vld [vmem:[%s7263_s1 + $0x188] sm:$0xff]  }
  0x2b   : > { %4624 = vmatpush3.bf16.msra.mxu0 %v5280_v30  ;;  %v481_v30 = vrot.slane %v479_v23, 1 }
  0x2c   : > { %4670 = vmatpush3.bf16.msra.mxu1 %v5281_v31  ;;  %4701 = vmatprep.subr.bf16.mxu0 %v5286_v40  ;;  %v5305_v31 = vld [vmem:[%s7263_s1 + $0x1e0] sm:$0xff]  }
  0x2d   : > { %4747 = vmatprep.subr.bf16.mxu1 %v5292_v60  ;;  %v5307_v40 = vld [vmem:[%s7263_s1 + $0x1a0] sm:$0xff]   ;;  %v482_v46 = vsel %vm434_vm0, %v477_v29, %v481_v30  ;;  %v5314_v60 = vld [vmem:[%s7263_s1 + $0x1d0] sm:$0xff]   ;;  %v493_v62 = vor.u32 %v491_v47, %v481_v30  ;;  %v1220_v29 = vrot.slane %v5909_v21, 1 }
  0x2e   : > { %662 = vmatmul.mubr.bf16.vlgmr.msra.gmra.mxu0 %v446_v1  ;;  %v515_v1 = vshrl.u32 %v5845_v43, 16 }
  0x2f   : > { %841 = vmatmul.mubr.bf16.vlgmr.msra.gmra.mxu1 %v4326_v37  ;;  %4702 = vmatpush3.bf16.msra.mxu0 %v5287_v51  ;;  %v5306_v37 = vld [vmem:[%s7263_s1 + $0x118] sm:$0xff]   ;;  %v495_v51 = vshll.u32 %v5849_v44, 16 }
  0x30   : > { %848 = vmatprep.mubr.bf16.mxu1 %v5728_v38  ;;  %4748 = vmatpush3.bf16.msra.mxu1 %v5293_v63  ;;  %v506_v63 = vsel %vm434_vm0, %v501_v49, %v505_v55 }
  0x31   : > { %4703 = vmatprep.subr.bf16.mxu0 %v5288_v57  ;;  %4749 = vmatprep.subr.bf16.mxu1 %v5296_v8  ;;  %v497_v56 = vrot.slane %v495_v51, 1  ;;  %v5313_v57 = vld [vmem:[%s7263_s1 + $0x110] sm:$0xff]   ;;  %v1223_v8 = vrot.slane %v5872_v61, 1  ;;  %v921_v51 = vrot.slane %v5732_v39, 1 }
  0x32   : > { %669 = vmatprep.mubr.bf16.mxu0 %v474_v11  ;;  %v5320_v11 = vld [vmem:[%s7263_s1 + $0x1c8] sm:$0xff]  }
  0x33   : > { %4704 = vmatpush3.bf16.msra.mxu0 %v5289_v4  ;;  %v924_v4 = vrot.slane %v5728_v38, 1  ;;  %v498_v9 = vsel %vm434_vm0, %v493_v62, %v497_v56  ;;  %v509_v35 = vor.u32 %v507_v10, %v497_v56  ;;  %v5333_v62 = vld [vmem:[%s7263_s1 + $0x238] sm:$0xff]   ;;  %v5990_v10 = vcombine.low %v5791_v14, %v5837_v41  ;;  %v5348_v38 = vld [vmem:[%s7263_s1 + $0x2e8] sm:$0xff]  }
  0x34   : > { %4750 = vmatpush3.bf16.msra.mxu1 %v5297_v12  ;;  %4705 = vmatprep.subr.bf16.mxu0 %v5294_v7  ;;  %v5891_v7 = vcombine.low %v356_v3, %v356_v3  ;;  %v517_v12 = vor.u32 %v515_v1, %v505_v55  ;;  %v5334_v3 = vld [vmem:[%s7263_s1 + $0x270] sm:$0xff]  }
  0x35   : > { %4751 = vmatprep.subr.bf16.mxu1 %v5302_v24  ;;  %v5323_v24 = vld [vmem:[%s7263_s1 + $0x100] sm:$0xff]  }
  0x36   : > { %670 = vmatmul.mubr.bf16.gmra.mxu0 %v466_v20  ;;  %v5322_v20 = vld [vmem:[%s7263_s1 + $0x140] sm:$0xff]  }
  0x37   : > { %849 = vmatmul.mubr.bf16.gmra.mxu1 %v5732_v39  ;;  %4706 = vmatpush3.bf16.msra.mxu0 %v5295_v15  ;;  %v519_v15 = vshll.u32 %v5886_v5, 16 }
  0x38   : > { %856 = vmatprep.mubr.bf16.mxu1 %v5755_v58  ;;  %677 = vmatprep.mubr.bf16.mxu0 %v490_v28  ;;  %v881_v28 = vld [vmem:[%s5706_s22] sm:$0xee] }
  0x39   : > { %4707 = vmatprep.subr.bf16.mxu0 %v5299_v18  ;;  %4752 = vmatpush3.bf16.msra.mxu1 %v5303_v27  ;;  %v511_v18 = vshll.u32 %v5891_v7, 16  ;;  %v521_v22 = vrot.slane %v519_v15, 1  ;;  %v5325_v27 = vld [vmem:[%s7263_s1 + $0x180] sm:$0xff]   ;;  %v4371_v30 = vcombine.high %v881_v28, %v5716_v33  ;;  %v5349_v15 = vld [vmem:[%s7263_s1 + $0x2a8] sm:$0xff]  }
  0x3a   : > { %4753 = vmatprep.subr.bf16.mxu1 %v5305_v31  ;;  %v1131_v31 = vld [vmem:[%s5706_s22 + $0x8] sm:$0xee] }
  0x3b   : > { %4708 = vmatpush3.bf16.msra.mxu0 %v5301_v26  ;;  %v513_v23 = vrot.slane %v511_v18, 1  ;;  %v5919_v26 = vcombine.high %v5747_v53, %v5788_v13  ;;  %v522_v52 = vsel %vm434_vm0, %v517_v12, %v521_v22  ;;  %v5934_v36 = vcombine.high %v1131_v31, %v5719_v34  ;;  %v5341_v18 = vld [vmem:[%s7263_s1 + $0x228] sm:$0xff]   ;;  %v5353_v22 = vld [vmem:[%s7263_s1 + $0x2a0] sm:$0xff]  }
  0x3c   : > { %4709 = vmatprep.subr.bf16.mxu0 %v5304_v32  ;;  %v5931_v32 = vcombine.low %v1131_v31, %v5719_v34  ;;  %v923_v47 = vrot.slane %v4371_v30, 1  ;;  %v5356_v31 = vld [vmem:[%s7263_s1 + $0x2d8] sm:$0xff]  }
  0x3d   : > { %4754 = vmatpush3.bf16.msra.mxu1 %v5307_v40  ;;  %v1227_v40 = vrot.slane %v5919_v26, 1 }
  0x3e   : > { %678 = vmatmul.mubr.bf16.gmra.mxu0 %v482_v46  ;;  %4755 = vmatprep.subr.bf16.mxu1 %v5310_v45  ;;  %v514_v45 = vsel %vm434_vm0, %v509_v35, %v513_v23  ;;  %v4370_v46 = vcombine.low %v881_v28, %v5716_v33  ;;  %v1219_v49 = vrot.slane %v5931_v32, 1  ;;  %v925_v50 = vsel %vm919_vm1, %v923_v47, %v924_v4  ;;  %v6018_v23 = vld [vmem:[%s5706_s22 + $0x50] sm:$0xff]  ;;  %v5350_v47 = vld [vmem:[%s7263_s1 + $0x258] sm:$0xff]  }
  0x3f   : > { %857 = vmatmul.mubr.bf16.gmra.mxu1 %v5759_v59  ;;  %4710 = vmatpush3.bf16.msra.mxu0 %v5306_v37  ;;  %v5332_v37 = vld [vmem:[%s7263_s1 + $0x278] sm:$0xff]   ;;  %v1228_v56 = vsel %vm919_vm1, %v1223_v8, %v1227_v40  ;;  %v938_v28 = vrot.slane %v5891_v7, 1  ;;  %v6034_v30 = vcombine.low %v5840_v42, %v6018_v23 }
  0x40   : > { %864 = vmatprep.mubr.bf16.mxu1 %v5798_v16  ;;  %4711 = vmatprep.subr.bf16.mxu0 %v5311_v48  ;;  %v1222_v48 = vrot.slane %v5934_v36, 1  ;;  %v1221_v55 = vsel %vm919_vm1, %v1219_v49, %v1220_v29  ;;  %v920_v39 = vrot.slane %v4370_v46, 1  ;;  %v1490_v46 = vshll.u32 %v5934_v36, 16 }
  0x41   : > { %685 = vmatprep.mubr.bf16.mxu0 %v506_v63  ;;  %4756 = vmatpush3.bf16.msra.mxu1 %v5312_v54  ;;  %v5950_v54 = vcombine.low %v5747_v53, %v5788_v13  ;;  %v5339_v53 = vld [vmem:[%s7263_s1 + $0x2b8] sm:$0xff]   ;;  %v928_v13 = vrot.slane %v5755_v58, 1  ;;  %v5343_v58 = vld [vmem:[%s7263_s1 + $0x2b0] sm:$0xff]   ;;  %v1495_v49 = vshrl.u32 %v5872_v61, 16 }
  0x42   : > { %4757 = vmatprep.subr.bf16.mxu1 %v5314_v60  ;;  %v1224_v33 = vsel %vm919_vm1, %v1222_v48, %v1223_v8  ;;  %v5960_v60 = vcombine.high %v5791_v14, %v5837_v41  ;;  %v5335_v8 = vld [vmem:[%s7263_s1 + $0x230] sm:$0xff]   ;;  %v930_v14 = vrot.slane %v5803_v17, 1  ;;  %v1229_v41 = vrot.slane %v5990_v10, 1 }
  0x43   : > { %4712 = vmatpush3.bf16.msra.mxu0 %v5313_v57  ;;  %v5338_v57 = vld [vmem:[%s7263_s1 + $0x2f8] sm:$0xff]   ;;  %v1225_v63 = vrot.slane %v5950_v54, 1 }
  0x44   : > { %4713 = vmatprep.subr.bf16.mxu0 %v5316_v2  ;;  %v1231_v1 = vrot.slane %v5960_v60, 1  ;;  %v922_v2 = vsel %vm919_vm1, %v920_v39, %v921_v51 }
  0x45   : > { %4758 = vmatpush3.bf16.msra.mxu1 %v5315_v0  ;;  %v5342_v0 = vld [vmem:[%s7263_s1 + $0x2f0] sm:$0xff]  }
  0x46   : > { %686 = vmatmul.mubr.bf16.gmra.mxu0 %v498_v9  ;;  %4759 = vmatprep.subr.bf16.mxu1 %v5320_v11  ;;  %v1226_v9 = vsel %vm919_vm1, %v1220_v29, %v1225_v63  ;;  %v926_v11 = vrot.slane %v5759_v59, 1  ;;  %v1232_v12 = vsel %vm919_vm1, %v1227_v40, %v1231_v1  ;;  %v5340_v59 = vld [vmem:[%s7263_s1 + $0x268] sm:$0xff]   ;;  %v1230_v29 = vsel %vm919_vm1, %v1225_v63, %v1229_v41  ;;  %v5347_v40 = vld [vmem:[%s7263_s1 + $0x220] sm:$0xff]  }
  0x47   : > { %865 = vmatmul.mubr.bf16.gmra.mxu1 %v5803_v17  ;;  %4714 = vmatpush3.bf16.msra.mxu0 %v5318_v6  ;;  %v929_v6 = vsel %vm919_vm1, %v924_v4, %v928_v13  ;;  %v932_v4 = vrot.slane %v5798_v16, 1  ;;  %v5351_v16 = vld [vmem:[%s7263_s1 + $0x2e0] sm:$0xff]   ;;  %v6076_v63 = vrot.slane %v1490_v46, 2 }
  0x48   : > { %872 = vmatprep.mubr.bf16.mxu1 %v5845_v43  ;;  %4715 = vmatprep.subr.bf16.mxu0 %v5322_v20  ;;  %v927_v20 = vsel %vm919_vm1, %v921_v51, %v926_v11  ;;  %v5360_v51 = vld [vmem:[%s7263_s1 + $0x2d0] sm:$0xff]   ;;  %v5368_v17 = vld [vmem:[%s7263_s1 + $0x240] sm:$0xff]  }
  0x49   : > { %693 = vmatprep.mubr.bf16.mxu0 %v522_v52  ;;  %4760 = vmatpush3.bf16.msra.mxu1 %v5321_v19  ;;  %v936_v19 = vrot.slane %v5845_v43, 1  ;;  %v933_v35 = vsel %vm919_vm1, %v928_v13, %v932_v4  ;;  %v5345_v52 = vld [vmem:[%s7263_s1 + $0x260] sm:$0xff]   ;;  %v5357_v13 = vld [vmem:[%s7263_s1 + $0x250] sm:$0xff]   ;;  %v1481_v43 = vshll.u32 %v5909_v21, 16 }
  0x4a   : > { %4761 = vmatprep.subr.bf16.mxu1 %v5324_v25  ;;  %v940_v25 = vrot.slane %v5886_v5, 1  ;;  %v5369_v5 = vld [vmem:[%s7263_s1 + $0x200] sm:$0xff]  }
  0x4b   : > { %4716 = vmatpush3.bf16.msra.mxu0 %v5323_v24  ;;  %v934_v24 = vrot.slane %v5849_v44, 1 }
  0x4c   : > { %4793 = vmatprep.subr.bf16.mxu0 %v5332_v37  ;;  %v1487_v37 = vshrl.u32 %v5934_v36, 16  ;;  %v5361_v36 = vld [vmem:[%s7263_s1 + $0x290] sm:$0xff]  }
  0x4d   : > { %4762 = vmatpush3.bf16.msra.mxu1 %v5325_v27  ;;  %v6028_v27 = vcombine.high %v5840_v42, %v6018_v23  ;;  %v5358_v42 = vld [vmem:[%s7263_s1 + $0x298] sm:$0xff]  }
  0x4e   : > { %694 = vmatmul.mubr.bf16.gmra.mxu0 %v514_v45  ;;  %4839 = vmatprep.subr.bf16.mxu1 %v5338_v57  ;;  %v1141_v57 = vld [vmem:[%s5706_s22 + $0x58] sm:$0x11]  ;;  %v6068_v39 = vrot.slane %v1487_v37, 1  ;;  %v1478_v37 = vshrl.u32 %v5909_v21, 16 }
  0x4f   : > { %873 = vmatmul.mubr.bf16.gmra.mxu1 %v5849_v44  ;;  %1080 = vmatprep.mubr.bf16.mxu0 %v925_v50  ;;  %v1235_v45 = vrot.slane %v6028_v27, 1  ;;  %v1233_v50 = vrot.slane %v6034_v30, 1  ;;  %v5382_v44 = vld [vmem:[%s7263_s1 + $0x3f0] sm:$0xff]  }
  0x50   : > { %1379 = vmatprep.mubr.bf16.mxu1 %v1224_v33  ;;  %v1498_v33 = vshll.u32 %v5872_v61, 16 }
  0x51   : > { %v1236_v48 = vsel %vm919_vm1, %v1231_v1, %v1235_v45  ;;  %v4398_v1 = vcombine.low %v1141_v57, %v1141_v57 }
  0x56   : > { %1081 = vmatmul.mubr.bf16.vlgmr.msra.gmra.mxu0 %v922_v2  ;;  %v5366_v2 = vld [vmem:[%s7263_s1 + $0x2c8] sm:$0xff]  }
  0x57   : > { %1380 = vmatmul.mubr.bf16.vlgmr.msra.gmra.mxu1 %v1221_v55  ;;  %4794 = vmatpush3.bf16.msra.mxu0 %v5333_v62  ;;  %v931_v55 = vsel %vm919_vm1, %v926_v11, %v930_v14  ;;  %v4399_v62 = vcombine.high %v1141_v57, %v1141_v57  ;;  %v5362_v11 = vld [vmem:[%s7263_s1 + $0x248] sm:$0xff]   ;;  %v1504_v57 = vshrl.u32 %v5950_v54, 16 }
  0x58   : > { %1387 = vmatprep.mubr.bf16.mxu1 %v1228_v56  ;;  %4840 = vmatpush3.bf16.msra.mxu1 %v5339_v53  ;;  %v5352_v56 = vld [vmem:[%s7263_s1 + $0x218] sm:$0xff]   ;;  %v937_v53 = vsel %vm919_vm1, %v932_v4, %v936_v19  ;;  %v1237_v4 = vrot.slane %v4398_v1, 1 }
  0x59   : > { %4841 = vmatprep.subr.bf16.mxu1 %v5342_v0  ;;  %1088 = vmatprep.mubr.bf16.mxu0 %v929_v6  ;;  %v1234_v0 = vsel %vm919_vm1, %v1229_v41, %v1233_v50  ;;  %v1239_v6 = vrot.slane %v4399_v62, 1  ;;  %v1764_v41 = vld [vmem:[%s5706_s22 + $0x8] sm:$0xcc]  ;;  %v5383_v62 = vld [vmem:[%s7263_s1 + $0x3b0] sm:$0xff]   ;;  %v5375_v1 = vld [vmem:[%s7263_s1 + $0x338] sm:$0xff]  }
  0x5a   : > { %4795 = vmatprep.subr.bf16.mxu0 %v5334_v3  ;;  %v5359_v3 = vld [vmem:[%s7263_s1 + $0x210] sm:$0xff]  }
  0x5b   : > { %4796 = vmatpush3.bf16.msra.mxu0 %v5335_v8  ;;  %v5367_v8 = vld [vmem:[%s7263_s1 + $0x288] sm:$0xff]  }
  0x5c   : > { %4842 = vmatpush3.bf16.msra.mxu1 %v5343_v58  ;;  %4797 = vmatprep.subr.bf16.mxu0 %v5340_v59  ;;  %v1497_v58 = vrot.slane %v1495_v49, 1  ;;  %v5371_v59 = vld [vmem:[%s7263_s1 + $0x280] sm:$0xff]   ;;  %v1811_v49 = vrot.slane %v5919_v26, 2 }
  0x5d   : > { %4843 = vmatprep.subr.bf16.mxu1 %v5348_v38  ;;  %v1470_v38 = vshrl.u32 %v5931_v32, 16 }
  0x5e   : > { %1089 = vmatmul.mubr.bf16.gmra.mxu0 %v927_v20  ;;  %v5364_v20 = vld [vmem:[%s7263_s1 + $0x208] sm:$0xff]  }
  0x5f   : > { %1388 = vmatmul.mubr.bf16.gmra.mxu1 %v1226_v9  ;;  %4798 = vmatpush3.bf16.msra.mxu0 %v5341_v18  ;;  %v1500_v9 = vrot.slane %v1498_v33, 2  ;;  %v935_v18 = vsel %vm919_vm1, %v930_v14, %v934_v24  ;;  %v1472_v14 = vrot.slane %v1470_v38, 1  ;;  %v5377_v38 = vld [vmem:[%s7263_s1 + $0x330] sm:$0xff]  }
  0x60   : > { %1395 = vmatprep.mubr.bf16.mxu1 %v1232_v12  ;;  %4844 = vmatpush3.bf16.msra.mxu1 %v5349_v15  ;;  %v1240_v12 = vsel %vm919_vm1, %v1235_v45, %v1239_v6  ;;  %v5370_v15 = vld [vmem:[%s7263_s1 + $0x2c0] sm:$0xff]   ;;  %v1493_v45 = vor.u32 %v6076_v63, %v6068_v39  ;;  %v1507_v39 = vshll.u32 %v5950_v54, 16  ;;  %v1531_v63 = vshrl.u32 %v5960_v60, 16 }
  0x61   : > { %4845 = vmatprep.subr.bf16.mxu1 %v5351_v16  ;;  %1096 = vmatprep.mubr.bf16.mxu0 %v933_v35  ;;  %v1807_v16 = vrot.slane %v5872_v61, 2  ;;  %v1473_v35 = vshll.u32 %v5931_v32, 16  ;;  %v941_v61 = vsel %vm919_vm1, %v936_v19, %v940_v25  ;;  %v5374_v19 = vld [vmem:[%s7263_s1 + $0x378] sm:$0xff]   ;;  %v1516_v25 = vshll.u32 %v5919_v26, 16 }
  0x62   : > { %4799 = vmatprep.subr.bf16.mxu0 %v5345_v52  ;;  %v1238_v52 = vsel %vm919_vm1, %v1233_v50, %v1237_v4  ;;  %v939_v50 = vsel %vm919_vm1, %v934_v24, %v938_v28  ;;  %v1506_v6 = vrot.slane %v1504_v57, 1 }
  0x63   : > { %4800 = vmatpush3.bf16.msra.mxu0 %v5347_v40  ;;  %v5378_v40 = vld [vmem:[%s7263_s1 + $0x3f8] sm:$0xff]   ;;  %v1812_v7 = vsel %vm1802_vm2, %v1807_v16, %v1811_v49 }
  0x64   : > { %4846 = vmatpush3.bf16.msra.mxu1 %v5353_v22  ;;  %4801 = vmatprep.subr.bf16.mxu0 %v5350_v47  ;;  %v4435_v22 = vcombine.high %v1764_v41, %v5719_v34  ;;  %v1804_v47 = vrot.slane %v5909_v21, 2 }
  0x65   : > { %4847 = vmatprep.subr.bf16.mxu1 %v5356_v31 }
  0x66   : > { %1097 = vmatmul.mubr.bf16.gmra.mxu0 %v931_v55  ;;  %v1806_v31 = vrot.slane %v4435_v22, 2  ;;  %v1549_v22 = vshrl.u32 %v6028_v27, 16 }
  0x67   : > { %1396 = vmatmul.mubr.bf16.gmra.mxu1 %v1230_v29  ;;  %4802 = vmatpush3.bf16.msra.mxu0 %v5352_v56  ;;  %v4434_v29 = vcombine.low %v1764_v41, %v5719_v34  ;;  %v1513_v34 = vshrl.u32 %v5919_v26, 16  ;;  %v1518_v56 = vrot.slane %v1516_v25, 2  ;;  %v5379_v26 = vld [vmem:[%s7263_s1 + $0x3b8] sm:$0xff]   ;;  %v1540_v25 = vshrl.u32 %v6034_v30, 16 }
  0x68   : > { %1403 = vmatprep.mubr.bf16.mxu1 %v1236_v48  ;;  %4848 = vmatpush3.bf16.msra.mxu1 %v5358_v42  ;;  %v1808_v32 = vsel %vm1802_vm2, %v1806_v31, %v1807_v16  ;;  %v1501_v42 = vor.u32 %v1500_v9, %v1497_v58  ;;  %v1475_v48 = vrot.slane %v1473_v35, 2  ;;  %v5386_v58 = vld [vmem:[%s7263_s1 + $0x3e8] sm:$0xff]   ;;  %v5389_v16 = vld [vmem:[%s7263_s1 + $0x3e0] sm:$0xff]  }
  0x69   : > { %4849 = vmatprep.subr.bf16.mxu1 %v5360_v51  ;;  %1104 = vmatprep.mubr.bf16.mxu0 %v937_v53  ;;  %v1803_v46 = vrot.slane %v4434_v29, 2  ;;  %v1480_v51 = vrot.slane %v1478_v37, 1  ;;  %v1515_v55 = vrot.slane %v1513_v34, 1  ;;  %v5391_v29 = vld [vmem:[%s7263_s1 + $0x3a0] sm:$0xff]   ;;  %v5392_v37 = vld [vmem:[%s7263_s1 + $0x3d8] sm:$0xff]  }
  0x6a   : > { %4803 = vmatprep.subr.bf16.mxu0 %v5357_v13  ;;  %v1502_v33 = vsel %vm1468_vm3, %v1493_v45, %v1501_v42  ;;  %v1476_v24 = vor.u32 %v1475_v48, %v1472_v14  ;;  %v1809_v13 = vrot.slane %v5950_v54, 2  ;;  %v1815_v54 = vrot.slane %v5960_v60, 2  ;;  %v5381_v14 = vld [vmem:[%s7263_s1 + $0x328] sm:$0xff]   ;;  %v5384_v31 = vld [vmem:[%s7263_s1 + $0x360] sm:$0xff]   ;;  %v5394_v45 = vld [vmem:[%s7263_s1 + $0x398] sm:$0xff]  }
  0x6b   : > { %4804 = vmatpush3.bf16.msra.mxu0 %v5359_v3  ;;  %v1805_v21 = vsel %vm1802_vm2, %v1803_v46, %v1804_v47  ;;  %v1519_v53 = vor.u32 %v1518_v56, %v1515_v55 }
  0x6c   : > { %4850 = vmatpush3.bf16.msra.mxu1 %v5361_v36  ;;  %4805 = vmatprep.subr.bf16.mxu0 %v5362_v11  ;;  %v1483_v36 = vrot.slane %v1481_v43, 2  ;;  %v1533_v11 = vrot.slane %v1531_v63, 1  ;;  %v1810_v4 = vsel %vm1802_vm2, %v1804_v47, %v1809_v13  ;;  %v1816_v41 = vsel %vm1802_vm2, %v1811_v49, %v1815_v54  ;;  %v5396_v47 = vld [vmem:[%s7263_s1 + $0x3d0] sm:$0xff]  }
  0x6d   : > { %4851 = vmatprep.subr.bf16.mxu1 %v5366_v2  ;;  %v5376_v2 = vld [vmem:[%s7263_s1 + $0x370] sm:$0xff]   ;;  %v1520_v9 = vsel %vm1468_vm3, %v1501_v42, %v1519_v53  ;;  %v1430_v42 = vld [vmem:[%s5706_s22 + $0x58] sm:$0x33] }
  0x6e   : > { %1105 = vmatmul.mubr.bf16.gmra.mxu0 %v935_v18  ;;  %v1484_v28 = vor.u32 %v1483_v36, %v1480_v51  ;;  %v4417_v48 = vcombine.high %v1430_v42, %v1430_v42  ;;  %v6218_v49 = vcombine.low %v1430_v42, %v1430_v42  ;;  %v5385_v51 = vld [vmem:[%s7263_s1 + $0x320] sm:$0xff]   ;;  %v5388_v36 = vld [vmem:[%s7263_s1 + $0x358] sm:$0xff]  }
  0x6f   : > { %1404 = vmatmul.mubr.bf16.gmra.mxu1 %v1234_v0  ;;  %1112 = vmatprep.mubr.bf16.mxu0 %v941_v61  ;;  %v1534_v0 = vshll.u32 %v5960_v60, 16  ;;  %v1522_v60 = vshrl.u32 %v5990_v10, 16  ;;  %v1813_v61 = vrot.slane %v5990_v10, 2 }
  0x70   : > { %1411 = vmatprep.mubr.bf16.mxu1 %v1240_v12  ;;  %4852 = vmatpush3.bf16.msra.mxu1 %v5367_v8  ;;  %v1485_v3 = vsel %vm1468_vm3, %v1476_v24, %v1484_v28  ;;  %v1509_v8 = vrot.slane %v1507_v39, 2  ;;  %v1567_v55 = vshrl.u32 %v4417_v48, 16  ;;  %v1570_v56 = vshll.u32 %v4417_v48, 16  ;;  %v5397_v24 = vld [vmem:[%s7263_s1 + $0x390] sm:$0xff]  }
  0x71   : > { %4853 = vmatprep.subr.bf16.mxu1 %v5370_v15  ;;  %4806 = vmatpush3.bf16.msra.mxu0 %v5364_v20  ;;  %v1536_v12 = vrot.slane %v1534_v0, 2  ;;  %v5387_v15 = vld [vmem:[%s7263_s1 + $0x3a8] sm:$0xff]   ;;  %v1525_v20 = vshll.u32 %v5990_v10, 16  ;;  %v1819_v10 = vrot.slane %v6028_v27, 2  ;;  %v1823_v57 = vrot.slane %v4417_v48, 2  ;;  %v5413_v48 = vld [vmem:[%s7263_s1 + $0x478] sm:$0xff]  }
  0x72   : > { %4807 = vmatprep.subr.bf16.mxu0 %v5368_v17  ;;  %v1510_v18 = vor.u32 %v1509_v8, %v1506_v6  ;;  %v1552_v17 = vshll.u32 %v6028_v27, 16  ;;  %v1543_v27 = vshll.u32 %v6034_v30, 16  ;;  %v1558_v39 = vshrl.u32 %v6218_v49, 16  ;;  %v5403_v0 = vld [vmem:[%s7263_s1 + $0x388] sm:$0xff]   ;;  %v2014_v6 = vld [vmem:[%s5706_s22 + $0x10] sm:$0xcc] }
  0x73   : > { %v1537_v35 = vor.u32 %v1536_v12, %v1533_v11  ;;  %v1527_v43 = vrot.slane %v1525_v20, 2  ;;  %v1820_v46 = vsel %vm1802_vm2, %v1815_v54, %v1819_v10  ;;  %v1572_v63 = vrot.slane %v1570_v56, 2  ;;  %v6262_v11 = vld [vmem:[%s5706_s22 + $0x18] sm:$0xff]  ;;  %v5398_v12 = vld [vmem:[%s7263_s1 + $0x348] sm:$0xff]  }
  0x74   : > { %4854 = vmatpush3.bf16.msra.mxu1 %v5371_v59  ;;  %v5380_v59 = vld [vmem:[%s7263_s1 + $0x368] sm:$0xff]   ;;  %v1554_v34 = vrot.slane %v1552_v17, 2  ;;  %v1824_v8 = vsel %vm1802_vm2, %v1819_v10, %v1823_v57 }
  0x75   : > { %4931 = vmatprep.subr.bf16.mxu1 %v5378_v40  ;;  %4808 = vmatpush3.bf16.msra.mxu0 %v5369_v5  ;;  %v1511_v5 = vsel %vm1468_vm3, %v1484_v28, %v1510_v18  ;;  %v1814_v40 = vsel %vm1802_vm2, %v1809_v13, %v1813_v61  ;;  %v5393_v28 = vld [vmem:[%s7263_s1 + $0x350] sm:$0xff]   ;;  %v6284_v20 = vld [vmem:[%s5706_s22 + $0x20] ss:$8 sps:$4 sm:$0xff]  }
  0x76   : > { %4885 = vmatprep.subr.bf16.mxu0 %v5374_v19  ;;  %1113 = vmatmul.mubr.bf16.gmra.mxu0 %v939_v50  ;;  %v1538_v19 = vsel %vm1468_vm3, %v1519_v53, %v1537_v35  ;;  %v1561_v53 = vshll.u32 %v6218_v49, 16  ;;  %v2364_v42 = vshll.u32 %v6284_v20, 16 }
  0x77   : > { %1412 = vmatmul.mubr.bf16.gmra.mxu1 %v1238_v52  ;;  %1713 = vmatprep.mubr.bf16.mxu0 %v1502_v33  ;;  %v1524_v52 = vrot.slane %v1522_v60, 1  ;;  %v6273_v60 = vcombine.high %v2014_v6, %v6262_v11 }
  0x78   : > { %1963 = vmatprep.mubr.bf16.mxu1 %v1808_v32  ;;  %v1551_v32 = vrot.slane %v1549_v22, 1 }
  0x79   : > { %v1528_v50 = vor.u32 %v1527_v43, %v1524_v52  ;;  %v2370_v22 = vshrl.u32 %v6273_v60, 16 }
  0x7a   : > { %v6226_v33 = vor.u32 %v1554_v34, %v1551_v32 }
  0x7b   : > { %v1529_v13 = vsel %vm1468_vm3, %v1510_v18, %v1528_v50  ;;  %v2372_v10 = vrot.slane %v2370_v22, 2  ;;  %v5431_v22 = vld [vmem:[%s7266_s4 + $0xe8] sm:$0xff]  }
  0x7e   : > { %1714 = vmatmul.mubr.bf16.vlgmr.msra.gmra.mxu0 %v1485_v3  ;;  %v5406_v3 = vld [vmem:[%s7263_s1 + $0x3c0] sm:$0xff]  }
  0x7f   : > { %1964 = vmatmul.mubr.bf16.vlgmr.msra.gmra.mxu1 %v1805_v21  ;;  %4886 = vmatpush3.bf16.msra.mxu0 %v5375_v1  ;;  %v5390_v21 = vld [vmem:[%s7263_s1 + $0x318] sm:$0xff]   ;;  %v1556_v1 = vsel %vm1468_vm3, %v1537_v35, %v6226_v33  ;;  %v2373_v35 = vshll.u32 %v6273_v60, 16 }
  0x80   : > { %1971 = vmatprep.mubr.bf16.mxu1 %v1812_v7  ;;  %4932 = vmatpush3.bf16.msra.mxu1 %v5379_v26  ;;  %v1542_v26 = vrot.slane %v1540_v25, 1  ;;  %v1545_v7 = vrot.slane %v1543_v27, 2  ;;  %v5405_v25 = vld [vmem:[%s7263_s1 + $0x300] sm:$0xff]  }
  0x81   : > { %4933 = vmatprep.subr.bf16.mxu1 %v5382_v44  ;;  %1721 = vmatprep.mubr.bf16.mxu0 %v1520_v9  ;;  %v1817_v44 = vrot.slane %v6034_v30, 2  ;;  %v5402_v30 = vld [vmem:[%s7263_s1 + $0x3c8] sm:$0xff]   ;;  %v1821_v9 = vrot.slane %v6218_v49, 2  ;;  %v6311_v49 = vld [vmem:[%s5706_s22 + $0x34] ss:$8 sps:$4 sm:$0xff]  }
  0x82   : > { %4887 = vmatprep.subr.bf16.mxu0 %v5376_v2  ;;  %v6249_v2 = vor.u32 %v1545_v7, %v1542_v26  ;;  %v2396_v26 = vshrl.u32 %v6311_v49, 16 }
  0x83   : > { %4888 = vmatpush3.bf16.msra.mxu0 %v5377_v38  ;;  %v1818_v54 = vsel %vm1802_vm2, %v1813_v61, %v1817_v44  ;;  %v6267_v38 = vrot.slane %v1558_v39, 1  ;;  %v5400_v61 = vld [vmem:[%s7263_s1 + $0x308] sm:$0xff]   ;;  %v1822_v17 = vsel %vm1802_vm2, %v1817_v44, %v1821_v9  ;;  %v2110_v9 = vrot.slane %v6311_v49, 2 }
  0x84   : > { %4934 = vmatpush3.bf16.msra.mxu1 %v5383_v62  ;;  %4889 = vmatprep.subr.bf16.mxu0 %v5380_v59  ;;  %v1569_v62 = vrot.slane %v1567_v55, 1  ;;  %v1547_v18 = vsel %vm1468_vm3, %v1528_v50, %v6249_v2  ;;  %v5420_v50 = vld [vmem:[%s7266_s4 + $0xf8] sm:$0xff]   ;;  %v2398_v57 = vrot.slane %v2396_v26, 2 }
  0x85   : > { %4935 = vmatprep.subr.bf16.mxu1 %v5386_v58  ;;  %v5395_v58 = vld [vmem:[%s7263_s1 + $0x310] sm:$0xff]  }
  0x86   : > { %1722 = vmatmul.mubr.bf16.gmra.mxu0 %v1511_v5  ;;  %v1573_v59 = vor.u32 %v1572_v63, %v1569_v62  ;;  %v6318_v55 = vld [vmem:[%s5706_s22 + $0x30] ss:$8 sps:$4 sm:$0xff]  }
  0x87   : > { %1972 = vmatmul.mubr.bf16.gmra.mxu1 %v1810_v4  ;;  %4890 = vmatpush3.bf16.msra.mxu0 %v5381_v14  ;;  %v6270_v4 = vcombine.low %v2014_v6, %v6262_v11  ;;  %v5404_v14 = vld [vmem:[%s7263_s1 + $0x340] sm:$0xff]   ;;  %v2390_v39 = vshll.u32 %v6318_v55, 16 }
  0x88   : > { %1979 = vmatprep.mubr.bf16.mxu1 %v1816_v41  ;;  %4936 = vmatpush3.bf16.msra.mxu1 %v5387_v15  ;;  %v6276_v15 = vld [vmem:[%s5706_s22 + $0x24] ss:$8 sps:$4 sm:$0xff]   ;;  %v1563_v41 = vrot.slane %v1561_v53, 2  ;;  %v1574_v43 = vsel %vm1468_vm3, %v6226_v33, %v1573_v59  ;;  %v2366_v33 = vrot.slane %v2364_v42, 3 }
  0x89   : > { %4937 = vmatprep.subr.bf16.mxu1 %v5389_v16  ;;  %1729 = vmatprep.mubr.bf16.mxu0 %v1538_v19  ;;  %v5407_v16 = vld [vmem:[%s7263_s1 + $0x380] sm:$0xff]   ;;  %v2378_v52 = vshrl.u32 %v6276_v15, 16  ;;  %v2353_v5 = vshrl.u32 %v6270_v4, 16  ;;  %v2356_v34 = vshll.u32 %v6270_v4, 16  ;;  %v2106_v56 = vrot.slane %v6276_v15, 2 }
  0x8a   : > { %4891 = vmatprep.subr.bf16.mxu0 %v5384_v31  ;;  %v2105_v31 = vrot.slane %v6273_v60, 2  ;;  %v5436_v42 = vld [vmem:[%s7266_s4 + $0xa0] sm:$0xff]  }
  0x8b   : > { %4892 = vmatpush3.bf16.msra.mxu0 %v5385_v51  ;;  %v2380_v32 = vrot.slane %v2378_v52, 2  ;;  %v2355_v27 = vrot.slane %v2353_v5, 2  ;;  %v1564_v51 = vor.u32 %v1563_v41, %v6267_v38  ;;  %v5414_v41 = vld [vmem:[%s7263_s1 + $0x438] sm:$0xff]   ;;  %v2111_v52 = vsel %vm1802_vm2, %v2106_v56, %v2110_v9 }
  0x8c   : > { %4938 = vmatpush3.bf16.msra.mxu1 %v5391_v29  ;;  %4893 = vmatprep.subr.bf16.mxu0 %v5388_v36  ;;  %v2381_v29 = vshll.u32 %v6276_v15, 16  ;;  %v2107_v62 = vsel %vm1802_vm2, %v2105_v31, %v2106_v56  ;;  %v5428_v56 = vld [vmem:[%s7263_s1 + $0x460] sm:$0xff]  }
  0x8d   : > { %4939 = vmatprep.subr.bf16.mxu1 %v5392_v37  ;;  %v2375_v37 = vrot.slane %v2373_v35, 3  ;;  %v1565_v53 = vsel %vm1468_vm3, %v6249_v2, %v1564_v51  ;;  %v2103_v2 = vrot.slane %v6284_v20, 2  ;;  %v5423_v51 = vld [vmem:[%s7263_s1 + $0x428] sm:$0xff]  }
  0x8e   : > { %1730 = vmatmul.mubr.bf16.gmra.mxu0 %v1529_v13  ;;  %v2383_v19 = vrot.slane %v2381_v29, 3  ;;  %v5421_v13 = vld [vmem:[%s7266_s4 + $0xb8] sm:$0xff]  }
  0x8f   : > { %1980 = vmatmul.mubr.bf16.gmra.mxu1 %v1814_v40  ;;  %4894 = vmatpush3.bf16.msra.mxu0 %v5390_v21  ;;  %v2376_v40 = vor.u32 %v2375_v37, %v2372_v10  ;;  %v5432_v10 = vld [vmem:[%s7266_s4 + $0xa8] sm:$0xff]  }
  0x90   : > { %1987 = vmatprep.mubr.bf16.mxu1 %v1820_v46  ;;  %4940 = vmatpush3.bf16.msra.mxu1 %v5394_v45  ;;  %v2361_v45 = vshrl.u32 %v6284_v20, 16  ;;  %v2384_v46 = vor.u32 %v2383_v19, %v2380_v32  ;;  %v5416_v32 = vld [vmem:[%s7263_s1 + $0x430] sm:$0xff]   ;;  %v2108_v19 = vrot.slane %v6318_v55, 2 }
  0x91   : > { %4941 = vmatprep.subr.bf16.mxu1 %v5396_v47  ;;  %1737 = vmatprep.mubr.bf16.mxu0 %v1556_v1  ;;  %v2358_v47 = vrot.slane %v2356_v34, 3 }
  0x92   : > { %4895 = vmatprep.subr.bf16.mxu0 %v5393_v28  ;;  %v2363_v36 = vrot.slane %v2361_v45, 2  ;;  %v2385_v21 = vsel %vm2351_vm4, %v2376_v40, %v2384_v46  ;;  %v2387_v28 = vshrl.u32 %v6318_v55, 16 }
  0x93   : > { %4896 = vmatpush3.bf16.msra.mxu0 %v5395_v58  ;;  %v2359_v7 = vor.u32 %v2358_v47, %v2355_v27  ;;  %v2102_v58 = vrot.slane %v6270_v4, 2  ;;  %v5425_v4 = vld [vmem:[%s7266_s4 + $0xb0] sm:$0xff]   ;;  %v2023_v27 = vld [vmem:[%s5706_s22 + $0x58] sm:$0xff] }
  0x94   : > { %4942 = vmatpush3.bf16.msra.mxu1 %v5397_v24  ;;  %4897 = vmatprep.subr.bf16.mxu0 %v5398_v12  ;;  %v2367_v44 = vor.u32 %v2366_v33, %v2363_v36  ;;  %v2399_v24 = vshll.u32 %v6311_v49, 16  ;;  %v2389_v63 = vrot.slane %v2387_v28, 2  ;;  %v6344_v12 = vld [vmem:[%s5706_s22 + $0x40] ss:$8 sps:$4 sm:$0xff]   ;;  %v6388_v47 = vcombine.low %v6018_v23, %v2023_v27 }
  0x95   : > { %4943 = vmatprep.subr.bf16.mxu1 %v5402_v30  ;;  %v2104_v35 = vsel %vm1802_vm2, %v2102_v58, %v2103_v2  ;;  %v5444_v58 = vld [vmem:[%s7266_s4 + $0x90] sm:$0xff]  }
  0x96   : > { %1738 = vmatmul.mubr.bf16.gmra.mxu0 %v1547_v18  ;;  %v2401_v30 = vrot.slane %v2399_v24, 3  ;;  %v2368_v1 = vsel %vm2351_vm4, %v2359_v7, %v2367_v44  ;;  %v2408_v18 = vshll.u32 %v6344_v12, 16  ;;  %v2426_v26 = vshll.u32 %v6388_v47, 16  ;;  %v5441_v7 = vld [vmem:[%s7266_s4 + $0x98] sm:$0xff]   ;;  %v5430_v24 = vld [vmem:[%s7263_s1 + $0x420] sm:$0xff]  }
  0x97   : > { %1988 = vmatmul.mubr.bf16.gmra.mxu1 %v1818_v54  ;;  %1745 = vmatprep.mubr.bf16.mxu0 %v1574_v43  ;;  %v5434_v43 = vld [vmem:[%s7266_s4 + $0xe0] sm:$0xff]  }
  0x98   : > { %1995 = vmatprep.mubr.bf16.mxu1 %v1824_v8  ;;  %4944 = vmatpush3.bf16.msra.mxu1 %v5403_v0  ;;  %v2392_v0 = vrot.slane %v2390_v39, 3  ;;  %v2402_v54 = vor.u32 %v2401_v30, %v2398_v57  ;;  %v6340_v8 = vld [vmem:[%s5706_s22 + $0x44] ss:$8 sps:$4 sm:$0xff]   ;;  %v2410_v31 = vrot.slane %v2408_v18, 3  ;;  %v2112_v30 = vrot.slane %v6344_v12, 2  ;;  %v5440_v18 = vld [vmem:[%s7263_s1 + $0x450] sm:$0xff]  }
  0x99   : > { %4945 = vmatprep.subr.bf16.mxu1 %v5406_v3  ;;  %4898 = vmatpush3.bf16.msra.mxu0 %v5400_v61  ;;  %v5424_v3 = vld [vmem:[%s7266_s4 + $0xf0] sm:$0xff]   ;;  %v2414_v60 = vshrl.u32 %v6340_v8, 16  ;;  %v2417_v59 = vshll.u32 %v6340_v8, 16  ;;  %v2114_v40 = vrot.slane %v6340_v8, 2 }
  0x9a   : > { %4899 = vmatprep.subr.bf16.mxu0 %v5404_v14  ;;  %v2403_v6 = vsel %vm2351_vm4, %v2384_v46, %v2402_v54  ;;  %v2393_v38 = vor.u32 %v2392_v0, %v2389_v63  ;;  %v5415_v14 = vld [vmem:[%s7263_s1 + $0x470] sm:$0xff]   ;;  %v6385_v46 = vcombine.high %v6018_v23, %v2023_v27  ;;  %v5433_v63 = vld [vmem:[%s7263_s1 + $0x458] sm:$0xff]   ;;  %v5455_v27 = vld [vmem:[%s7266_s4 + $0xc0] sm:$0xff]  }
  0x9b   : > { %v2416_v61 = vrot.slane %v2414_v60, 2  ;;  %v2115_v23 = vsel %vm1802_vm2, %v2110_v9, %v2114_v40 }
  0x9c   : > { %4946 = vmatpush3.bf16.msra.mxu1 %v5407_v16  ;;  %v2405_v16 = vshrl.u32 %v6344_v12, 16  ;;  %v2394_v37 = vsel %vm2351_vm4, %v2367_v44, %v2393_v38  ;;  %v2432_v36 = vshrl.u32 %v6385_v46, 16  ;;  %v2435_v33 = vshll.u32 %v6385_v46, 16 }
  0x9d   : > { %5023 = vmatprep.subr.bf16.mxu1 %v5420_v50  ;;  %4900 = vmatpush3.bf16.msra.mxu0 %v5405_v25  ;;  %v5422_v25 = vld [vmem:[%s7263_s1 + $0x468] sm:$0xff]   ;;  %v2109_v50 = vsel %vm1802_vm2, %v2103_v2, %v2108_v19  ;;  %v2118_v0 = vrot.slane %v6385_v46, 2  ;;  %v2024_v2 = vld [vmem:[%s5706_s22 + $0x60] sm:$0x33] }
  0x9e   : > { %4977 = vmatprep.subr.bf16.mxu0 %v5413_v48  ;;  %1746 = vmatmul.mubr.bf16.gmra.mxu0 %v1565_v53  ;;  %v2407_v29 = vrot.slane %v2405_v16, 2  ;;  %v5439_v48 = vld [vmem:[%s7266_s4 + $0xd8] sm:$0xff]   ;;  %v2434_v28 = vrot.slane %v2432_v36, 2  ;;  %v2437_v57 = vrot.slane %v2435_v33, 3  ;;  %v2428_v53 = vrot.slane %v2426_v26, 3  ;;  %v6484_v33 = vld [vmem:[%s6463_s11 + $0x10] sm:$0xff] }
  0x9f   : > { %1996 = vmatmul.mubr.bf16.gmra.mxu1 %v1822_v17  ;;  %2262 = vmatprep.mubr.bf16.mxu0 %v2107_v62  ;;  %v2419_v17 = vrot.slane %v2417_v59, 3  ;;  %v5443_v62 = vld [vmem:[%s7266_s4 + $0xd0] sm:$0xff]   ;;  %v4463_v9 = vcombine.high %v2024_v2, %v2024_v2  ;;  %v5451_v59 = vld [vmem:[%s7266_s4 + $0xc8] sm:$0xff]   ;;  %v2116_v16 = vrot.slane %v6388_v47, 2 }
  0xa0   : > { %2596 = vmatprep.mubr.bf16.mxu1 %v2385_v21  ;;  %v2411_v45 = vor.u32 %v2410_v31, %v2407_v29  ;;  %v2423_v21 = vshrl.u32 %v6388_v47, 16  ;;  %v5452_v31 = vld [vmem:[%s7266_s4 + $0x88] sm:$0xff]  }
  0xa1   : > { %v2420_v5 = vor.u32 %v2419_v17, %v2416_v61  ;;  %v5442_v17 = vld [vmem:[%s7263_s1 + $0x410] sm:$0xff]   ;;  %v6494_v26 = vld [vmem:[%s6463_s11 + $0x4] ss:$8 sps:$4 sm:$0xff]  }
  0xa2   : > { %v2412_v44 = vsel %vm2351_vm4, %v2393_v38, %v2411_v45  ;;  %v2425_v39 = vrot.slane %v2423_v21, 2  ;;  %v6491_v21 = vld [vmem:[%s6463_s11] ss:$8 sps:$4 sm:$0xff]  }
  0xa3   : > { %v2421_v34 = vsel %vm2351_vm4, %v2402_v54, %v2420_v5 }
  0xa4   : > { %v6421_v54 = vor.u32 %v2428_v53, %v2425_v39  ;;  %v2690_v39 = vrot.slane %v6276_v15, 3  ;;  %v3087_v53 = vshrl.u32 %v6494_v26, 16  ;;  %v5467_v15 = vld [vmem:[%s7266_s4 + $0x30] sm:$0xff]  }
  0xa6   : > { %2263 = vmatmul.mubr.bf16.vlgmr.msra.gmra.mxu0 %v2104_v35  ;;  %v2430_v61 = vsel %vm2351_vm4, %v2411_v45, %v6421_v54 }
  0xa7   : > { %2597 = vmatmul.mubr.bf16.vlgmr.msra.gmra.mxu1 %v2368_v1  ;;  %4978 = vmatpush3.bf16.msra.mxu0 %v5414_v41  ;;  %v2119_v41 = vsel %vm1802_vm2, %v2114_v40, %v2118_v0 }
  0xa8   : > { %2604 = vmatprep.mubr.bf16.mxu1 %v2403_v6  ;;  %5024 = vmatpush3.bf16.msra.mxu1 %v5421_v13  ;;  %v2438_v13 = vor.u32 %v2437_v57, %v2434_v28  ;;  %v5435_v6 = vld [vmem:[%s7263_s1 + $0x418] sm:$0xff]   ;;  %v5454_v57 = vld [vmem:[%s7263_s1 + $0x400] sm:$0xff]  }
  0xa9   : > { %5025 = vmatprep.subr.bf16.mxu1 %v5424_v3  ;;  %2270 = vmatprep.mubr.bf16.mxu0 %v2111_v52  ;;  %v2313_v3 = vld [vmem:[%s5706_s22 + $0x60] sm:$0x77] }
  0xaa   : > { %4979 = vmatprep.subr.bf16.mxu0 %v5415_v14  ;;  %v2439_v1 = vsel %vm2351_vm4, %v2420_v5, %v2438_v13  ;;  %v6431_v38 = vcombine.high %v2313_v3, %v2313_v3  ;;  %v6434_v60 = vcombine.low %v2313_v3, %v2313_v3  ;;  %v2122_v14 = vrot.slane %v4463_v9, 2 }
  0xab   : > { %4980 = vmatpush3.bf16.msra.mxu0 %v5416_v32  ;;  %v5445_v32 = vld [vmem:[%s7263_s1 + $0x448] sm:$0xff]  }
  0xac   : > { %5026 = vmatpush3.bf16.msra.mxu1 %v5425_v4  ;;  %4981 = vmatprep.subr.bf16.mxu0 %v5422_v25  ;;  %v2113_v4 = vsel %vm1802_vm2, %v2108_v19, %v2112_v30  ;;  %v2453_v35 = vshll.u32 %v6431_v38, 16  ;;  %v2441_v52 = vshrl.u32 %v6434_v60, 16  ;;  %v2444_v29 = vshll.u32 %v6434_v60, 16 }
  0xad   : > { %5027 = vmatprep.subr.bf16.mxu1 %v5431_v22  ;;  %v2450_v22 = vshrl.u32 %v6431_v38, 16  ;;  %v4462_v25 = vcombine.low %v2024_v2, %v2024_v2  ;;  %v2123_v36 = vsel %vm1802_vm2, %v2118_v0, %v2122_v14  ;;  %v5464_v2 = vld [vmem:[%s7266_s4 + $0x78] sm:$0xff]  }
  0xae   : > { %2271 = vmatmul.mubr.bf16.gmra.mxu0 %v2109_v50  ;;  %v2443_v5 = vrot.slane %v2441_v52, 2  ;;  %v2647_v50 = vld [vmem:[%s5706_s22 + $0x10] sm:$0x88]  ;;  %v5470_v14 = vld [vmem:[%s7266_s4 + $0x178] sm:$0xff]  }
  0xaf   : > { %2605 = vmatmul.mubr.bf16.gmra.mxu1 %v2394_v37  ;;  %4982 = vmatpush3.bf16.msra.mxu0 %v5423_v51  ;;  %v2455_v37 = vrot.slane %v2453_v35, 3  ;;  %v2117_v51 = vsel %vm1802_vm2, %v2112_v30, %v2116_v16  ;;  %v3089_v30 = vshll.u32 %v6494_v26, 16  ;;  %v4498_v35 = vcombine.low %v2647_v50, %v6262_v11 }
  0xb0   : > { %2612 = vmatprep.mubr.bf16.mxu1 %v2421_v34  ;;  %5028 = vmatpush3.bf16.msra.mxu1 %v5432_v10  ;;  %v2452_v10 = vrot.slane %v2450_v22, 2  ;;  %v5448_v34 = vld [vmem:[%s7263_s1 + $0x408] sm:$0xff]  }
  0xb1   : > { %5029 = vmatprep.subr.bf16.mxu1 %v5434_v43  ;;  %2278 = vmatprep.mubr.bf16.mxu0 %v2115_v23  ;;  %v2446_v43 = vrot.slane %v2444_v29, 3  ;;  %v6487_v23 = vld [vmem:[%s6463_s11 + $0x18] sm:$0xff] }
  0xb2   : > { %4983 = vmatprep.subr.bf16.mxu0 %v5428_v56  ;;  %v2456_v19 = vor.u32 %v2455_v37, %v2452_v10  ;;  %v4499_v56 = vcombine.high %v2647_v50, %v6262_v11  ;;  %v2694_v11 = vrot.slane %v6311_v49, 3  ;;  %v5479_v49 = vld [vmem:[%s7266_s4 + $0x20] sm:$0xff]  }
  0xb3   : > { %4984 = vmatpush3.bf16.msra.mxu0 %v5430_v24  ;;  %v2447_v40 = vor.u32 %v2446_v43, %v2443_v5  ;;  %v2120_v24 = vrot.slane %v4462_v25, 2  ;;  %v5474_v25 = vld [vmem:[%s7266_s4 + $0x170] sm:$0xff]  }
  0xb4   : > { %5030 = vmatpush3.bf16.msra.mxu1 %v5436_v42  ;;  %4985 = vmatprep.subr.bf16.mxu0 %v5433_v63  ;;  %v2457_v45 = vsel %vm2351_vm4, %v2438_v13, %v2456_v19  ;;  %v5453_v42 = vld [vmem:[%s7263_s1 + $0x440] sm:$0xff]   ;;  %v3077_v63 = vshll.u32 %v6491_v21, 16  ;;  %v2686_v19 = vrot.slane %v4498_v35, 3 }
  0xb5   : > { %5031 = vmatprep.subr.bf16.mxu1 %v5439_v48  ;;  %v5456_v48 = vld [vmem:[%s7266_s4 + $0x80] sm:$0xff]   ;;  %v2448_v28 = vsel %vm2351_vm4, %v6421_v54, %v2447_v40  ;;  %v3091_v54 = vrot.slane %v3089_v30, 1  ;;  %v2121_v9 = vsel %vm1802_vm2, %v2116_v16, %v2120_v24  ;;  %v5475_v40 = vld [vmem:[%s7266_s4 + $0x130] sm:$0xff]  }
  0xb6   : > { %2279 = vmatmul.mubr.bf16.gmra.mxu0 %v2113_v4  ;;  %v3079_v3 = vrot.slane %v3077_v63, 1 }
  0xb7   : > { %2613 = vmatmul.mubr.bf16.gmra.mxu1 %v2412_v44  ;;  %4986 = vmatpush3.bf16.msra.mxu0 %v5435_v6  ;;  %v6502_v44 = vcombine.high %v6484_v33, %v6487_v23  ;;  %v3092_v4 = vor.u32 %v3091_v54, %v3087_v53  ;;  %v5466_v53 = vld [vmem:[%s7266_s4 + $0x70] sm:$0xff]   ;;  %v5481_v54 = vld [vmem:[%s7266_s4 + $0x128] sm:$0xff]  }
  0xb8   : > { %5032 = vmatpush3.bf16.msra.mxu1 %v5441_v7  ;;  %2620 = vmatprep.mubr.bf16.mxu1 %v2439_v1  ;;  %v6498_v7 = vcombine.low %v6484_v33, %v6487_v23  ;;  %v2689_v1 = vrot.slane %v4499_v56, 3  ;;  %v2692_v56 = vrot.slane %v6318_v55, 3  ;;  %v5499_v55 = vld [vmem:[%s7266_s4 + $0x108] sm:$0xff]  }
  0xb9   : > { %5033 = vmatprep.subr.bf16.mxu1 %v5443_v62  ;;  %2286 = vmatprep.mubr.bf16.mxu0 %v2119_v41  ;;  %v3094_v13 = vshll.u32 %v6502_v44, 16  ;;  %v3075_v62 = vshrl.u32 %v6491_v21, 16  ;;  %v6524_v41 = vld [vmem:[%s6463_s11 + $0x20] sm:$0xff]  ;;  %v3106_v22 = vshrl.u32 %v6502_v44, 16 }
  0xba   : > { %4987 = vmatprep.subr.bf16.mxu0 %v5440_v18  ;;  %v3082_v0 = vshll.u32 %v6498_v7, 16  ;;  %v6527_v18 = vld [vmem:[%s6463_s11 + $0x28] sm:$0xff]  ;;  %v2691_v52 = vsel %vm2685_vm5, %v2689_v1, %v2690_v39 }
  0xbb   : > { %4988 = vmatpush3.bf16.msra.mxu0 %v5442_v17  ;;  %v6533_v17 = vcombine.high %v6524_v41, %v6527_v18  ;;  %v6537_v16 = vcombine.low %v6524_v41, %v6527_v18  ;;  %v5480_v1 = vld [vmem:[%s7266_s4 + $0x168] sm:$0xff]  }
  0xbc   : > { %5034 = vmatpush3.bf16.msra.mxu1 %v5444_v58  ;;  %4989 = vmatprep.subr.bf16.mxu0 %v5445_v32  ;;  %v3096_v58 = vrot.slane %v3094_v13, 1  ;;  %v3084_v6 = vrot.slane %v3082_v0, 1  ;;  %v5471_v32 = vld [vmem:[%s7266_s4 + $0x138] sm:$0xff]   ;;  %v2695_v13 = vsel %vm2685_vm5, %v2690_v39, %v2694_v11  ;;  %v2698_v39 = vrot.slane %v6340_v8, 3 }
  0xbd   : > { %5035 = vmatprep.subr.bf16.mxu1 %v5451_v59  ;;  %v2687_v59 = vrot.slane %v6284_v20, 3  ;;  %v3110_v5 = vshll.u32 %v6533_v17, 16  ;;  %v3102_v43 = vshll.u32 %v6537_v16, 16  ;;  %v3114_v30 = vshrl.u32 %v6537_v16, 16 }
  0xbe   : > { %2287 = vmatmul.mubr.bf16.gmra.mxu0 %v2117_v51  ;;  %v3097_v29 = vsel %vm434_vm0, %v3092_v4, %v3096_v58  ;;  %v3108_v37 = vor.u32 %v3106_v22, %v3096_v58  ;;  %v6566_v51 = vld [vmem:[%s6463_s11 + $0x38] sm:$0xff]  ;;  %v5473_v22 = vld [vmem:[%s7266_s4 + $0x28] sm:$0xff]   ;;  %v2700_v8 = vrot.slane %v6388_v47, 3 }
  0xbf   : > { %2621 = vmatmul.mubr.bf16.gmra.mxu1 %v2430_v61  ;;  %2294 = vmatprep.mubr.bf16.mxu0 %v2123_v36  ;;  %v3080_v61 = vor.u32 %v3079_v3, %v3075_v62  ;;  %v3104_v50 = vrot.slane %v3102_v43, 1  ;;  %v5465_v36 = vld [vmem:[%s7266_s4 + $0x38] sm:$0xff]   ;;  %v5483_v3 = vld [vmem:[%s7266_s4 + $0x160] sm:$0xff]   ;;  %v5494_v47 = vld [vmem:[%s7266_s4 + $0x48] sm:$0xff]  }
  0xc0   : > { %5036 = vmatpush3.bf16.msra.mxu1 %v5452_v31  ;;  %2628 = vmatprep.mubr.bf16.mxu1 %v2457_v45  ;;  %v3098_v31 = vshrl.u32 %v6498_v7, 16  ;;  %v3122_v45 = vshrl.u32 %v6533_v17, 16  ;;  %v5477_v43 = vld [vmem:[%s7266_s4 + $0x60] sm:$0xff]  }
  0xc1   : > { %5037 = vmatprep.subr.bf16.mxu1 %v5455_v27  ;;  %4990 = vmatpush3.bf16.msra.mxu0 %v5448_v34  ;;  %v3085_v10 = vsel %vm434_vm0, %v3080_v61, %v3084_v6  ;;  %v3112_v34 = vrot.slane %v3110_v5, 1  ;;  %v6561_v27 = vld [vmem:[%s6463_s11 + $0x30] sm:$0xff]  ;;  %v3116_v35 = vor.u32 %v3114_v30, %v3104_v50  ;;  %v2693_v5 = vsel %vm2685_vm5, %v2687_v59, %v2692_v56 }
  0xc2   : > { %4991 = vmatprep.subr.bf16.mxu0 %v5453_v42  ;;  %v6574_v24 = vcombine.high %v6561_v27, %v6566_v51 }
  0xc3   : > { %v3113_v42 = vsel %vm434_vm0, %v3108_v37, %v3112_v34  ;;  %v3124_v62 = vor.u32 %v3122_v45, %v3112_v34  ;;  %v5488_v37 = vld [vmem:[%s7266_s4 + $0x158] sm:$0xff]  }
  0xc4   : > { %5038 = vmatpush3.bf16.msra.mxu1 %v5456_v48  ;;  %v3100_v48 = vor.u32 %v3098_v31, %v3084_v6  ;;  %v3126_v63 = vshll.u32 %v6574_v24, 16  ;;  %v5472_v6 = vld [vmem:[%s7266_s4 + $0x68] sm:$0xff]   ;;  %v3138_v4 = vshrl.u32 %v6574_v24, 16  ;;  %v5490_v45 = vld [vmem:[%s7266_s4 + $0x118] sm:$0xff]  }
  0xc5   : > { %4992 = vmatpush3.bf16.msra.mxu0 %v5454_v57  ;;  %5115 = vmatprep.subr.bf16.mxu1 %v5470_v14  ;;  %v2688_v57 = vsel %vm2685_vm5, %v2686_v19, %v2687_v59  ;;  %v5485_v14 = vld [vmem:[%s7266_s4 + $0x120] sm:$0xff]   ;;  %v2699_v19 = vsel %vm2685_vm5, %v2694_v11, %v2698_v39  ;;  %v2702_v11 = vrot.slane %v6385_v46, 3  ;;  %v6748_v46 = vcombine.high %v6527_v18, %v6561_v27 }
  0xc6   : > { %5069 = vmatprep.subr.bf16.mxu0 %v5464_v2  ;;  %2295 = vmatmul.mubr.bf16.gmra.mxu0 %v2121_v9  ;;  %v3105_v58 = vsel %vm434_vm0, %v3100_v48, %v3104_v50  ;;  %v3128_v2 = vrot.slane %v3126_v63, 1  ;;  %v5492_v48 = vld [vmem:[%s7266_s4 + $0x150] sm:$0xff]   ;;  %v5482_v50 = vld [vmem:[%s7266_s4 + $0x58] sm:$0xff]  }
  0xc7   : > { %2629 = vmatmul.mubr.bf16.gmra.mxu1 %v2448_v28  ;;  %2846 = vmatprep.mubr.bf16.mxu0 %v2691_v52  ;;  %v6578_v28 = vcombine.low %v6561_v27, %v6566_v51  ;;  %v6620_v52 = vld [vmem:[%s6463_s11 + $0x40] sm:$0xff]  ;;  %v2996_v63 = vld [vmem:[%s6463_s11 + $0x50] sm:$0x11] }
  0xc8   : > { %3300 = vmatprep.mubr.bf16.mxu1 %v3097_v29  ;;  %v3129_v9 = vsel %vm434_vm0, %v3124_v62, %v3128_v2  ;;  %v6623_v29 = vld [vmem:[%s6463_s11 + $0x48] sm:$0xff]  ;;  %v3140_v34 = vor.u32 %v3138_v4, %v3128_v2  ;;  %v5493_v62 = vld [vmem:[%s7266_s4 + $0x110] sm:$0xff]  }
  0xc9   : > { %v3118_v0 = vshll.u32 %v6578_v28, 16  ;;  %v6627_v31 = vcombine.high %v6620_v52, %v6623_v29  ;;  %v3130_v20 = vshrl.u32 %v6578_v28, 16  ;;  %v5498_v2 = vld [vmem:[%s7266_s4 + $0x148] sm:$0xff]  }
  0xcb   : > { %v3120_v61 = vrot.slane %v3118_v0, 1  ;;  %v5489_v0 = vld [vmem:[%s7266_s4 + $0x50] sm:$0xff]  }
  0xcd   : > { %v3121_v59 = vsel %vm434_vm0, %v3116_v35, %v3120_v61  ;;  %v3132_v30 = vor.u32 %v3130_v20, %v3120_v61  ;;  %v5502_v35 = vld [vmem:[%s7266_s4 + $0x140] sm:$0xff]   ;;  %v6706_v61 = vcombine.high %v6487_v23, %v6524_v41 }
  0xce   : > { %2847 = vmatmul.mubr.bf16.vlgmr.msra.gmra.mxu0 %v2688_v57  ;;  %v3154_v57 = vshrl.u32 %v6627_v31, 16 }
  0xcf   : > { %3301 = vmatmul.mubr.bf16.vlgmr.msra.gmra.mxu1 %v3085_v10  ;;  %5070 = vmatpush3.bf16.msra.mxu0 %v5465_v36  ;;  %v6631_v10 = vcombine.low %v6620_v52, %v6623_v29  ;;  %v3612_v20 = vrot.slane %v6706_v61, 1 }
  0xd0   : > { %5116 = vmatpush3.bf16.msra.mxu1 %v5471_v32  ;;  %3308 = vmatprep.mubr.bf16.mxu1 %v3113_v42  ;;  %v2696_v32 = vrot.slane %v6344_v12, 3 }
  0xd1   : > { %5117 = vmatprep.subr.bf16.mxu1 %v5474_v25  ;;  %2854 = vmatprep.mubr.bf16.mxu0 %v2695_v13  ;;  %v3142_v25 = vshll.u32 %v6627_v31, 16 }
  0xd2   : > { %5071 = vmatprep.subr.bf16.mxu0 %v5466_v53  ;;  %v5484_v53 = vld [vmem:[%s7266_s4 + $0x18] sm:$0xff]  }
  0xd3   : > { %5072 = vmatpush3.bf16.msra.mxu0 %v5467_v15  ;;  %v3144_v42 = vrot.slane %v3142_v25, 1  ;;  %v2703_v15 = vsel %vm2685_vm5, %v2698_v39, %v2702_v11  ;;  %v5491_v39 = vld [vmem:[%s7266_s4 + $0x10] sm:$0xff]  }
  0xd4   : > { %5118 = vmatpush3.bf16.msra.mxu1 %v5475_v40  ;;  %5073 = vmatprep.subr.bf16.mxu0 %v5472_v6  ;;  %v3134_v40 = vshll.u32 %v6631_v10, 16 }
  0xd5   : > { %5119 = vmatprep.subr.bf16.mxu1 %v5480_v1  ;;  %v3145_v36 = vsel %vm434_vm0, %v3140_v34, %v3144_v42  ;;  %v4528_v1 = vcombine.high %v2996_v63, %v2996_v63  ;;  %v5503_v34 = vld [vmem:[%s7266_s4 + $0x100] sm:$0xff]  }
  0xd6   : > { %2855 = vmatmul.mubr.bf16.gmra.mxu0 %v2693_v5  ;;  %v3136_v13 = vrot.slane %v3134_v40, 1  ;;  %v3520_v5 = vld [vmem:[%s6463_s11 + $0x8] sm:$0xee] }
  0xd7   : > { %3309 = vmatmul.mubr.bf16.gmra.mxu1 %v3105_v58  ;;  %5074 = vmatpush3.bf16.msra.mxu0 %v5473_v22  ;;  %v2697_v58 = vsel %vm2685_vm5, %v2692_v56, %v2696_v32  ;;  %v3158_v6 = vshll.u32 %v4528_v1, 16  ;;  %v6718_v25 = vcombine.high %v3520_v5, %v6484_v33  ;;  %v5496_v40 = vld [vmem:[%s7266_s4 + $0x8] sm:$0xff]   ;;  %v6764_v1 = vcombine.low %v6527_v18, %v6561_v27 }
  0xd8   : > { %3316 = vmatprep.mubr.bf16.mxu1 %v3129_v9  ;;  %5120 = vmatpush3.bf16.msra.mxu1 %v5481_v54  ;;  %v4527_v54 = vcombine.low %v2996_v63, %v2996_v63  ;;  %v3146_v9 = vshrl.u32 %v6631_v10, 16  ;;  %v3137_v56 = vsel %vm434_vm0, %v3132_v30, %v3136_v13  ;;  %v3616_v30 = vrot.slane %v6748_v46, 1 }
  0xd9   : > { %5121 = vmatprep.subr.bf16.mxu1 %v5483_v3  ;;  %2862 = vmatprep.mubr.bf16.mxu0 %v2699_v19  ;;  %v3156_v3 = vor.u32 %v3154_v57, %v3144_v42  ;;  %v3160_v22 = vrot.slane %v3158_v6, 1  ;;  %v5500_v42 = vld [vmem:[%s7266_s4 + $0x40] sm:$0xff]  }
  0xda   : > { %5075 = vmatprep.subr.bf16.mxu0 %v5477_v43  ;;  %v3150_v4 = vshll.u32 %v4527_v54, 16  ;;  %v3148_v43 = vor.u32 %v3146_v9, %v3136_v13 }
  0xdb   : > { %5076 = vmatpush3.bf16.msra.mxu0 %v5479_v49 }
  0xdc   : > { %5122 = vmatpush3.bf16.msra.mxu1 %v5485_v14  ;;  %5077 = vmatprep.subr.bf16.mxu0 %v5482_v50  ;;  %v2706_v14 = vrot.slane %v6431_v38, 3  ;;  %v3152_v19 = vrot.slane %v3150_v4, 1  ;;  %v5508_v38 = vld [vmem:[%s7266_s4 + $0x1f8] sm:$0xff]   ;;  %v5511_v4 = vld [vmem:[%s7266_s4 + $0x1b0] sm:$0xff]  }
  0xdd   : > { %5123 = vmatprep.subr.bf16.mxu1 %v5488_v37  ;;  %v3161_v37 = vsel %vm434_vm0, %v3156_v3, %v3160_v22  ;;  %v6772_v3 = vcombine.high %v6566_v51, %v6620_v52 }
  0xde   : > { %2863 = vmatmul.mubr.bf16.gmra.mxu0 %v2697_v58  ;;  %v2707_v49 = vsel %vm2685_vm5, %v2702_v11, %v2706_v14  ;;  %v3153_v12 = vsel %vm434_vm0, %v3148_v43, %v3152_v19  ;;  %v5515_v19 = vld [vmem:[%s7266_s4 + $0x1a8] sm:$0xff]  }
  0xdf   : > { %3317 = vmatmul.mubr.bf16.gmra.mxu1 %v3121_v59  ;;  %5078 = vmatpush3.bf16.msra.mxu0 %v5484_v53  ;;  %v2701_v59 = vsel %vm2685_vm5, %v2696_v32, %v2700_v8  ;;  %v6739_v32 = vcombine.low %v3520_v5, %v6484_v33  ;;  %v5501_v33 = vld [vmem:[%s7266_s4] sm:$0xff]  }
  0xe0   : > { %3324 = vmatprep.mubr.bf16.mxu1 %v3145_v36  ;;  %5124 = vmatpush3.bf16.msra.mxu1 %v5490_v45  ;;  %v3611_v45 = vrot.slane %v6718_v25, 1  ;;  %v2704_v36 = vrot.slane %v6434_v60, 3 }
  0xe1   : > { %5125 = vmatprep.subr.bf16.mxu1 %v5492_v48  ;;  %2870 = vmatprep.mubr.bf16.mxu0 %v2703_v15  ;;  %v6743_v48 = vcombine.low %v6487_v23, %v6524_v41  ;;  %v3608_v41 = vrot.slane %v6739_v32, 1  ;;  %v5510_v15 = vld [vmem:[%s7266_s4 + $0x1f0] sm:$0xff]  }
  0xe2   : > { %5079 = vmatprep.subr.bf16.mxu0 %v5489_v0  ;;  %v3613_v50 = vsel %vm919_vm1, %v3611_v45, %v3612_v20  ;;  %v2705_v13 = vsel %vm2685_vm5, %v2700_v8, %v2704_v36  ;;  %v5509_v0 = vld [vmem:[%s7266_s4 + $0x1b8] sm:$0xff]  }
  0xe3   : > { %5080 = vmatpush3.bf16.msra.mxu0 %v5491_v39  ;;  %v3609_v57 = vrot.slane %v6743_v48, 1  ;;  %v3620_v39 = vrot.slane %v6772_v3, 1 }
  0xe4   : > { %5126 = vmatpush3.bf16.msra.mxu1 %v5493_v62  ;;  %5081 = vmatprep.subr.bf16.mxu0 %v5494_v47  ;;  %v3529_v47 = vld [vmem:[%s6463_s11 + $0x50] sm:$0xff] }
  0xe5   : > { %5127 = vmatprep.subr.bf16.mxu1 %v5498_v2  ;;  %v3610_v63 = vsel %vm919_vm1, %v3608_v41, %v3609_v57  ;;  %v3617_v2 = vsel %vm919_vm1, %v3612_v20, %v3616_v30  ;;  %v6800_v45 = vcombine.high %v6623_v29, %v3529_v47 }
  0xe6   : > { %2871 = vmatmul.mubr.bf16.gmra.mxu0 %v2701_v59  ;;  %v3621_v59 = vsel %vm919_vm1, %v3616_v30, %v3620_v39 }
  0xe7   : > { %3325 = vmatmul.mubr.bf16.gmra.mxu1 %v3137_v56  ;;  %2878 = vmatprep.mubr.bf16.mxu0 %v2707_v49 }
  0xe8   : > { %3332 = vmatprep.mubr.bf16.mxu1 %v3161_v37  ;;  %5128 = vmatpush3.bf16.msra.mxu1 %v5499_v55  ;;  %v3614_v55 = vrot.slane %v6764_v1, 1 }
  0xe9   : > { %5129 = vmatprep.subr.bf16.mxu1 %v5502_v35  ;;  %5082 = vmatpush3.bf16.msra.mxu0 %v5496_v40  ;;  %v5517_v40 = vld [vmem:[%s7266_s4 + $0x1e0] sm:$0xff]  }
  0xea   : > { %5083 = vmatprep.subr.bf16.mxu0 %v5500_v42  ;;  %v3615_v43 = vsel %vm919_vm1, %v3609_v57, %v3614_v55  ;;  %v6816_v57 = vld [vmem:[%s6463_s11 + $0x58] sm:$0x11] }
  0xec   : > { %5130 = vmatpush3.bf16.msra.mxu1 %v5503_v34  ;;  %v6792_v34 = vcombine.low %v6566_v51, %v6620_v52 }
  0xed   : > { %5207 = vmatprep.subr.bf16.mxu1 %v5508_v38  ;;  %5084 = vmatpush3.bf16.msra.mxu0 %v5501_v33  ;;  %v3624_v33 = vrot.slane %v6800_v45, 1 }
  0xee   : > { %5161 = vmatprep.subr.bf16.mxu0 %v5508_v38  ;;  %v4625_v54 = vpop.f32.mrf.mxu0  ;;  %2879 = vmatmul.mubr.bf16.gmra.mxu0 %v2705_v13 }
  0xef   : > { %v4671_v11 = vpop.f32.mrf.mxu1  ;;  %3333 = vmatmul.mubr.bf16.gmra.mxu1 %v3153_v12  ;;  %3479 = vmatprep.mubr.bf16.mxu0 %v6494_v26  ;;  %v5514_v26 = vld [vmem:[%s7266_s4 + $0x1e8] sm:$0xff]   ;;  %v3618_v12 = vrot.slane %v6792_v34, 1 }
  0xf0   : > { %3768 = vmatprep.mubr.bf16.mxu1 %v3613_v50  ;;  %v4626_v9 = vpop.f32.mrf.mxu0  ;;  %v5519_v50 = vld [vmem:[%s7266_s4 + $0x1a0] sm:$0xff]  }
  0xf1   : > { %v4672_v23 = vpop.f32.mrf.mxu1  ;;  %v4627_v18 = vadd.f32 %v4626_v9, %v4625_v54  ;;  %v3919_v9 = vshrl.u32 %v6772_v3, 16 }
  0xf2   : > { %v4673_v53 = vadd.f32 %v4672_v23, %v4671_v11  ;;  %v4628_v56 = vpop.f32.mrf.mxu0 }
  0xf3   : > { %v4674_v62 = vpop.f32.mrf.mxu1 }
  0xf4   : > { %v6783_v22 = vadd.f32 %v4673_v53, %v4627_v18  ;;  %v4629_v14 = vpop.f32.mrf.mxu0 }
  0xf5   : > { %v4675_v60 = vpop.f32.mrf.mxu1  ;;  %v4630_v37 = vadd.f32 %v4629_v14, %v4628_v56  ;;  %v3937_v56 = vshrl.u32 %v6800_v45, 16 }
  0xf6   : > { %v4676_v58 = vadd.f32 %v4675_v60, %v4674_v62  ;;  %v4631_v20 = vpop.f32.mrf.mxu0  ;;  %3480 = vmatmul.mubr.bf16.vlgmr.msra.gmra.mxu0 %v6491_v21  ;;  %v3619_v62 = vsel %vm919_vm1, %v3614_v55, %v3618_v12  ;;  %v5521_v60 = vld [vmem:[%s7266_s4 + $0x198] sm:$0xff]   ;;  %v6844_v55 = vld [vmem:[%s7266_s4 + $0x190] sm:$0xff]  }
  0xf7   : > { %v4677_v6 = vpop.f32.mrf.mxu1  ;;  %3769 = vmatmul.mubr.bf16.vlgmr.msra.gmra.mxu1 %v3610_v63  ;;  %5162 = vmatpush3.bf16.msra.mxu0 %v5509_v0  ;;  %v6825_v63 = vcombine.low %v6623_v29, %v3529_v47  ;;  %v3940_v47 = vshll.u32 %v6800_v45, 16 }
  0xf8   : > { %3776 = vmatprep.mubr.bf16.mxu1 %v3617_v2  ;;  %5215 = vmatpush3.bf16.msra.mxu1 %v5509_v0  ;;  %v6802_v49 = vadd.f32 %v4676_v58, %v4630_v37  ;;  %v4632_v52 = vpop.f32.mrf.mxu0  ;;  %v3625_v58 = vsel %vm919_vm1, %v3620_v39, %v3624_v33  ;;  %v4572_v2 = vcombine.high %v6816_v57, %v6816_v57  ;;  %v6851_v39 = vld [vmem:[%s7266_s4 + $0x1c8] sm:$0xff]  }
  0xf9   : > { %v4678_v27 = vpop.f32.mrf.mxu1  ;;  %5208 = vmatprep.subr.bf16.mxu1 %v5510_v15  ;;  %3487 = vmatprep.mubr.bf16.mxu0 %v6502_v44  ;;  %v4633_v21 = vadd.f32 %v4632_v52, %v4631_v20  ;;  %v5520_v44 = vld [vmem:[%s7266_s4 + $0x1d8] sm:$0xff]   ;;  %v3875_v20 = vshrl.u32 %v6718_v25, 16 }
  0xfa   : > { %v4679_v8 = vadd.f32 %v4678_v27, %v4677_v6  ;;  %5163 = vmatprep.subr.bf16.mxu0 %v5510_v15  ;;  %v4634_v11 = vpop.f32.mrf.mxu0  ;;  %v5524_v15 = vld [vmem:[%s7266_s4 + $0x1d0] sm:$0xff]  }
  0xfb   : > { %v4680_v35 = vpop.f32.mrf.mxu1  ;;  %5164 = vmatpush3.bf16.msra.mxu0 %v5511_v4 }
  0xfc   : > { %5216 = vmatpush3.bf16.msra.mxu1 %v5511_v4  ;;  %v6813_v23 = vadd.f32 %v4679_v8, %v4633_v21  ;;  %v4635_v53 = vpop.f32.mrf.mxu0  ;;  %5165 = vmatprep.subr.bf16.mxu0 %v5514_v26  ;;  %v3622_v4 = vrot.slane %v6825_v63, 1 }
  0xfd   : > { %v4681_v5 = vpop.f32.mrf.mxu1  ;;  %5209 = vmatprep.subr.bf16.mxu1 %v5514_v26  ;;  %v4636_v30 = vadd.f32 %v4635_v53, %v4634_v11  ;;  %v3910_v53 = vshrl.u32 %v6792_v34, 16 }
  0xfe   : > { %v4682_v38 = vadd.f32 %v4681_v5, %v4680_v35  ;;  %v4637_v0 = vpop.f32.mrf.mxu0  ;;  %3488 = vmatmul.mubr.bf16.gmra.mxu0 %v6498_v7  ;;  %v3628_v35 = vrot.slane %v4572_v2, 1  ;;  %v3883_v5 = vshrl.u32 %v6706_v61, 16  ;;  %v3623_v21 = vsel %vm919_vm1, %v3618_v12, %v3622_v4  ;;  %v5530_v12 = vld [vmem:[%s7266_s4 + $0x1c0] sm:$0xff]  }
  0xff   : > { %v4683_v51 = vpop.f32.mrf.mxu1  ;;  %3777 = vmatmul.mubr.bf16.gmra.mxu1 %v3615_v43  ;;  %5166 = vmatpush3.bf16.msra.mxu0 %v5515_v19  ;;  %v6860_v43 = vld [vmem:[%s6463_s11 + $0x58] sm:$0x33] }
 0x100   : > { %3784 = vmatprep.mubr.bf16.mxu1 %v3621_v59  ;;  %5217 = vmatpush3.bf16.msra.mxu1 %v5515_v19  ;;  %v6836_v6 = vadd.f32 %v4682_v38, %v4636_v30  ;;  %v4638_v7 = vpop.f32.mrf.mxu0  ;;  %v3878_v38 = vshll.u32 %v6718_v25, 16  ;;  %v3886_v59 = vshll.u32 %v6706_v61, 16  ;;  %v3939_v25 = vrot.slane %v3937_v56, 1 }
 0x101   : > { %v4684_v42 = vpop.f32.mrf.mxu1  ;;  %5210 = vmatprep.subr.bf16.mxu1 %v5517_v40  ;;  %3495 = vmatprep.mubr.bf16.mxu0 %v6533_v17  ;;  %v4639_v18 = vadd.f32 %v4638_v7, %v4637_v0  ;;  %v3922_v17 = vshll.u32 %v6772_v3, 16  ;;  %v4571_v3 = vcombine.low %v6816_v57, %v6816_v57  ;;  %v3885_v0 = vrot.slane %v3883_v5, 1 }
 0x102   : > { %v4685_v36 = vadd.f32 %v4684_v42, %v4683_v51  ;;  %5167 = vmatprep.subr.bf16.mxu0 %v5517_v40  ;;  %v4640_v8 = vpop.f32.mrf.mxu0  ;;  %v3921_v40 = vrot.slane %v3919_v9, 1  ;;  %v6874_v42 = vld [vmem:[%s7266_s4 + $0x188] sm:$0xff]   ;;  %v3869_v5 = vshll.u32 %v6743_v48, 16 }
 0x103   : > { %v4686_v41 = vpop.f32.mrf.mxu1  ;;  %5168 = vmatpush3.bf16.msra.mxu0 %v5519_v50 }
 0x104   : > { %5218 = vmatpush3.bf16.msra.mxu1 %v5519_v50  ;;  %v6854_v14 = vadd.f32 %v4685_v36, %v4639_v18  ;;  %v4641_v19 = vpop.f32.mrf.mxu0  ;;  %5169 = vmatprep.subr.bf16.mxu0 %v5520_v44  ;;  %v3924_v50 = vrot.slane %v3922_v17, 2  ;;  %v3629_v36 = vsel %vm919_vm1, %v3624_v33, %v3628_v35  ;;  %v3626_v33 = vrot.slane %v4571_v3, 1 }
 0x105   : > { %v4687_v13 = vpop.f32.mrf.mxu1  ;;  %5211 = vmatprep.subr.bf16.mxu1 %v5520_v44  ;;  %v4642_v51 = vadd.f32 %v4641_v19, %v4640_v8  ;;  %v3942_v44 = vrot.slane %v3940_v47, 2  ;;  %v3858_v35 = vshrl.u32 %v6739_v32, 16  ;;  %v3861_v47 = vshll.u32 %v6739_v32, 16 }
 0x106   : > { %v4688_v54 = vadd.f32 %v4687_v13, %v4686_v41  ;;  %v4643_v11 = vpop.f32.mrf.mxu0  ;;  %3496 = vmatmul.mubr.bf16.gmra.mxu0 %v6537_v16  ;;  %v4590_v41 = vcombine.high %v6860_v43, %v6860_v43  ;;  %v3913_v16 = vshll.u32 %v6792_v34, 16  ;;  %v6891_v13 = vrot.slane %v3875_v20, 1 }
 0x107   : > { %v4689_v29 = vpop.f32.mrf.mxu1  ;;  %3785 = vmatmul.mubr.bf16.gmra.mxu1 %v3619_v62  ;;  %5170 = vmatpush3.bf16.msra.mxu0 %v5521_v60  ;;  %v6893_v62 = vrot.slane %v3878_v38, 2  ;;  %v6899_v34 = vor.u32 %v3924_v50, %v3921_v40  ;;  %v6903_v9 = vor.u32 %v3942_v44, %v3939_v25  ;;  %v3627_v8 = vsel %vm919_vm1, %v3622_v4, %v3626_v33 }
 0x108   : > { %3792 = vmatprep.mubr.bf16.mxu1 %v3625_v58  ;;  %5219 = vmatpush3.bf16.msra.mxu1 %v5521_v60  ;;  %v6886_v57 = vadd.f32 %v4688_v54, %v4642_v51  ;;  %v4644_v30 = vpop.f32.mrf.mxu0  ;;  %v3888_v58 = vrot.slane %v3886_v59, 2  ;;  %v3928_v60 = vshrl.u32 %v6825_v63, 16  ;;  %v3955_v18 = vshrl.u32 %v4590_v41, 16 }
 0x109   : > { %v4690_v27 = vpop.f32.mrf.mxu1  ;;  %5212 = vmatprep.subr.bf16.mxu1 %v5524_v15  ;;  %3503 = vmatprep.mubr.bf16.mxu0 %v6574_v24  ;;  %v4645_v54 = vadd.f32 %v4644_v30, %v4643_v11  ;;  %v5531_v24 = vld [vmem:[%s7266_s4 + $0x180] sm:$0xff]   ;;  %v3866_v3 = vshrl.u32 %v6743_v48, 16  ;;  %v3915_v19 = vrot.slane %v3913_v16, 2  ;;  %v4589_v4 = vcombine.low %v6860_v43, %v6860_v43 }
 0x10a   : > { %v4691_v26 = vadd.f32 %v4690_v27, %v4689_v29  ;;  %5171 = vmatprep.subr.bf16.mxu0 %v5524_v15  ;;  %v3931_v15 = vshll.u32 %v6825_v63, 16  ;;  %v4646_v29 = vpop.f32.mrf.mxu0  ;;  %v3958_v27 = vshll.u32 %v4590_v41, 16  ;;  %v3930_v38 = vrot.slane %v3928_v60, 1 }
 0x10b   : > { %v4692_v37 = vpop.f32.mrf.mxu1  ;;  %5172 = vmatpush3.bf16.msra.mxu0 %v6844_v55  ;;  %v3957_v40 = vrot.slane %v3955_v18, 1  ;;  %v3889_v43 = vor.u32 %v3888_v58, %v3885_v0  ;;  %v3901_v11 = vshrl.u32 %v6748_v46, 16  ;;  %v3946_v44 = vshrl.u32 %v4589_v4, 16 }
 0x10c   : > { %5220 = vmatpush3.bf16.msra.mxu1 %v6844_v55  ;;  %v6905_v17 = vadd.f32 %v4691_v26, %v4645_v54  ;;  %5173 = vmatprep.subr.bf16.mxu0 %v6851_v39  ;;  %v3912_v26 = vrot.slane %v3910_v53, 1  ;;  %v3933_v63 = vrot.slane %v3931_v15, 2  ;;  %v3960_v48 = vrot.slane %v3958_v27, 2 }
 0x10d   : > { %v4693_v52 = vpop.f32.mrf.mxu1  ;;  %5213 = vmatprep.subr.bf16.mxu1 %v6851_v39  ;;  %v3944_v39 = vsel %vm1468_vm3, %v6899_v34, %v6903_v9  ;;  %v3863_v16 = vrot.slane %v3861_v47, 2  ;;  %v3871_v33 = vrot.slane %v3869_v5, 2  ;;  %v3948_v15 = vrot.slane %v3946_v44, 1 }
 0x10e   : > { %v4694_v61 = vadd.f32 %v4693_v52, %v4692_v37  ;;  %v4647_v37 = vpop.f32.mrf.mxu0  ;;  %3504 = vmatmul.mubr.bf16.gmra.mxu0 %v6578_v28  ;;  %v3881_v52 = vor.u32 %v6893_v62, %v6891_v13  ;;  %v3860_v28 = vrot.slane %v3858_v35, 1  ;;  %v6928_v25 = vor.u32 %v3915_v19, %v3912_v26 }
 0x10f   : > { %v4695_v45 = vpop.f32.mrf.mxu1  ;;  %3793 = vmatmul.mubr.bf16.gmra.mxu1 %v3623_v21  ;;  %v4648_v20 = vadd.f32 %v4647_v37, %v4646_v29  ;;  %3511 = vmatprep.mubr.bf16.mxu0 %v6627_v31  ;;  %v3934_v31 = vor.u32 %v3933_v63, %v3930_v38  ;;  %v3961_v30 = vor.u32 %v3960_v48, %v3957_v40  ;;  %v3892_v47 = vshrl.u32 %v6764_v1, 16 }
 0x110   : > { %3800 = vmatprep.mubr.bf16.mxu1 %v3629_v36  ;;  %5221 = vmatpush3.bf16.msra.mxu1 %v6874_v42  ;;  %v4649_v59 = vpop.f32.mrf.mxu0  ;;  %v3890_v58 = vsel %vm1468_vm3, %v3881_v52, %v3889_v43  ;;  %v3895_v37 = vshll.u32 %v6764_v1, 16 }
 0x111   : > { %v4696_v2 = vpop.f32.mrf.mxu1  ;;  %5214 = vmatprep.subr.bf16.mxu1 %v5530_v12  ;;  %v6922_v51 = vadd.f32 %v4694_v61, %v4648_v20  ;;  %5174 = vmatpush3.bf16.msra.mxu0 %v6874_v42  ;;  %v3904_v61 = vshll.u32 %v6748_v46, 16  ;;  %v3949_v42 = vshll.u32 %v4589_v4, 16  ;;  %v3903_v46 = vrot.slane %v3901_v11, 1 }
 0x112   : > { %v4697_v7 = vadd.f32 %v4696_v2, %v4695_v45  ;;  %v4650_v21 = vpop.f32.mrf.mxu0  ;;  %5175 = vmatprep.subr.bf16.mxu0 %v5530_v12  ;;  %v3868_v45 = vrot.slane %v3866_v3, 1  ;;  %v3935_v60 = vsel %vm1468_vm3, %v6928_v25, %v3934_v31  ;;  %v3894_v4 = vrot.slane %v3892_v47, 1 }
 0x113   : > { %v4698_v56 = vpop.f32.mrf.mxu1  ;;  %v4651_v36 = vadd.f32 %v4650_v21, %v4649_v59  ;;  %v3906_v54 = vrot.slane %v3904_v61, 2  ;;  %v3951_v29 = vrot.slane %v3949_v42, 2  ;;  %v3897_v59 = vrot.slane %v3895_v37, 2 }
 0x114   : > { %5222 = vmatpush3.bf16.msra.mxu1 %v5531_v24  ;;  %v4652_v41 = vpop.f32.mrf.mxu0 }
 0x115   : > { %v4699_v55 = vpop.f32.mrf.mxu1  ;;  %v6932_v13 = vadd.f32 %v4697_v7, %v4651_v36  ;;  %5176 = vmatpush3.bf16.msra.mxu0 %v5531_v24  ;;  %v3864_v7 = vor.u32 %v3863_v16, %v3860_v28  ;;  %v3962_v24 = vsel %vm1468_vm3, %v6903_v9, %v3961_v30  ;;  %v3907_v26 = vor.u32 %v3906_v54, %v3903_v46 }
 0x116   : > { %v4700_v32 = vadd.f32 %v4699_v55, %v4698_v56  ;;  %v4653_v62 = vpop.f32.mrf.mxu0  ;;  %3512 = vmatmul.mubr.bf16.gmra.mxu0 %v6631_v10  ;;  %v3872_v56 = vor.u32 %v3871_v33, %v3868_v45  ;;  %v3952_v10 = vor.u32 %v3951_v29, %v3948_v15 }
 0x117   : > { %v4763_v50 = vpop.f32.mrf.mxu1  ;;  %3801 = vmatmul.mubr.bf16.gmra.mxu1 %v3627_v8  ;;  %v4654_v2 = vadd.f32 %v4653_v62, %v4652_v41  ;;  %4101 = vmatprep.mubr.bf16.mxu0 %v3890_v58  ;;  %v3908_v1 = vsel %vm1468_vm3, %v3889_v43, %v3907_v26 }
 0x118   : > { %4125 = vmatprep.mubr.bf16.mxu1 %v3944_v39  ;;  %v4717_v18 = vpop.f32.mrf.mxu0  ;;  %v3873_v55 = vsel %vm1468_vm3, %v3864_v7, %v3872_v56  ;;  %v3953_v52 = vsel %vm1468_vm3, %v3934_v31, %v3952_v10 }
 0x119   : > { %v4764_v53 = vpop.f32.mrf.mxu1  ;;  %v6940_v8 = vadd.f32 %v4700_v32, %v4654_v2 }
 0x11a   : > { %v4765_v12 = vadd.f32 %v4764_v53, %v4763_v50  ;;  %v4718_v3 = vpop.f32.mrf.mxu0 }
 0x11b   : > { %v4766_v0 = vpop.f32.mrf.mxu1  ;;  %v4719_v19 = vadd.f32 %v4718_v3, %v4717_v18 }
 0x11c   : > { %v4720_v20 = vpop.f32.mrf.mxu0 }
 0x11d   : > { %v4767_v27 = vpop.f32.mrf.mxu1  ;;  %v1121_v9 = vadd.f32 %v4719_v19, %v6783_v22  ;;  %v3898_v22 = vor.u32 %v3897_v59, %v3894_v4 }
 0x11e   : > { %v4768_v35 = vadd.f32 %v4767_v27, %v4766_v0  ;;  %v4721_v32 = vpop.f32.mrf.mxu0  ;;  %4102 = vmatmul.mubr.bf16.vlgmr.msra.gmra.mxu0 %v3873_v55 }
 0x11f   : > { %v4769_v5 = vpop.f32.mrf.mxu1  ;;  %4126 = vmatmul.mubr.bf16.vlgmr.msra.gmra.mxu1 %v3935_v60  ;;  %v6947_v40 = vadd.f32 %v4765_v12, %v1121_v9  ;;  %v4722_v48 = vadd.f32 %v4721_v32, %v4720_v20  ;;  %4109 = vmatprep.mubr.bf16.mxu0 %v3908_v1  ;;  %v3899_v31 = vsel %vm1468_vm3, %v3872_v56, %v3898_v22 }
 0x120   : > { %4133 = vmatprep.mubr.bf16.mxu1 %v3962_v24  ;;  %v4723_v21 = vpop.f32.mrf.mxu0 }
 0x121   : > { %v4770_v38 = vpop.f32.mrf.mxu1  ;;  %v1122_v28 = vadd.f32 %v4722_v48, %v6802_v49  ;;  %v3926_v49 = vsel %vm1468_vm3, %v3907_v26, %v6899_v34  ;;  %v3917_v34 = vsel %vm1468_vm3, %v3898_v22, %v6928_v25 }
 0x122   : > { %v4771_v63 = vadd.f32 %v4770_v38, %v4769_v5  ;;  %v4724_v61 = vpop.f32.mrf.mxu0 }
 0x123   : > { %v4772_v39 = vpop.f32.mrf.mxu1  ;;  %v6951_v44 = vadd.f32 %v4768_v35, %v1122_v28  ;;  %v4725_v42 = vadd.f32 %v4724_v61, %v4723_v21 }
 0x124   : > { %v4726_v43 = vpop.f32.mrf.mxu0 }
 0x125   : > { %v4773_v50 = vpop.f32.mrf.mxu1  ;;  %v1123_v53 = vadd.f32 %v4725_v42, %v6813_v23 }
 0x126   : > { %v4774_v11 = vadd.f32 %v4773_v50, %v4772_v39  ;;  %v4727_v45 = vpop.f32.mrf.mxu0  ;;  %4110 = vmatmul.mubr.bf16.gmra.mxu0 %v3899_v31 }
 0x127   : > { %v4775_v36 = vpop.f32.mrf.mxu1  ;;  %4134 = vmatmul.mubr.bf16.gmra.mxu1 %v3953_v52  ;;  %v6957_v30 = vadd.f32 %v4771_v63, %v1123_v53  ;;  %v4728_v12 = vadd.f32 %v4727_v45, %v4726_v43  ;;  %4117 = vmatprep.mubr.bf16.mxu0 %v3926_v49 }
 0x128   : > { %v4729_v62 = vpop.f32.mrf.mxu0 }
 0x129   : > { %v4776_v41 = vpop.f32.mrf.mxu1  ;;  %v1124_v58 = vadd.f32 %v4728_v12, %v6836_v6 }
 0x12a   : > { %v4777_v16 = vadd.f32 %v4776_v41, %v4775_v36  ;;  %v4730_v54 = vpop.f32.mrf.mxu0 }
 0x12b   : > { %v4778_v33 = vpop.f32.mrf.mxu1  ;;  %v6960_v2 = vadd.f32 %v4774_v11, %v1124_v58  ;;  %v4731_v60 = vadd.f32 %v4730_v54, %v4729_v62 }
 0x12c   : > { %v4732_v15 = vpop.f32.mrf.mxu0 }
 0x12d   : > { %v4779_v0 = vpop.f32.mrf.mxu1  ;;  %v1125_v18 = vadd.f32 %v4731_v60, %v6854_v14 }
 0x12e   : > { %v4780_v46 = vadd.f32 %v4779_v0, %v4778_v33  ;;  %v4733_v7 = vpop.f32.mrf.mxu0  ;;  %4118 = vmatmul.mubr.bf16.gmra.mxu0 %v3917_v34 }
 0x12f   : > { %v4781_v23 = vpop.f32.mrf.mxu1  ;;  %v6965_v24 = vadd.f32 %v4777_v16, %v1125_v18  ;;  %v4734_v6 = vadd.f32 %v4733_v7, %v4732_v15 }
 0x130   : > { %v4735_v35 = vpop.f32.mrf.mxu0 }
 0x131   : > { %v4782_v29 = vpop.f32.mrf.mxu1  ;;  %v1126_v37 = vadd.f32 %v4734_v6, %v6886_v57 }
 0x132   : > { %v4783_v27 = vadd.f32 %v4782_v29, %v4781_v23  ;;  %v4736_v5 = vpop.f32.mrf.mxu0 }
 0x133   : > { %v4784_v56 = vpop.f32.mrf.mxu1  ;;  %v6968_v19 = vadd.f32 %v4780_v46, %v1126_v37  ;;  %v4737_v14 = vadd.f32 %v4736_v5, %v4735_v35 }
 0x134   : > { %v4738_v10 = vpop.f32.mrf.mxu0 }
 0x135   : > { %v4785_v47 = vpop.f32.mrf.mxu1  ;;  %v1127_v25 = vadd.f32 %v4737_v14, %v6905_v17 }
 0x136   : > { %v4786_v3 = vadd.f32 %v4785_v47, %v4784_v56  ;;  %v4739_v38 = vpop.f32.mrf.mxu0 }
 0x137   : > { %v4787_v26 = vpop.f32.mrf.mxu1  ;;  %v6971_v63 = vadd.f32 %v4783_v27, %v1127_v25  ;;  %v4740_v4 = vadd.f32 %v4739_v38, %v4738_v10 }
 0x138   : > { %v4741_v59 = vpop.f32.mrf.mxu0 }
 0x139   : > { %v4788_v20 = vpop.f32.mrf.mxu1  ;;  %v1128_v57 = vadd.f32 %v4740_v4, %v6922_v51 }
 0x13a   : > { %v4789_v55 = vadd.f32 %v4788_v20, %v4787_v26  ;;  %v4742_v1 = vpop.f32.mrf.mxu0 }
 0x13b   : > { %v4790_v9 = vpop.f32.mrf.mxu1  ;;  %v6974_v52 = vadd.f32 %v4786_v3, %v1128_v57  ;;  %v4743_v21 = vadd.f32 %v4742_v1, %v4741_v59 }
 0x13c   : > { %v4744_v50 = vpop.f32.mrf.mxu0 }
 0x13d   : > { %v4791_v32 = vpop.f32.mrf.mxu1  ;;  %v1129_v17 = vadd.f32 %v4743_v21, %v6932_v13 }
 0x13e   : > { %v4792_v39 = vadd.f32 %v4791_v32, %v4790_v9  ;;  %v4745_v22 = vpop.f32.mrf.mxu0 }
 0x13f   : > { %v4855_v48 = vpop.f32.mrf.mxu1  ;;  %v6977_v36 = vadd.f32 %v4789_v55, %v1129_v17  ;;  %v4746_v42 = vadd.f32 %v4745_v22, %v4744_v50 }
 0x140   : > { %v4809_v43 = vpop.f32.mrf.mxu0 }
 0x141   : > { %v4856_v28 = vpop.f32.mrf.mxu1  ;;  %v1130_v51 = vadd.f32 %v4746_v42, %v6940_v8 }
 0x142   : > { %v4857_v11 = vadd.f32 %v4856_v28, %v4855_v48  ;;  %v4810_v31 = vpop.f32.mrf.mxu0 }
 0x143   : > { %v4858_v61 = vpop.f32.mrf.mxu1  ;;  %v6980_v45 = vadd.f32 %v4792_v39, %v1130_v51  ;;  %v4811_v33 = vadd.f32 %v4810_v31, %v4809_v43 }
 0x144   : > { %v4812_v49 = vpop.f32.mrf.mxu0 }
 0x145   : > { %v4859_v41 = vpop.f32.mrf.mxu1  ;;  %v1754_v13 = vadd.f32 %v4811_v33, %v6947_v40 }
 0x146   : > { %v4860_v53 = vadd.f32 %v4859_v41, %v4858_v61  ;;  %v4813_v0 = vpop.f32.mrf.mxu0 }
 0x147   : > { %v4861_v16 = vpop.f32.mrf.mxu1  ;;  %v6983_v46 = vadd.f32 %v4857_v11, %v1754_v13  ;;  %v4814_v54 = vadd.f32 %v4813_v0, %v4812_v49 }
 0x148   : > { %v4815_v23 = vpop.f32.mrf.mxu0 }
 0x149   : > { %v4862_v12 = vpop.f32.mrf.mxu1  ;;  %v1755_v8 = vadd.f32 %v4814_v54, %v6951_v44 }
 0x14a   : > { %v4863_v62 = vadd.f32 %v4862_v12, %v4861_v16  ;;  %v4816_v29 = vpop.f32.mrf.mxu0 }
 0x14b   : > { %v4864_v58 = vpop.f32.mrf.mxu1  ;;  %v6986_v34 = vadd.f32 %v4860_v53, %v1755_v8  ;;  %v4817_v27 = vadd.f32 %v4816_v29, %v4815_v23 }
 0x14c   : > { %v4818_v7 = vpop.f32.mrf.mxu0 }
 0x14d   : > { %v4865_v60 = vpop.f32.mrf.mxu1  ;;  %v1756_v40 = vadd.f32 %v4817_v27, %v6957_v30 }
 0x14e   : > { %v4866_v15 = vadd.f32 %v4865_v60, %v4864_v58  ;;  %v4819_v35 = vpop.f32.mrf.mxu0 }
 0x14f   : > { %v4867_v18 = vpop.f32.mrf.mxu1  ;;  %v6989_v37 = vadd.f32 %v4863_v62, %v1756_v40  ;;  %v4820_v3 = vadd.f32 %v4819_v35, %v4818_v7 }
 0x150   : > { %v4821_v5 = vpop.f32.mrf.mxu0 }
 0x151   : > { %v4868_v56 = vpop.f32.mrf.mxu1  ;;  %v1757_v44 = vadd.f32 %v4820_v3, %v6960_v2 }
 0x152   : > { %v4869_v6 = vadd.f32 %v4868_v56, %v4867_v18  ;;  %v4822_v10 = vpop.f32.mrf.mxu0 }
 0x153   : > { %v4870_v47 = vpop.f32.mrf.mxu1  ;;  %v6992_v25 = vadd.f32 %v4866_v15, %v1757_v44  ;;  %v4823_v55 = vadd.f32 %v4822_v10, %v4821_v5 }
 0x154   : > { %v4824_v38 = vpop.f32.mrf.mxu0 }
 0x155   : > { %v4871_v26 = vpop.f32.mrf.mxu1  ;;  %v1758_v30 = vadd.f32 %v4823_v55, %v6965_v24 }
 0x156   : > { %v4872_v14 = vadd.f32 %v4871_v26, %v4870_v47  ;;  %v4825_v59 = vpop.f32.mrf.mxu0 }
 0x157   : > { %v4873_v20 = vpop.f32.mrf.mxu1  ;;  %v6995_v57 = vadd.f32 %v4869_v6, %v1758_v30  ;;  %v4826_v39 = vadd.f32 %v4825_v59, %v4824_v38 }
 0x158   : > { %v4827_v1 = vpop.f32.mrf.mxu0 }
 0x159   : > { %v4874_v9 = vpop.f32.mrf.mxu1  ;;  %v1759_v2 = vadd.f32 %v4826_v39, %v6968_v19 }
 0x15a   : > { %v4875_v4 = vadd.f32 %v4874_v9, %v4873_v20  ;;  %v4828_v50 = vpop.f32.mrf.mxu0 }
 0x15b   : > { %v4876_v32 = vpop.f32.mrf.mxu1  ;;  %v6998_v17 = vadd.f32 %v4872_v14, %v1759_v2  ;;  %v4829_v11 = vadd.f32 %v4828_v50, %v4827_v1 }
 0x15c   : > { %v4830_v22 = vpop.f32.mrf.mxu0 }
 0x15d   : > { %v4877_v48 = vpop.f32.mrf.mxu1  ;;  %v1760_v24 = vadd.f32 %v4829_v11, %v6971_v63 }
 0x15e   : > { %v4878_v21 = vadd.f32 %v4877_v48, %v4876_v32  ;;  %v4831_v43 = vpop.f32.mrf.mxu0 }
 0x15f   : > { %v4879_v28 = vpop.f32.mrf.mxu1  ;;  %v7001_v51 = vadd.f32 %v4875_v4, %v1760_v24  ;;  %v4832_v53 = vadd.f32 %v4831_v43, %v4830_v22 }
 0x160   : > { %v4833_v31 = vpop.f32.mrf.mxu0 }
 0x161   : > { %v4880_v61 = vpop.f32.mrf.mxu1  ;;  %v1761_v19 = vadd.f32 %v4832_v53, %v6974_v52 }
 0x162   : > { %v4881_v42 = vadd.f32 %v4880_v61, %v4879_v28  ;;  %v4834_v49 = vpop.f32.mrf.mxu0 }
 0x163   : > { %v4882_v41 = vpop.f32.mrf.mxu1  ;;  %v7004_v13 = vadd.f32 %v4878_v21, %v1761_v19  ;;  %v4835_v62 = vadd.f32 %v4834_v49, %v4833_v31 }
 0x164   : > { %v4836_v0 = vpop.f32.mrf.mxu0 }
 0x165   : > { %v4883_v16 = vpop.f32.mrf.mxu1  ;;  %v1762_v63 = vadd.f32 %v4835_v62, %v6977_v36 }
 0x166   : > { %v4884_v33 = vadd.f32 %v4883_v16, %v4882_v41  ;;  %v4837_v23 = vpop.f32.mrf.mxu0 }
 0x167   : > { %v4947_v12 = vpop.f32.mrf.mxu1  ;;  %v7007_v8 = vadd.f32 %v4881_v42, %v1762_v63  ;;  %v4838_v15 = vadd.f32 %v4837_v23, %v4836_v0 }
 0x168   : > { %v4901_v29 = vpop.f32.mrf.mxu0 }
 0x169   : > { %v4948_v58 = vpop.f32.mrf.mxu1  ;;  %v1763_v52 = vadd.f32 %v4838_v15, %v6980_v45 }
 0x16a   : > { %v4949_v54 = vadd.f32 %v4948_v58, %v4947_v12  ;;  %v4902_v7 = vpop.f32.mrf.mxu0 }
 0x16b   : > { %v4950_v60 = vpop.f32.mrf.mxu1  ;;  %v7010_v40 = vadd.f32 %v4884_v33, %v1763_v52  ;;  %v4903_v6 = vadd.f32 %v4902_v7, %v4901_v29 }
 0x16c   : > { %v4904_v35 = vpop.f32.mrf.mxu0 }
 0x16d   : > { %v4951_v18 = vpop.f32.mrf.mxu1  ;;  %v2303_v36 = vadd.f32 %v4903_v6, %v6983_v46 }
 0x16e   : > { %v4952_v27 = vadd.f32 %v4951_v18, %v4950_v60  ;;  %v4905_v5 = vpop.f32.mrf.mxu0 }
 0x16f   : > { %v4953_v56 = vpop.f32.mrf.mxu1  ;;  %v7013_v44 = vadd.f32 %v4949_v54, %v2303_v36  ;;  %v4906_v14 = vadd.f32 %v4905_v5, %v4904_v35 }
 0x170   : > { %v4907_v10 = vpop.f32.mrf.mxu0 }
 0x171   : > { %v4954_v47 = vpop.f32.mrf.mxu1  ;;  %v2304_v45 = vadd.f32 %v4906_v14, %v6986_v34 }
 0x172   : > { %v4955_v3 = vadd.f32 %v4954_v47, %v4953_v56  ;;  %v4908_v38 = vpop.f32.mrf.mxu0 }
 0x173   : > { %v4956_v26 = vpop.f32.mrf.mxu1  ;;  %v7016_v30 = vadd.f32 %v4952_v27, %v2304_v45  ;;  %v4909_v4 = vadd.f32 %v4908_v38, %v4907_v10 }
 0x174   : > { %v4910_v59 = vpop.f32.mrf.mxu0 }
 0x175   : > { %v4957_v20 = vpop.f32.mrf.mxu1  ;;  %v2305_v46 = vadd.f32 %v4909_v4, %v6989_v37 }
 0x176   : > { %v4958_v55 = vadd.f32 %v4957_v20, %v4956_v26  ;;  %v4911_v1 = vpop.f32.mrf.mxu0 }
 0x177   : > { %v4959_v9 = vpop.f32.mrf.mxu1  ;;  %v7019_v2 = vadd.f32 %v4955_v3, %v2305_v46  ;;  %v4912_v21 = vadd.f32 %v4911_v1, %v4910_v59 }
 0x178   : > { %v4913_v50 = vpop.f32.mrf.mxu0 }
 0x179   : > { %v4960_v32 = vpop.f32.mrf.mxu1  ;;  %v2306_v34 = vadd.f32 %v4912_v21, %v6992_v25 }
 0x17a   : > { %v4961_v39 = vadd.f32 %v4960_v32, %v4959_v9  ;;  %v4914_v22 = vpop.f32.mrf.mxu0 }
 0x17b   : > { %v4962_v48 = vpop.f32.mrf.mxu1  ;;  %v7022_v24 = vadd.f32 %v4958_v55, %v2306_v34  ;;  %v4915_v42 = vadd.f32 %v4914_v22, %v4913_v50 }
 0x17c   : > { %v4916_v43 = vpop.f32.mrf.mxu0 }
 0x17d   : > { %v4963_v28 = vpop.f32.mrf.mxu1  ;;  %v2307_v37 = vadd.f32 %v4915_v42, %v6995_v57 }
 0x17e   : > { %v4964_v11 = vadd.f32 %v4963_v28, %v4962_v48  ;;  %v4917_v31 = vpop.f32.mrf.mxu0 }
 0x17f   : > { %v4965_v61 = vpop.f32.mrf.mxu1  ;;  %v7025_v19 = vadd.f32 %v4961_v39, %v2307_v37  ;;  %v4918_v33 = vadd.f32 %v4917_v31, %v4916_v43 }
 0x180   : > { %v4919_v49 = vpop.f32.mrf.mxu0 }
 0x181   : > { %v4966_v41 = vpop.f32.mrf.mxu1  ;;  %v2308_v25 = vadd.f32 %v4918_v33, %v6998_v17 }
 0x182   : > { %v4967_v53 = vadd.f32 %v4966_v41, %v4965_v61  ;;  %v4920_v0 = vpop.f32.mrf.mxu0 }
 0x183   : > { %v4968_v16 = vpop.f32.mrf.mxu1  ;;  %v7028_v63 = vadd.f32 %v4964_v11, %v2308_v25  ;;  %v4921_v54 = vadd.f32 %v4920_v0, %v4919_v49 }
 0x184   : > { %v4922_v23 = vpop.f32.mrf.mxu0 }
 0x185   : > { %v4969_v12 = vpop.f32.mrf.mxu1  ;;  %v2309_v57 = vadd.f32 %v4921_v54, %v7001_v51 }
 0x186   : > { %v4970_v62 = vadd.f32 %v4969_v12, %v4968_v16  ;;  %v4923_v29 = vpop.f32.mrf.mxu0 }
 0x187   : > { %v4971_v58 = vpop.f32.mrf.mxu1  ;;  %v7031_v52 = vadd.f32 %v4967_v53, %v2309_v57  ;;  %v4924_v27 = vadd.f32 %v4923_v29, %v4922_v23 }
 0x188   : > { %v4925_v7 = vpop.f32.mrf.mxu0 }
 0x189   : > { %v4972_v60 = vpop.f32.mrf.mxu1  ;;  %v2310_v17 = vadd.f32 %v4924_v27, %v7004_v13 }
 0x18a   : > { %v4973_v15 = vadd.f32 %v4972_v60, %v4971_v58  ;;  %v4926_v35 = vpop.f32.mrf.mxu0 }
 0x18b   : > { %v4974_v18 = vpop.f32.mrf.mxu1  ;;  %v7034_v36 = vadd.f32 %v4970_v62, %v2310_v17  ;;  %v4927_v3 = vadd.f32 %v4926_v35, %v4925_v7 }
 0x18c   : > { %v4928_v5 = vpop.f32.mrf.mxu0 }
 0x18d   : > { %v4975_v56 = vpop.f32.mrf.mxu1  ;;  %v2311_v51 = vadd.f32 %v4927_v3, %v7007_v8 }
 0x18e   : > { %v4976_v6 = vadd.f32 %v4975_v56, %v4974_v18  ;;  %v4929_v10 = vpop.f32.mrf.mxu0 }
 0x18f   : > { %v5039_v47 = vpop.f32.mrf.mxu1  ;;  %v7039_v45 = vadd.f32 %v4973_v15, %v2311_v51  ;;  %v4930_v55 = vadd.f32 %v4929_v10, %v4928_v5 }
 0x190   : > { %v4993_v38 = vpop.f32.mrf.mxu0 }
 0x191   : > { %v5040_v26 = vpop.f32.mrf.mxu1  ;;  %v2312_v13 = vadd.f32 %v4930_v55, %v7010_v40 }
 0x192   : > { %v7037_v14 = vadd.f32 %v5040_v26, %v5039_v47  ;;  %v4994_v59 = vpop.f32.mrf.mxu0 }
 0x193   : > { %v5042_v20 = vpop.f32.mrf.mxu1  ;;  %v7044_v46 = vadd.f32 %v4976_v6, %v2312_v13  ;;  %v4995_v39 = vadd.f32 %v4994_v59, %v4993_v38 }
 0x194   : > { %v4996_v1 = vpop.f32.mrf.mxu0 }
 0x195   : > { %v5043_v9 = vpop.f32.mrf.mxu1  ;;  %v7047_v48 = vadd.f32 %v4995_v39, %v7013_v44 }
 0x196   : > { %v7042_v4 = vadd.f32 %v5043_v9, %v5042_v20  ;;  %v4997_v50 = vpop.f32.mrf.mxu0 }
 0x197   : > { %v5045_v32 = vpop.f32.mrf.mxu1  ;;  %v4998_v34 = vadd.f32 %v4997_v50, %v4996_v1 }
 0x198   : > { %v4999_v11 = vpop.f32.mrf.mxu0 }
 0x199   : > { %v5046_v8 = vpop.f32.mrf.mxu1  ;;  %v7052_v40 = vadd.f32 %v4998_v34, %v7016_v30 }
 0x19a   : > { %v7049_v21 = vadd.f32 %v5046_v8, %v5045_v32  ;;  %v5000_v42 = vpop.f32.mrf.mxu0 }
 0x19b   : > { %v5048_v28 = vpop.f32.mrf.mxu1  ;;  %v5001_v41 = vadd.f32 %v5000_v42, %v4999_v11 }
 0x19c   : > { %v5002_v37 = vpop.f32.mrf.mxu0 }
 0x19d   : > { %v5049_v22 = vpop.f32.mrf.mxu1  ;;  %v7057_v44 = vadd.f32 %v5001_v41, %v7019_v2 }
 0x19e   : > { %v7054_v61 = vadd.f32 %v5049_v22, %v5048_v28  ;;  %v5003_v16 = vpop.f32.mrf.mxu0 }
 0x19f   : > { %v5051_v43 = vpop.f32.mrf.mxu1  ;;  %v5004_v49 = vadd.f32 %v5003_v16, %v5002_v37 }
 0x1a0   : > { %v5005_v12 = vpop.f32.mrf.mxu0 }
 0x1a1   : > { %v5052_v53 = vpop.f32.mrf.mxu1  ;;  %v7062_v30 = vadd.f32 %v5004_v49, %v7022_v24 }
 0x1a2   : > { %v7059_v31 = vadd.f32 %v5052_v53, %v5051_v43  ;;  %v5006_v0 = vpop.f32.mrf.mxu0  ;;  %v7133_v53 = vld [vmem:[%s7264_s2] ss:$0 sm:$0xff] }
 0x1a3   : > { %v5054_v33 = vpop.f32.mrf.mxu1  ;;  %v5007_v54 = vadd.f32 %v5006_v0, %v5005_v12  ;;  %v2904_v0 = vadd.f32 %v7133_v53, %v7047_v48 }
 0x1a4   : > { %7268 = vst [vmem:[#allocation2_spill] sm:$0xff] %v7059_v31  ;;  %v5008_v23 = vpop.f32.mrf.mxu0 }
 0x1a5   : > { %v5055_v25 = vpop.f32.mrf.mxu1  ;;  %v7071_v2 = vadd.f32 %v5007_v54, %v7025_v19  ;;  %v2905_v54 = vadd.f32 %v7133_v53, %v7052_v40  ;;  %vm2914_vm6 = vcmp.ge.f32.partialorder %v2904_v0, 0.0 }
 0x1a6   : > { %v7064_v62 = vadd.f32 %v5055_v25, %v5054_v33  ;;  %v5009_v57 = vpop.f32.mrf.mxu0 }
 0x1a7   : > { %v7066_v58 = vpop.f32.mrf.mxu1  ;;  %v5010_v29 = vadd.f32 %v5009_v57, %v5008_v23  ;;  %vm2915_vm7 = vcmp.ge.f32.partialorder %v2905_v54, 0.0 }
 0x1a8   : > { %7269 = vst [vmem:[#allocation3_spill] sm:$0xff] %v7064_v62  ;;  %v5011_v18 = vpop.f32.mrf.mxu0 }
 0x1a9   : > { %v7068_v60 = vpop.f32.mrf.mxu1  ;;  %v7078_v24 = vadd.f32 %v5010_v29, %v7028_v63 }
 0x1aa   : > { %v5012_v7 = vpop.f32.mrf.mxu0 }
 0x1ab   : > { %v7073_v15 = vpop.f32.mrf.mxu1  ;;  %7270 = vst [vmem:[#allocation4_spill] sm:$0xff] %v7078_v24  ;;  %v5013_v49 = vadd.f32 %v5012_v7, %v5011_v18  ;;  %v2925_v18 = vmul.f32 0.2, %v2905_v54  ;;  %v2906_v7 = vadd.f32 %v7133_v53, %v7057_v44  ;;  %v7155_v44 = vadd.f32 %v7133_v53, %v7062_v30 }
 0x1ac   : > { %v5014_v17 = vpop.f32.mrf.mxu0 }
 0x1ad   : > { %v7075_v27 = vpop.f32.mrf.mxu1  ;;  %v2893_v29 = vadd.f32 %v5013_v49, %v7031_v52  ;;  %v2926_v49 = vmul.f32 0.2, %v2906_v7  ;;  %vm2916_vm8 = vcmp.ge.f32.partialorder %v2906_v7, 0.0  ;;  %vm2917_vm14 = vcmp.ge.f32.partialorder %v7155_v44, 0.0 }
 0x1ae   : > { %v5015_v35 = vpop.f32.mrf.mxu0 }
 0x1af   : > { %v7080_v56 = vpop.f32.mrf.mxu1  ;;  %v5016_v62 = vadd.f32 %v5015_v35, %v5014_v17  ;;  %v2910_v48 = vadd.f32 %v7133_v53, %v2893_v29 }
 0x1b0   : > { %v5017_v19 = vpop.f32.mrf.mxu0 }
 0x1b1   : > { %v7082_v6 = vpop.f32.mrf.mxu1  ;;  %v2894_v40 = vadd.f32 %v5016_v62, %v7034_v36  ;;  %v2930_v29 = vmul.f32 0.2, %v2910_v48  ;;  %v5059_v36 = vadd.f32 %v7068_v60, %v7066_v58  ;;  %vm2920_vm9 = vcmp.ge.f32.partialorder %v2910_v48, 0.0 }
 0x1b2   : > { %v5018_v5 = vpop.f32.mrf.mxu0  ;;  %v5062_v58 = vadd.f32 %v7075_v27, %v7073_v15  ;;  %v5065_v60 = vadd.f32 %v7082_v6, %v7080_v56 }
 0x1b3   : > { %v7084_v47 = vpop.f32.mrf.mxu1 }
 0x1b4   : > { %v5020_v51 = vpop.f32.mrf.mxu0 }
 0x1b5   : > { %v7086_v3 = vpop.f32.mrf.mxu1 }
 0x1b6   : > { %v5021_v63 = vpop.f32.mrf.mxu0 }
 0x1b7   : > { %v7088_v26 = vpop.f32.mrf.mxu1  ;;  %v5022_v52 = vadd.f32 %v5021_v63, %v5020_v51 }
 0x1b8   : > { %v7094_v55 = vpop.f32.mrf.mxu0 }
 0x1b9   : > { %v7090_v10 = vpop.f32.mrf.mxu1  ;;  %v2896_v51 = vadd.f32 %v5022_v52, %v7044_v46 }
 0x1ba   : > { %v7098_v9 = vpop.f32.mrf.mxu0 }
 0x1bb   : > { %v7092_v20 = vpop.f32.mrf.mxu1 }
 0x1bc   : > { %v7102_v59 = vpop.f32.mrf.mxu0 }
 0x1bd   : > { %v7096_v38 = vpop.f32.mrf.mxu1 }
 0x1be   : > { %v7106_v39 = vpop.f32.mrf.mxu0 }
 0x1bf   : > { %v7100_v13 = vpop.f32.mrf.mxu1 }
 0x1c0   : > { %v7110_v8 = vpop.f32.mrf.mxu0 }
 0x1c1   : > { %v7104_v32 = vpop.f32.mrf.mxu1 }
 0x1c2   : > { %v7114_v28 = vpop.f32.mrf.mxu0 }
 0x1c3   : > { %v7108_v1 = vpop.f32.mrf.mxu1 }
 0x1c4   : > { %v7118_v11 = vpop.f32.mrf.mxu0 }
 0x1c5   : > { %v7112_v50 = vpop.f32.mrf.mxu1 }
 0x1c6   : > { %v7122_v42 = vpop.f32.mrf.mxu0 }
 0x1c7   : > { %v7116_v34 = vpop.f32.mrf.mxu1 }
 0x1c8   : > { %7271 = vst [vmem:[#allocation5_spill] sm:$0xff] %v7116_v34  ;;  %v7126_v41 = vpop.f32.mrf.mxu0  ;;  %v2924_v34 = vmul.f32 0.2, %v2904_v0 }
 0x1c9   : > { %v7120_v22 = vpop.f32.mrf.mxu1  ;;  %7274 = vst [vmem:[#allocation8_spill] sm:$0xff] %v7126_v41  ;;  %v2935_v41 = vsel %vm2915_vm7, %v2905_v54, %v2925_v18  ;;  %v7169_v54 = vmul.f32 0.2, %v7155_v44  ;;  %v7176_v18 = vsel %vm2916_vm8, %v2906_v7, %v2926_v49  ;;  %v5068_v7 = vadd.f32 %v7086_v3, %v7084_v47 }
 0x1ca   : > { %7272 = vst [vmem:[#allocation6_spill] sm:$0xff] %v7120_v22  ;;  %v7135_v16 = vpop.f32.mrf.mxu0 }
 0x1cb   : > { %v7124_v43 = vpop.f32.mrf.mxu1  ;;  %7276 = vst [vmem:[#allocation10_spill] sm:$0xff] %v7135_v16 }
 0x1cc   : > { %7273 = vst [vmem:[#allocation7_spill] sm:$0xff] %v7124_v43  ;;  %v7137_v12 = vpop.f32.mrf.mxu0 }
 0x1cd   : > { %v7128_v37 = vpop.f32.mrf.mxu1  ;;  %7277 = vst [vmem:[#allocation11_spill] sm:$0xff] %v7137_v12 }
 0x1ce   : > { %7275 = vst [vmem:[#allocation9_spill] sm:$0xff] %v7128_v37  ;;  %v7143_v23 = vpop.f32.mrf.mxu0  ;;  %v5019_v37 = vadd.f32 %v5018_v5, %v5017_v19  ;;  %v2934_v5 = vsel %vm2914_vm6, %v2904_v0, %v2924_v34  ;;  %v7166_v0 = vmul.f32 1.4142135, %v2935_v41  ;;  %v2940_v41 = vsel %vm2920_vm9, %v2910_v48, %v2930_v29 }
 0x1cf   : > { %v5149_v33 = vpop.f32.mrf.mxu1  ;;  %7278 = vst [vmem:[#allocation12_spill] sm:$0xff] %v7143_v23 }
 0x1d0   : > { %v5103_v43 = vpop.f32.mrf.mxu0  ;;  %v2895_v23 = vadd.f32 %v5019_v37, %v7039_v45  ;;  %v2911_v45 = vadd.f32 %v7133_v53, %v2894_v40 }
 0x1d1   : > { %v5150_v25 = vpop.f32.mrf.mxu1 }
 0x1d2   : > { %v5104_v12 = vpop.f32.mrf.mxu0  ;;  %v2912_v62 = vadd.f32 %v7133_v53, %v2895_v23  ;;  %v5151_v37 = vadd.f32 %v5150_v25, %v5149_v33  ;;  %v2931_v40 = vmul.f32 0.2, %v2911_v45  ;;  %v2913_v25 = vadd.f32 %v7133_v53, %v2896_v51 }
 0x1d3   : > { %v5152_v57 = vpop.f32.mrf.mxu1  ;;  %v5105_v19 = vadd.f32 %v5104_v12, %v5103_v43  ;;  %v7164_v43 = vmul.f32 1.4142135, %v2934_v5  ;;  %vm2921_vm11 = vcmp.ge.f32.partialorder %v2911_v45, 0.0  ;;  %v5133_v5 = vadd.f32 %v7090_v10, %v7088_v26 }
 0x1d4   : > { %v5106_v17 = vpop.f32.mrf.mxu0  ;;  %v2932_v33 = vmul.f32 0.2, %v2912_v62  ;;  %vm2922_vm12 = vcmp.ge.f32.partialorder %v2912_v62, 0.0  ;;  %v2941_v29 = vsel %vm2921_vm11, %v2911_v45, %v2931_v40  ;;  %v2933_v51 = vmul.f32 0.2, %v2913_v25 }
 0x1d5   : > { %v5153_v22 = vpop.f32.mrf.mxu1  ;;  %v3506_v30 = vadd.f32 %v5105_v19, %v5059_v36  ;;  %vm2923_vm13 = vcmp.ge.f32.partialorder %v2913_v25, 0.0 }
 0x1d6   : > { %v5107_v24 = vpop.f32.mrf.mxu0  ;;  %v5154_v52 = vadd.f32 %v5153_v22, %v5152_v57  ;;  %v2950_v22 = vmul.f32 1.4142135, %v2940_v41  ;;  %v2942_v36 = vsel %vm2922_vm12, %v2912_v62, %v2932_v33 }
 0x1d7   : > { %v7148_v31 = vpop.f32.mrf.mxu1  ;;  %v5108_v12 = vadd.f32 %v5107_v24, %v5106_v17  ;;  %v5087_v24 = vadd.f32 %v7098_v9, %v7094_v55  ;;  %v3815_v56 = vadd.f32 %v5151_v37, %v3506_v30  ;;  %v5090_v55 = vadd.f32 %v7106_v39, %v7102_v59 }
 0x1d8   : > { %v5109_v63 = vpop.f32.mrf.mxu0 }
 0x1d9   : > { %v5156_v35 = vpop.f32.mrf.mxu1  ;;  %v3509_v6 = vadd.f32 %v5108_v12, %v5062_v58  ;;  %v3482_v48 = vadd.f32 %v5087_v24, %v7037_v14  ;;  %v3485_v39 = vadd.f32 %v5090_v55, %v7042_v4  ;;  %v5136_v12 = vadd.f32 %v7096_v38, %v7092_v20 }
 0x1da   : > { %v5110_v46 = vpop.f32.mrf.mxu0  ;;  %v5093_v14 = vadd.f32 %v7114_v28, %v7110_v8  ;;  %v2952_v38 = vmul.f32 1.4142135, %v2942_v36  ;;  %v2943_v8 = vsel %vm2923_vm13, %v2913_v25, %v2933_v51 }
 0x1db   : > { %v7157_v16 = vpop.f32.mrf.mxu1  ;;  %v5111_v17 = vadd.f32 %v5110_v46, %v5109_v63  ;;  %v5157_v63 = vadd.f32 %v5156_v35, %v7148_v31  ;;  %v3816_v26 = vadd.f32 %v5154_v52, %v3509_v6  ;;  %v2951_v35 = vmul.f32 1.4142135, %v2941_v29 }
 0x1dc   : > { %v5112_v15 = vpop.f32.mrf.mxu0  ;;  %v3809_v62 = vadd.f32 %v5133_v5, %v3482_v48  ;;  %v3810_v52 = vadd.f32 %v5136_v12, %v3485_v39  ;;  %v7280_v48 = vld [vmem:[#allocation10_spill] sm:$0xff] }
 0x1dd   : > { %v5159_v34 = vpop.f32.mrf.mxu1  ;;  %v3514_v10 = vadd.f32 %v5111_v17, %v5065_v60  ;;  %v7282_v39 = vld [vmem:[#allocation2_spill] sm:$0xff] }
 0x1de   : > { %v5113_v9 = vpop.f32.mrf.mxu0 }
 0x1df   : > { %v5195_v23 = vpop.f32.mrf.mxu1  ;;  %v5114_v30 = vadd.f32 %v5113_v9, %v5112_v15  ;;  %v3817_v28 = vadd.f32 %v5157_v63, %v3514_v10  ;;  %v3490_v15 = vadd.f32 %v5093_v14, %v7049_v21  ;;  %v7284_v14 = vld [vmem:[#allocation6_spill] sm:$0xff] }
 0x1e0   : > { %v5177_v47 = vpop.f32.mrf.mxu0 }
 0x1e1   : > { %v5196_v27 = vpop.f32.mrf.mxu1  ;;  %v3517_v4 = vadd.f32 %v5114_v30, %v5068_v7  ;;  %v2908_v7 = vadd.f32 %v7133_v53, %v7071_v2  ;;  %v5142_v2 = vadd.f32 %v7112_v50, %v7108_v1 }
 0x1e2   : > { %v5197_v19 = vadd.f32 %v5196_v27, %v5195_v23  ;;  %v5178_v31 = vpop.f32.mrf.mxu0  ;;  %v5160_v23 = vadd.f32 %v5159_v34, %v7157_v16  ;;  %v5139_v27 = vadd.f32 %v7104_v32, %v7100_v13  ;;  %v5096_v16 = vadd.f32 %v7122_v42, %v7118_v11 }
 0x1e3   : > { %v5198_v57 = vpop.f32.mrf.mxu1  ;;  %v5179_v58 = vadd.f32 %v5178_v31, %v5177_v47  ;;  %v2953_v13 = vmul.f32 1.4142135, %v2943_v8  ;;  %v2928_v47 = vmul.f32 0.2, %v2908_v7  ;;  %vm2918_vm15 = vcmp.ge.f32.partialorder %v2908_v7, 0.0 }
 0x1e4   : > { %v4148_v49 = vadd.f32 %v5197_v19, %v3815_v56  ;;  %v5180_v20 = vpop.f32.mrf.mxu0  ;;  %v3818_v5 = vadd.f32 %v5160_v23, %v3517_v4 }
 0x1e5   : > { %v5199_v3 = vpop.f32.mrf.mxu1  ;;  %v4142_v33 = vadd.f32 %v5179_v58, %v3809_v62  ;;  %v7286_v62 = vld [vmem:[#allocation12_spill] sm:$0xff] }
 0x1e6   : > { %v4158_v37 = vadd.f32 %v4148_v49, %v2950_v22  ;;  %v5200_v59 = vadd.f32 %v5199_v3, %v5198_v57  ;;  %v5181_v34 = vpop.f32.mrf.mxu0  ;;  %v3493_v22 = vadd.f32 %v5096_v16, %v7054_v61  ;;  %v7279_v57 = vld [vmem:[#allocation8_spill] sm:$0xff]  ;;  %v2946_v3 = vmul.f32 1.4142135, %v7176_v18  ;;  %v7283_v18 = vld [vmem:[#allocation5_spill] sm:$0xff] }
 0x1e7   : > { %v5201_v45 = vpop.f32.mrf.mxu1  ;;  %v4152_v25 = vadd.f32 %v4142_v33, %v7164_v43  ;;  %v5182_v6 = vadd.f32 %v5181_v34, %v5180_v20  ;;  %v3811_v43 = vadd.f32 %v5139_v27, %v3490_v15  ;;  %v5099_v49 = vadd.f32 %v7280_v48, %v7279_v57 }
 0x1e8   : > { %v4168_v60 = vmul.f32 0.70710677, %v4158_v37  ;;  %v4149_v46 = vadd.f32 %v5200_v59, %v3816_v26  ;;  %v5183_v21 = vpop.f32.mrf.mxu0  ;;  %v2937_v61 = vsel %vm2917_vm14, %v7155_v44, %v7169_v54  ;;  %v3812_v59 = vadd.f32 %v5142_v2, %v3493_v22 }
 0x1e9   : > { %v5202_v40 = vpop.f32.mrf.mxu1  ;;  %v4162_v55 = vmul.f32 0.70710677, %v4152_v25  ;;  %v4143_v9 = vadd.f32 %v5182_v6, %v3810_v52  ;;  %v3498_v12 = vadd.f32 %v5099_v49, %v7282_v39  ;;  %v5145_v31 = vadd.f32 %v7284_v14, %v7283_v18 }
 0x1ea   : > { %4179 = vst.msk [vmem:[%s7198_s25 + $0x30] sm:$0xff] %vm4172_vm10, %v4168_v60  ;;  %v4159_v24 = vadd.f32 %v4149_v46, %v2951_v35  ;;  %v5203_v41 = vadd.f32 %v5202_v40, %v5201_v45  ;;  %v5184_v29 = vpop.f32.mrf.mxu0  ;;  %v7285_v45 = vld [vmem:[#allocation11_spill] sm:$0xff]  ;;  %v2947_v23 = vmul.f32 1.4142135, %v2937_v61  ;;  %v7288_v40 = vld [vmem:[#allocation9_spill] sm:$0xff] }
 0x1eb   : > { %v5204_v56 = vpop.f32.mrf.mxu1  ;;  %4173 = vst.msk [vmem:[%s7198_s25] sm:$0xff] %vm4172_vm10, %v4162_v55  ;;  %v4153_v36 = vadd.f32 %v4143_v9, %v7166_v0  ;;  %v5185_v51 = vadd.f32 %v5184_v29, %v5183_v21  ;;  %v7281_v0 = vld [vmem:[#allocation4_spill] sm:$0xff]  ;;  %v5102_v44 = vadd.f32 %v7286_v62, %v7285_v45 }
 0x1ec   : > { %v4169_v17 = vmul.f32 0.70710677, %v4159_v24  ;;  %v4150_v19 = vadd.f32 %v5203_v41, %v3817_v28  ;;  %v5186_v26 = vpop.f32.mrf.mxu0  ;;  %v2909_v37 = vadd.f32 %v7133_v53, %v7281_v0  ;;  %v2938_v28 = vsel %vm2918_vm15, %v2908_v7, %v2928_v47  ;;  %v7289_v41 = vld [vmem:[#allocation3_spill] sm:$0xff] }
 0x1ed   : > { %v5205_v32 = vpop.f32.mrf.mxu1  ;;  %v4163_v1 = vmul.f32 0.70710677, %v4153_v36  ;;  %v4144_v50 = vadd.f32 %v5185_v51, %v3811_v43  ;;  %v3813_v24 = vadd.f32 %v5145_v31, %v3498_v12  ;;  %v3501_v52 = vadd.f32 %v5102_v44, %v7289_v41 }
 0x1ee   : > { %4180 = vst.msk [vmem:[%s7198_s25 + $0x38] sm:$0xff] %vm4172_vm10, %v4169_v17  ;;  %v4160_v11 = vadd.f32 %v4150_v19, %v2952_v38  ;;  %v5206_v42 = vadd.f32 %v5205_v32, %v5204_v56  ;;  %v5187_v35 = vpop.f32.mrf.mxu0  ;;  %v2929_v20 = vmul.f32 0.2, %v2909_v37  ;;  %v7287_v38 = vld [vmem:[#allocation7_spill] sm:$0xff]  ;;  %vm2919_vm0 = vcmp.ge.f32.partialorder %v2909_v37, 0.0 }
 0x1ef   : > { %4174 = vst.msk [vmem:[%s7198_s25 + $0x8] sm:$0xff] %vm4172_vm10, %v4163_v1  ;;  %v4154_v54 = vadd.f32 %v4144_v50, %v2946_v3  ;;  %v5188_v58 = vadd.f32 %v5187_v35, %v5186_v26  ;;  %v5148_v8 = vadd.f32 %v7288_v40, %v7287_v38  ;;  %v2948_v56 = vmul.f32 1.4142135, %v2938_v28 }
 0x1f0   : > { %v4170_v63 = vmul.f32 0.70710677, %v4160_v11  ;;  %v4151_v30 = vadd.f32 %v5206_v42, %v3818_v5  ;;  %v5189_v46 = vpop.f32.mrf.mxu0  ;;  %v2939_v6 = vsel %vm2919_vm0, %v2909_v37, %v2929_v20 }
 0x1f1   : > { %v4164_v4 = vmul.f32 0.70710677, %v4154_v54  ;;  %v4145_v53 = vadd.f32 %v5188_v58, %v3812_v59  ;;  %v3814_v19 = vadd.f32 %v5148_v8, %v3501_v52 }
 0x1f2   : > { %4181 = vst.msk [vmem:[%s7198_s25 + $0x40] sm:$0xff] %vm4172_vm10, %v4170_v63  ;;  %v4161_v10 = vadd.f32 %v4151_v30, %v2953_v13  ;;  %v5190_v33 = vpop.f32.mrf.mxu0  ;;  %v2949_v13 = vmul.f32 1.4142135, %v2939_v6 }
 0x1f3   : > { %4175 = vst.msk [vmem:[%s7198_s25 + $0x10] sm:$0xff] %vm4172_vm10, %v4164_v4  ;;  %v4155_v15 = vadd.f32 %v4145_v53, %v2947_v23  ;;  %v5191_v27 = vadd.f32 %v5190_v33, %v5189_v46 }
 0x1f4   : > { %v4171_v60 = vmul.f32 0.70710677, %v4161_v10  ;;  %v5192_v16 = vpop.f32.mrf.mxu0 }
 0x1f5   : > { %v4165_v34 = vmul.f32 0.70710677, %v4155_v15  ;;  %v4146_v25 = vadd.f32 %v5191_v27, %v3813_v24 }
 0x1f6   : > { %4182 = vst.msk [vmem:[%s7198_s25 + $0x48] sm:$0xff] %vm4172_vm10, %v4171_v60  ;;  %v5193_v17 = vpop.f32.mrf.mxu0 }
 0x1f7   : > { %4176 = vst.msk [vmem:[%s7198_s25 + $0x18] sm:$0xff] %vm4172_vm10, %v4165_v34  ;;  %v4156_v7 = vadd.f32 %v4146_v25, %v2948_v56  ;;  %v5194_v5 = vadd.f32 %v5193_v17, %v5192_v16 }
 0x1f9   : > { %v4166_v21 = vmul.f32 0.70710677, %v4156_v7  ;;  %v4147_v32 = vadd.f32 %v5194_v5, %v3814_v19 }
 0x1fb   : > { %4177 = vst.msk [vmem:[%s7198_s25 + $0x20] sm:$0xff] %vm4172_vm10, %v4166_v21  ;;  %v4157_v55 = vadd.f32 %v4147_v32, %v2949_v13 }
 0x1fd   : > { %v4167_v9 = vmul.f32 0.70710677, %v4157_v55 }
 0x1ff   : > { %4178 = vst.msk [vmem:[%s7198_s25 + $0x28] sm:$0xff] %vm4172_vm10, %v4167_v9 }
 0x200 PF: > { %s15_s20 = sadd.s32 1, %s5556_s20   ;;  %s7290_s18 = smov %s5552_s19 }
 0x201   : > { %p12_p5 = scmp.ge.s32.totalorder %s15_s20, 4   ;;  %s7291_s19 = smov %s7293_s21 }
 0x203   :  { %14 = sbr.rel (!%p12_p5) target bundleno = 2 (0x2), region = 82 }

</bundles_post_ra>
